<compile_context>
chip_gen: v7x
topology: tpu7x:2x2x1
jax: 0.10.0
libtpu: 0.0.40
codegen_flags: <defaults>
</compile_context>

<pallas_src>
import functools

import numpy as np
import jax
import jax.numpy as jnp
from jax.experimental import pallas as pl
from jax.experimental.pallas import tpu as pltpu


# pl.reciprocal(approx=True) routes the attention-softmax divide to the fast EUP vrcp,
# but its extra relative error can flip greedy near-ties vs. the exact reference; keep
# it exact for the bit-faithful self-test (flip to True when benchmarking).
_APPROX_RECIPROCAL = False

# Elementwise dtype for the per-step (B,S,H) tanh / score path.  jnp.bfloat16 roughly
# halves the EUP/VPU binding slot on v6e/v7x but may flip greedy argmax on near-ties
# (and only adds pack/unpack work on v5e), so the default stays f32.
_EW_DTYPE = jnp.float32


def _sigmoid(x):
    return 1.0 / (1.0 + jnp.exp(-x))


def _softmax_lanes(x):
    """Softmax over the (lane) last axis, explicit EUP reciprocal."""
    m = jnp.max(x, axis=-1, keepdims=True)
    ez = jnp.exp(x - m)
    return ez * pl.reciprocal(jnp.sum(ez, axis=-1, keepdims=True),
                              approx=_APPROX_RECIPROCAL)


# ----------------------------------------------------------------------------------
# Pallas kernel: one batch tile, whole decode loop (encoders + split GRU + attention
# + pointer) resident in VMEM.
# ----------------------------------------------------------------------------------
def drl4tsp_kernel(
    static_ref,     # (TB, S, Cs) f32
    dynamic_ref,    # (TB, S, Cd) f32
    wse_ref,        # (Cs, H)  static encoder (pre-transposed)
    bse_ref,        # (1, H)
    wda_ref,        # (Cd, H)  dynamic encoder folded into attention W_d slice
    bda_ref,        # (1, H)
    wdec_ref,       # (Cs, H)  decoder-input encoder
    bdec_ref,       # (1, H)
    wih_ref,        # (H, 3H)  GRU input->gates weights  [r|z|n], pre-transposed
    whh_ref,        # (H, 3H)  GRU hidden->gates weights [r|z|n], pre-transposed
    bih_ref,        # (1, 3H)
    bhh_ref,        # (1, 3H)
    was_ref,        # (H, H)   attention W, static slice
    wah_ref,        # (H, H)   attention W, rnn-out slice
    vatt_ref,       # (1, H)
    wps_ref,        # (H, H)   pointer W, static slice
    wpc_ref,        # (H, H)   pointer W, context slice
    vptr_ref,       # (1, H)
    x0_ref,         # (1, Cs)  initial decoder input (zeros)
    tour_idx_ref,   # (TB, S) int32 out
    tour_logp_ref,  # (TB, S) f32   out
):
    f32 = jnp.float32
    B, S, Cs = static_ref.shape          # B == batch tile
    Cd = dynamic_ref.shape[-1]
    H = bse_ref.shape[1]
    ew = _EW_DTYPE

    st2 = static_ref[...].reshape(B * S, Cs)      # view when S % 8 == 0
    dy2 = dynamic_ref[...].reshape(B * S, Cd)

    wdec = wdec_ref[...]
    bdec = bdec_ref[...]

    # ---- one-time encoder / projection work (MXU) -------------------------------
    sh2 = jnp.dot(st2, wse_ref[...], preferred_element_type=f32) + bse_ref[...]   # (B*S,H)
    # dynamic encoder is pre-folded into wda/bda: dy @ (Wd^T Wad^T) + b_d Wad^T
    u2 = (jnp.dot(sh2, was_ref[...], preferred_element_type=f32)
          + jnp.dot(dy2, wda_ref[...], preferred_element_type=f32)
          + bda_ref[...])                                                          # (B*S,H)
    p2 = jnp.dot(sh2, wps_ref[...], preferred_element_type=f32)                    # (B*S,H)
    # decoder-input encoder hoisted out of the loop: x_all[b,s] = decoder(static[b,:,s])
    x2 = jnp.dot(st2, wdec, preferred_element_type=f32) + bdec                     # (B*S,H)

    sh = sh2.reshape(B, S, H)
    x_all = x2.reshape(B, S, H)
    u_sd = u2.reshape(B, S, H).astype(ew)
    p_st = p2.reshape(B, S, H).astype(ew)

    wih = wih_ref[...]
    whh = whh_ref[...]
    bih = bih_ref[...]
    bhh = bhh_ref[...]
    wah = wah_ref[...]
    wpc = wpc_ref[...]

    # (1,1,H) stride-0 / lane-replicated operands instead of materialized (TB,S,H)
    # broadcasts (frees 2*TB*S*H*4 bytes of resident VMEM and two full read streams).
    v_att3 = vatt_ref[...].reshape(1, 1, H).astype(ew)
    v_ptr3 = vptr_ref[...].reshape(1, 1, H).astype(ew)
    iota_s = jax.lax.broadcasted_iota(jnp.int32, (B, S), 1)

    def step(t, carry):
        hh, x, idx_acc, logp_acc = carry          # (B,H), (B,H), (B,S)i32, (B,S)f32

        # single-step GRU, no per-step concat: two K=H dots accumulated in the gates
        # (same gate order r|z|n as torch.nn.GRU).
        gi = jnp.dot(x, wih, preferred_element_type=f32) + bih                     # (B,3H)
        gh = jnp.dot(hh, whh, preferred_element_type=f32) + bhh                    # (B,3H)
        r = _sigmoid(gi[:, :H] + gh[:, :H])
        z = _sigmoid(gi[:, H:2 * H] + gh[:, H:2 * H])
        n = jnp.tanh(gi[:, 2 * H:] + r * gh[:, 2 * H:])
        rnn_out = (1.0 - z) * n + z * hh                                           # (B,H)

        # attention over encoder states: softmax_s( v_att . tanh(W[sh;dh;rnn]) )
        u_h = jnp.dot(rnn_out, wah, preferred_element_type=f32)                    # (B,H)
        e = jnp.tanh(u_sd + u_h.astype(ew)[:, None, :])                            # (B,S,H)
        att = _softmax_lanes(jnp.sum((e * v_att3).astype(f32), axis=-1))           # (B,S)

        # context = att @ static_hidden; batched (1,S)@(S,H) on the MXU, which has
        # slack (the EUP tanh passes are the binder).  VPU/XLU alternative:
        #   jnp.sum(att[:, :, None] * sh, axis=1)
        context = jnp.einsum("bks,bsh->bkh", att[:, None, :], sh,
                             preferred_element_type=f32)[:, 0, :]                  # (B,H)

        # pointer scores: v_ptr . tanh(W[sh; context]); mask.log() == 0 (all-ones mask)
        p_ctx = jnp.dot(context, wpc, preferred_element_type=f32)                  # (B,H)
        pe = jnp.tanh(p_st + p_ctx.astype(ew)[:, None, :])                         # (B,S,H)
        ptr_sc = jnp.sum((pe * v_ptr3).astype(f32), axis=-1)                       # (B,S)

        # greedy (eval-mode) first-max selection; logp = log(max softmax) = -logsumexp
        m_p = jnp.max(ptr_sc, axis=-1, keepdims=True)                              # (B,1)
        ptr = jnp.min(jnp.where(ptr_sc >= m_p, iota_s, S), axis=-1)                # (B,)
        logp = -jnp.log(jnp.sum(jnp.exp(ptr_sc - m_p), axis=-1))                   # (B,)

        # accumulate outputs in (B,S) carries (cheap VPU selects) -- no per-step
        # sublane->lane relayout and no per-step masked row stores.
        sel = iota_s == t
        idx_acc = jnp.where(sel, ptr[:, None], idx_acc)
        logp_acc = jnp.where(sel, logp[:, None], logp_acc)

        # next encoded decoder input: one-hot gather of the precomputed x_all (MXU)
        onehot = (iota_s == ptr[:, None]).astype(f32)                              # (B,S)
        x_next = jnp.einsum("bks,bsh->bkh", onehot[:, None, :], x_all,
                            preferred_element_type=f32)[:, 0, :]                   # (B,H)
        return rnn_out, x_next, idx_acc, logp_acc

    hh0 = jnp.zeros((B, H), f32)                               # last_hh = None -> zeros
    x0 = jnp.broadcast_to(
        jnp.dot(x0_ref[...], wdec, preferred_element_type=f32) + bdec, (B, H))
    idx0 = jnp.zeros((B, S), jnp.int32)
    lp0 = jnp.zeros((B, S), f32)

    _, _, idx_acc, logp_acc = jax.lax.fori_loop(0, S, step, (hh0, x0, idx0, lp0))

    # single block store per tile
    tour_idx_ref[...] = idx_acc
    tour_logp_ref[...] = logp_acc
    # TODO(synk): training-mode Categorical sampling + rejection loop, update_fn /
    #             mask_fn callbacks and the data-dependent early break have no clean
    #             in-kernel equivalent; default config (None, eval) is implemented.


# ----------------------------------------------------------------------------------
# tiling heuristics (generation-aware)
# ----------------------------------------------------------------------------------
def _vmem_capacity_bytes():
    try:
        info = pltpu.get_tpu_info()
        cap = int(getattr(info, "vmem_capacity_bytes", 0))
        if cap > 0:
            return cap
    except Exception:
        pass
    return 64 << 20   # conservative fallback: v7x has 64 MiB per TensorCore


def _vmem_bytes(tb, S, H, Cs, Cd, weight_bytes):
    f = 4
    lane_s = max(S, 128)                              # lane-padded (.,S) allocations
    resident = 4 * tb * S * H * f                     # sh, u_sd, p_st, x_all
    transient = 2 * tb * S * H * f                    # e / pe temporaries per step
    inputs = 2 * 2 * tb * S * (Cs + Cd) * f           # double-buffered static/dynamic
    outputs = 2 * 2 * tb * lane_s * f                 # double-buffered (TB,S) idx/logp
    carries = 2 * tb * lane_s * f + 2 * tb * H * f    # idx/logp accumulators, hh, x
    total = resident + transient + inputs + outputs + carries + 2 * weight_bytes
    return int(total * 1.25) + (2 << 20)              # Mosaic internal-scratch headroom


def _pick_batch_tile(B, S, H, Cs, Cd, weight_bytes, budget):
    """Largest fitting divisor of B, preferring nb>=2 grid steps (keeps both v7x
    TensorCores busy / keeps the pipeline warm) and lane-dense multiples of 256/128."""
    fitting = [d for d in range(1, B + 1)
               if B % d == 0 and _vmem_bytes(d, S, H, Cs, Cd, weight_bytes) <= budget]
    if not fitting:
        return 1

    def score(d):
        nb = B // d
        lane_tier = 3 if d % 256 == 0 else 2 if d % 128 == 0 else 1 if d % 8 == 0 else 0
        return (nb >= 2, lane_tier, d)

    return max(fitting, key=score)


# ----------------------------------------------------------------------------------
# wrapper: weight folding / fusion, layout glue, pallas_call with a batch grid
# ----------------------------------------------------------------------------------
def drl4tsp_forward(params, static, dynamic, batch_tile=None):
    """static: (B, Cs, S), dynamic: (B, Cd, S)  -- PyTorch NCW layout."""
    B, Cs, S = static.shape
    Cd = dynamic.shape[1]
    H = params["w_enc_s"].shape[0]
    assert H % 128 == 0, "hidden_size must be a multiple of 128 (lane-aligned gate slices)"
    assert S % 8 == 0, "sequence_size must be a multiple of 8 (sublane-aligned reshapes)"

    static_t = jnp.transpose(static, (0, 2, 1)).astype(jnp.float32)     # (B, S, Cs)
    dynamic_t = jnp.transpose(dynamic, (0, 2, 1)).astype(jnp.float32)   # (B, S, Cd)

    w_att = params["w_att"]          # (H, 3H): [static | dynamic | rnn]
    w_ptr = params["w_ptr"]          # (H, 2H): [static | context]

    # fold the dynamic encoder into the attention "dynamic" slice
    wad_T = w_att[:, H:2 * H].T                                  # (H, H)
    w_dyn_att = params["w_enc_d"].T @ wad_T                      # (Cd, H)
    b_dyn_att = params["b_enc_d"] @ wad_T                        # (1, H)

    args = (
        static_t, dynamic_t,
        params["w_enc_s"].T, params["b_enc_s"],
        w_dyn_att, b_dyn_att,
        params["w_dec"].T, params["b_dec"],
        params["w_ih"].T, params["w_hh"].T, params["b_ih"], params["b_hh"],
        w_att[:, :H].T, w_att[:, 2 * H:].T, params["v_att"],
        w_ptr[:, :H].T, w_ptr[:, H:].T, params["v_ptr"],
        params["x0"],
    )

    weight_bytes = sum(int(a.size) * a.dtype.itemsize for a in args[2:])
    cap = _vmem_capacity_bytes()
    budget = max(16 << 20, min(int(cap * 0.45), 56 << 20))
    if batch_tile is None:
        batch_tile = _pick_batch_tile(B, S, H, Cs, Cd, weight_bytes, budget)
    assert B % batch_tile == 0, "batch must be divisible by batch_tile"
    tb = batch_tile
    nb = B // tb

    def _tiled_spec(shape):                      # batch-tiled tensor input
        return pl.BlockSpec((tb,) + tuple(shape[1:]), lambda b: (b, 0, 0))

    def _full_spec(shape):                       # replicated weight (whole array)
        return pl.BlockSpec(tuple(shape), lambda b, _n=len(shape): (0,) * _n)

    in_specs = ([_tiled_spec(static_t.shape), _tiled_spec(dynamic_t.shape)]
                + [_full_spec(a.shape) for a in args[2:]])

    need = _vmem_bytes(tb, S, H, Cs, Cd, weight_bytes)
    # keep the request below the physical per-core VMEM (cap - 8 MiB headroom;
    # this lands at <=56 MiB on v7x and <=100 MiB on v5e/v6e).
    vmem_limit = int(max(16 << 20,
                         min(max(need, 32 << 20), cap - (8 << 20), 100 << 20)))

    tour_idx_blk, tour_logp_blk = pl.pallas_call(
        drl4tsp_kernel,
        grid=(nb,),
        out_shape=(
            jax.ShapeDtypeStruct((nb, tb, S), jnp.int32),
            jax.ShapeDtypeStruct((nb, tb, S), jnp.float32),
        ),
        in_specs=in_specs,
        out_specs=(
            pl.BlockSpec((None, tb, S), lambda b: (b, 0, 0)),
            pl.BlockSpec((None, tb, S), lambda b: (b, 0, 0)),
        ),
        compiler_params=pltpu.CompilerParams(
            dimension_semantics=("parallel",),
            vmem_limit_bytes=vmem_limit,
        ),
    )(*args)

    # (nb, tb, S) -> (B, S) is a pure reshape (no transpose needed anywhere)
    return tour_idx_blk.reshape(B, S), tour_logp_blk.reshape(B, S)


# ----------------------------------------------------------------------------------
# pure-JAX reference (mirrors the PyTorch forward, eval mode, no update/mask fn)
# ----------------------------------------------------------------------------------
def _softmax_ref(x):
    m = jnp.max(x, axis=-1, keepdims=True)
    e = jnp.exp(x - m)
    return e / jnp.sum(e, axis=-1, keepdims=True)


def reference_forward(params, static, dynamic):
    B, Cs, S = static.shape
    H = params["w_enc_s"].shape[0]
    st = jnp.transpose(static, (0, 2, 1))
    dy = jnp.transpose(dynamic, (0, 2, 1))
    sh = jnp.einsum("bsc,hc->bsh", st, params["w_enc_s"]) + params["b_enc_s"]
    dh = jnp.einsum("bsc,hc->bsh", dy, params["w_enc_d"]) + params["b_enc_d"]
    w_att, w_ptr = params["w_att"], params["w_ptr"]
    w_s, w_d, w_h = w_att[:, :H], w_att[:, H:2 * H], w_att[:, 2 * H:]
    wp_s, wp_c = w_ptr[:, :H], w_ptr[:, H:]
    v_att, v_ptr = params["v_att"][0], params["v_ptr"][0]
    u_sd = jnp.einsum("bsj,ij->bsi", sh, w_s) + jnp.einsum("bsj,ij->bsi", dh, w_d)
    p_st = jnp.einsum("bsj,ij->bsi", sh, wp_s)

    hh = jnp.zeros((B, H), jnp.float32)
    dec_in = jnp.broadcast_to(params["x0"], (B, Cs))
    idxs, logps = [], []
    for _ in range(S):
        x = dec_in @ params["w_dec"].T + params["b_dec"]
        gi = x @ params["w_ih"].T + params["b_ih"]
        gh = hh @ params["w_hh"].T + params["b_hh"]
        r = _sigmoid(gi[:, :H] + gh[:, :H])
        z = _sigmoid(gi[:, H:2 * H] + gh[:, H:2 * H])
        n = jnp.tanh(gi[:, 2 * H:] + r * gh[:, 2 * H:])
        hh = (1.0 - z) * n + z * hh
        e = jnp.tanh(u_sd + (hh @ w_h.T)[:, None, :])
        att = _softmax_ref(jnp.einsum("bsi,i->bs", e, v_att))
        context = jnp.einsum("bs,bsh->bh", att, sh)
        pe = jnp.tanh(p_st + (context @ wp_c.T)[:, None, :])
        probs = _softmax_ref(jnp.einsum("bsi,i->bs", pe, v_ptr))
        ptr = jnp.argmax(probs, axis=-1)
        idxs.append(ptr.astype(jnp.int32))
        logps.append(jnp.log(jnp.max(probs, axis=-1)))
        dec_in = jnp.take_along_axis(st, ptr[:, None, None], axis=1)[:, 0, :]
    return jnp.stack(idxs, axis=1), jnp.stack(logps, axis=1)


# ----------------------------------------------------------------------------------
# deterministic parameter init (xavier-like for >1D weights; zeros for x0)
# ----------------------------------------------------------------------------------
def init_params(key, static_size, dynamic_size, hidden):
    H = hidden
    ks = jax.random.split(key, 14)

    def xavier(k, shape):
        fan_out, fan_in = shape[-2], shape[-1]
        lim = float(np.sqrt(6.0 / (fan_in + fan_out)))
        return jax.random.uniform(k, shape, jnp.float32, -lim, lim)

    def unif(k, shape, s=0.1):
        return jax.random.uniform(k, shape, jnp.float32, -s, s)

    return dict(
        w_enc_s=xavier(ks[0], (H, static_size)),   b_enc_s=unif(ks[1], (1, H)),
        w_enc_d=xavier(ks[2], (H, dynamic_size)),  b_enc_d=unif(ks[3], (1, H)),
        w_dec=xavier(ks[4], (H, static_size)),     b_dec=unif(ks[5], (1, H)),
        w_ih=xavier(ks[6], (3 * H, H)),            b_ih=unif(ks[7], (1, 3 * H)),
        w_hh=xavier(ks[8], (3 * H, H)),            b_hh=unif(ks[9], (1, 3 * H)),
        w_att=xavier(ks[10], (H, 3 * H)),          v_att=xavier(ks[11], (1, H)),
        w_ptr=xavier(ks[12], (H, 2 * H)),          v_ptr=xavier(ks[13], (1, H)),
        x0=jnp.zeros((1, static_size), jnp.float32),
    )


if __name__ == "__main__":
    key = jax.random.PRNGKey(0)
    # small but lane-friendly shapes: H multiple of 128, S multiple of 8,
    # batch_tile=4 -> grid=(2,) actually exercises the batch tiling.
    B, Cs, Cd, S, H = 8, 2, 2, 16, 128
    k_s, k_d, k_p = jax.random.split(key, 3)
    static = jax.random.uniform(k_s, (B, Cs, S), jnp.float32)
    dynamic = jax.random.uniform(k_d, (B, Cd, S), jnp.float32)
    params = init_params(k_p, Cs, Cd, H)

    fwd = jax.jit(functools.partial(drl4tsp_forward, batch_tile=4))
    tour_idx, tour_logp = fwd(params, static, dynamic)
    jax.block_until_ready((tour_idx, tour_logp))

    ref_idx, ref_logp = reference_forward(params, static, dynamic)
    assert tour_idx.shape == (B, S) and tour_logp.shape == (B, S)
    np.testing.assert_array_equal(np.asarray(tour_idx), np.asarray(ref_idx))
    np.testing.assert_allclose(np.asarray(tour_logp), np.asarray(ref_logp),
                               rtol=5e-4, atol=5e-4)
    print("KERNEL_OK")
</pallas_src>

<mosaic_0001>
module attributes {stable_mosaic.version = 11 : i64} {
  func.func @drl4tsp_kernel(%arg0: i32, %arg1: memref<4x16x2xf32, #tpu.memory_space<vmem>>, %arg2: memref<4x16x2xf32, #tpu.memory_space<vmem>>, %arg3: memref<2x128xf32, #tpu.memory_space<vmem>>, %arg4: memref<1x128xf32, #tpu.memory_space<vmem>>, %arg5: memref<2x128xf32, #tpu.memory_space<vmem>>, %arg6: memref<1x128xf32, #tpu.memory_space<vmem>>, %arg7: memref<2x128xf32, #tpu.memory_space<vmem>>, %arg8: memref<1x128xf32, #tpu.memory_space<vmem>>, %arg9: memref<128x384xf32, #tpu.memory_space<vmem>>, %arg10: memref<128x384xf32, #tpu.memory_space<vmem>>, %arg11: memref<1x384xf32, #tpu.memory_space<vmem>>, %arg12: memref<1x384xf32, #tpu.memory_space<vmem>>, %arg13: memref<128x128xf32, #tpu.memory_space<vmem>>, %arg14: memref<128x128xf32, #tpu.memory_space<vmem>>, %arg15: memref<1x128xf32, #tpu.memory_space<vmem>>, %arg16: memref<128x128xf32, #tpu.memory_space<vmem>>, %arg17: memref<128x128xf32, #tpu.memory_space<vmem>>, %arg18: memref<1x128xf32, #tpu.memory_space<vmem>>, %arg19: memref<1x2xf32, #tpu.memory_space<vmem>>, %arg20: memref<1x4x16xi32, #tpu.memory_space<vmem>>, %arg21: memref<1x4x16xf32, #tpu.memory_space<vmem>>) attributes {dimension_semantics = [#tpu.dimension_semantics<parallel>], iteration_bounds = array<i64: 2>, scalar_prefetch = 0 : i64, scratch_operands = 0 : i64, tpu.core_type = #tpu.core_type<tc>, window_params = [{transform_indices = @transform_0, window_bounds = array<i64: 4, 16, 2>}, {transform_indices = @transform_1, window_bounds = array<i64: 4, 16, 2>}, {pipeline_mode = #tpu.pipeline_mode<synchronous>, transform_indices = @transform_2, window_bounds = array<i64: 2, 128>}, {pipeline_mode = #tpu.pipeline_mode<synchronous>, transform_indices = @transform_3, window_bounds = array<i64: 1, 128>}, {pipeline_mode = #tpu.pipeline_mode<synchronous>, transform_indices = @transform_4, window_bounds = array<i64: 2, 128>}, {pipeline_mode = #tpu.pipeline_mode<synchronous>, transform_indices = @transform_5, window_bounds = array<i64: 1, 128>}, {pipeline_mode = #tpu.pipeline_mode<synchronous>, transform_indices = @transform_6, window_bounds = array<i64: 2, 128>}, {pipeline_mode = #tpu.pipeline_mode<synchronous>, transform_indices = @transform_7, window_bounds = array<i64: 1, 128>}, {pipeline_mode = #tpu.pipeline_mode<synchronous>, transform_indices = @transform_8, window_bounds = array<i64: 128, 384>}, {pipeline_mode = #tpu.pipeline_mode<synchronous>, transform_indices = @transform_9, window_bounds = array<i64: 128, 384>}, {pipeline_mode = #tpu.pipeline_mode<synchronous>, transform_indices = @transform_10, window_bounds = array<i64: 1, 384>}, {pipeline_mode = #tpu.pipeline_mode<synchronous>, transform_indices = @transform_11, window_bounds = array<i64: 1, 384>}, {pipeline_mode = #tpu.pipeline_mode<synchronous>, transform_indices = @transform_12, window_bounds = array<i64: 128, 128>}, {pipeline_mode = #tpu.pipeline_mode<synchronous>, transform_indices = @transform_13, window_bounds = array<i64: 128, 128>}, {pipeline_mode = #tpu.pipeline_mode<synchronous>, transform_indices = @transform_14, window_bounds = array<i64: 1, 128>}, {pipeline_mode = #tpu.pipeline_mode<synchronous>, transform_indices = @transform_15, window_bounds = array<i64: 128, 128>}, {pipeline_mode = #tpu.pipeline_mode<synchronous>, transform_indices = @transform_16, window_bounds = array<i64: 128, 128>}, {pipeline_mode = #tpu.pipeline_mode<synchronous>, transform_indices = @transform_17, window_bounds = array<i64: 1, 128>}, {pipeline_mode = #tpu.pipeline_mode<synchronous>, transform_indices = @transform_18, window_bounds = array<i64: 1, 2>}, {transform_indices = @transform_19, window_bounds = array<i64: 1, 4, 16>}, {transform_indices = @transform_20, window_bounds = array<i64: 1, 4, 16>}]} {
    %c0 = arith.constant 0 : index
    %c0_0 = arith.constant 0 : index
    %c0_1 = arith.constant 0 : index
    %0 = vector.load %arg1[%c0, %c0_0, %c0_1] : memref<4x16x2xf32, #tpu.memory_space<vmem>>, vector<4x16x2xf32>
    %1 = vector.shape_cast %0 : vector<4x16x2xf32> to vector<64x2xf32>
    %c0_2 = arith.constant 0 : index
    %c0_3 = arith.constant 0 : index
    %c0_4 = arith.constant 0 : index
    %2 = vector.load %arg2[%c0_2, %c0_3, %c0_4] : memref<4x16x2xf32, #tpu.memory_space<vmem>>, vector<4x16x2xf32>
    %3 = vector.shape_cast %2 : vector<4x16x2xf32> to vector<64x2xf32>
    %c0_5 = arith.constant 0 : index
    %c0_6 = arith.constant 0 : index
    %4 = vector.load %arg7[%c0_5, %c0_6] : memref<2x128xf32, #tpu.memory_space<vmem>>, vector<2x128xf32>
    %c0_7 = arith.constant 0 : index
    %c0_8 = arith.constant 0 : index
    %5 = vector.load %arg8[%c0_7, %c0_8] : memref<1x128xf32, #tpu.memory_space<vmem>>, vector<1x128xf32>
    %c0_9 = arith.constant 0 : index
    %c0_10 = arith.constant 0 : index
    %6 = vector.load %arg3[%c0_9, %c0_10] : memref<2x128xf32, #tpu.memory_space<vmem>>, vector<2x128xf32>
    %cst = arith.constant dense<0.000000e+00> : vector<64x128xf32>
    %7 = tpu.matmul %1, %6, %cst {dimension_numbers = #tpu.dot_dimension_numbers<[1], [0], [0], [1], [0, 0, 1, 1], [], []>} : vector<64x2xf32>, vector<2x128xf32>, vector<64x128xf32> -> vector<64x128xf32>
    %c0_11 = arith.constant 0 : index
    %c0_12 = arith.constant 0 : index
    %8 = vector.load %arg4[%c0_11, %c0_12] : memref<1x128xf32, #tpu.memory_space<vmem>>, vector<1x128xf32>
    %9 = vector.broadcast %8 : vector<1x128xf32> to vector<64x128xf32>
    %10 = arith.addf %7, %9 : vector<64x128xf32>
    %c0_13 = arith.constant 0 : index
    %c0_14 = arith.constant 0 : index
    %11 = vector.load %arg13[%c0_13, %c0_14] : memref<128x128xf32, #tpu.memory_space<vmem>>, vector<128x128xf32>
    %cst_15 = arith.constant dense<0.000000e+00> : vector<64x128xf32>
    %12 = tpu.matmul %10, %11, %cst_15 {dimension_numbers = #tpu.dot_dimension_numbers<[1], [0], [0], [1], [0, 0, 1, 1], [], []>} : vector<64x128xf32>, vector<128x128xf32>, vector<64x128xf32> -> vector<64x128xf32>
    %c0_16 = arith.constant 0 : index
    %c0_17 = arith.constant 0 : index
    %13 = vector.load %arg5[%c0_16, %c0_17] : memref<2x128xf32, #tpu.memory_space<vmem>>, vector<2x128xf32>
    %cst_18 = arith.constant dense<0.000000e+00> : vector<64x128xf32>
    %14 = tpu.matmul %3, %13, %cst_18 {dimension_numbers = #tpu.dot_dimension_numbers<[1], [0], [0], [1], [0, 0, 1, 1], [], []>} : vector<64x2xf32>, vector<2x128xf32>, vector<64x128xf32> -> vector<64x128xf32>
    %15 = arith.addf %12, %14 : vector<64x128xf32>
    %c0_19 = arith.constant 0 : index
    %c0_20 = arith.constant 0 : index
    %16 = vector.load %arg6[%c0_19, %c0_20] : memref<1x128xf32, #tpu.memory_space<vmem>>, vector<1x128xf32>
    %17 = vector.broadcast %16 : vector<1x128xf32> to vector<64x128xf32>
    %18 = arith.addf %15, %17 : vector<64x128xf32>
    %c0_21 = arith.constant 0 : index
    %c0_22 = arith.constant 0 : index
    %19 = vector.load %arg16[%c0_21, %c0_22] : memref<128x128xf32, #tpu.memory_space<vmem>>, vector<128x128xf32>
    %cst_23 = arith.constant dense<0.000000e+00> : vector<64x128xf32>
    %20 = tpu.matmul %10, %19, %cst_23 {dimension_numbers = #tpu.dot_dimension_numbers<[1], [0], [0], [1], [0, 0, 1, 1], [], []>} : vector<64x128xf32>, vector<128x128xf32>, vector<64x128xf32> -> vector<64x128xf32>
    %cst_24 = arith.constant dense<0.000000e+00> : vector<64x128xf32>
    %21 = tpu.matmul %1, %4, %cst_24 {dimension_numbers = #tpu.dot_dimension_numbers<[1], [0], [0], [1], [0, 0, 1, 1], [], []>} : vector<64x2xf32>, vector<2x128xf32>, vector<64x128xf32> -> vector<64x128xf32>
    %22 = vector.broadcast %5 : vector<1x128xf32> to vector<64x128xf32>
    %23 = arith.addf %21, %22 : vector<64x128xf32>
    %24 = vector.shape_cast %10 : vector<64x128xf32> to vector<4x16x128xf32>
    %25 = vector.shape_cast %23 : vector<64x128xf32> to vector<4x16x128xf32>
    %26 = vector.shape_cast %18 : vector<64x128xf32> to vector<4x16x128xf32>
    %27 = vector.shape_cast %20 : vector<64x128xf32> to vector<4x16x128xf32>
    %c0_25 = arith.constant 0 : index
    %c0_26 = arith.constant 0 : index
    %28 = vector.load %arg9[%c0_25, %c0_26] : memref<128x384xf32, #tpu.memory_space<vmem>>, vector<128x384xf32>
    %c0_27 = arith.constant 0 : index
    %c0_28 = arith.constant 0 : index
    %29 = vector.load %arg10[%c0_27, %c0_28] : memref<128x384xf32, #tpu.memory_space<vmem>>, vector<128x384xf32>
    %c0_29 = arith.constant 0 : index
    %c0_30 = arith.constant 0 : index
    %30 = vector.load %arg11[%c0_29, %c0_30] : memref<1x384xf32, #tpu.memory_space<vmem>>, vector<1x384xf32>
    %c0_31 = arith.constant 0 : index
    %c0_32 = arith.constant 0 : index
    %31 = vector.load %arg12[%c0_31, %c0_32] : memref<1x384xf32, #tpu.memory_space<vmem>>, vector<1x384xf32>
    %c0_33 = arith.constant 0 : index
    %c0_34 = arith.constant 0 : index
    %32 = vector.load %arg14[%c0_33, %c0_34] : memref<128x128xf32, #tpu.memory_space<vmem>>, vector<128x128xf32>
    %c0_35 = arith.constant 0 : index
    %c0_36 = arith.constant 0 : index
    %33 = vector.load %arg17[%c0_35, %c0_36] : memref<128x128xf32, #tpu.memory_space<vmem>>, vector<128x128xf32>
    %c0_37 = arith.constant 0 : index
    %c0_38 = arith.constant 0 : index
    %34 = vector.load %arg15[%c0_37, %c0_38] : memref<1x128xf32, #tpu.memory_space<vmem>>, vector<1x128xf32>
    %35 = vector.shape_cast %34 : vector<1x128xf32> to vector<1x1x128xf32>
    %c0_39 = arith.constant 0 : index
    %c0_40 = arith.constant 0 : index
    %36 = vector.load %arg18[%c0_39, %c0_40] : memref<1x128xf32, #tpu.memory_space<vmem>>, vector<1x128xf32>
    %37 = vector.shape_cast %36 : vector<1x128xf32> to vector<1x1x128xf32>
    %38 = tpu.iota {dimensions = array<i32: 1>} : vector<4x16xi32>
    %cst_41 = arith.constant 0.000000e+00 : f32
    %39 = vector.broadcast %cst_41 : f32 to vector<4x128xf32>
    %c0_42 = arith.constant 0 : index
    %c0_43 = arith.constant 0 : index
    %40 = vector.load %arg19[%c0_42, %c0_43] : memref<1x2xf32, #tpu.memory_space<vmem>>, vector<1x2xf32>
    %cst_44 = arith.constant dense<0.000000e+00> : vector<1x128xf32>
    %41 = tpu.matmul %40, %4, %cst_44 {dimension_numbers = #tpu.dot_dimension_numbers<[1], [0], [0], [1], [0, 0, 1, 1], [], []>} : vector<1x2xf32>, vector<2x128xf32>, vector<1x128xf32> -> vector<1x128xf32>
    %42 = arith.addf %41, %5 : vector<1x128xf32>
    %43 = vector.shape_cast %42 : vector<1x128xf32> to vector<1x128xf32>
    %44 = vector.broadcast %43 : vector<1x128xf32> to vector<4x128xf32>
    %c0_i32 = arith.constant 0 : i32
    %45 = vector.broadcast %c0_i32 : i32 to vector<4x16xi32>
    %cst_45 = arith.constant 0.000000e+00 : f32
    %46 = vector.broadcast %cst_45 : f32 to vector<4x16xf32>
    %c0_i32_46 = arith.constant 0 : i32
    %c16_i32 = arith.constant 16 : i32
    %47 = arith.addi %c0_i32_46, %c16_i32 : i32
    %c1_i32 = arith.constant 1 : i32
    %48:4 = scf.for %arg22 = %c0_i32_46 to %47 step %c1_i32 iter_args(%arg23 = %39, %arg24 = %44, %arg25 = %45, %arg26 = %46) -> (vector<4x128xf32>, vector<4x128xf32>, vector<4x16xi32>, vector<4x16xf32>)  : i32 {
      %cst_54 = arith.constant dense<0.000000e+00> : vector<4x384xf32>
      %55 = tpu.matmul %arg24, %28, %cst_54 {dimension_numbers = #tpu.dot_dimension_numbers<[1], [0], [0], [1], [0, 0, 1, 1], [], []>} : vector<4x128xf32>, vector<128x384xf32>, vector<4x384xf32> -> vector<4x384xf32>
      %56 = vector.broadcast %30 : vector<1x384xf32> to vector<4x384xf32>
      %57 = arith.addf %55, %56 : vector<4x384xf32>
      %cst_55 = arith.constant dense<0.000000e+00> : vector<4x384xf32>
      %58 = tpu.matmul %arg23, %29, %cst_55 {dimension_numbers = #tpu.dot_dimension_numbers<[1], [0], [0], [1], [0, 0, 1, 1], [], []>} : vector<4x128xf32>, vector<128x384xf32>, vector<4x384xf32> -> vector<4x384xf32>
      %59 = vector.broadcast %31 : vector<1x384xf32> to vector<4x384xf32>
      %60 = arith.addf %58, %59 : vector<4x384xf32>
      %61 = vector.extract_strided_slice %57 {offsets = [0, 0], sizes = [4, 128], strides = [1, 1]} : vector<4x384xf32> to vector<4x128xf32>
      %62 = vector.extract_strided_slice %60 {offsets = [0, 0], sizes = [4, 128], strides = [1, 1]} : vector<4x384xf32> to vector<4x128xf32>
      %63 = arith.addf %61, %62 : vector<4x128xf32>
      %cst_56 = arith.constant 0.000000e+00 : f32
      %64 = vector.broadcast %cst_56 : f32 to vector<4x128xf32>
      %65 = arith.subf %64, %63 : vector<4x128xf32>
      %66 = math.exp %65 : vector<4x128xf32>
      %cst_57 = arith.constant 1.000000e+00 : f32
      %67 = vector.broadcast %cst_57 : f32 to vector<4x128xf32>
      %68 = arith.addf %67, %66 : vector<4x128xf32>
      %cst_58 = arith.constant 1.000000e+00 : f32
      %69 = vector.broadcast %cst_58 : f32 to vector<4x128xf32>
      %70 = arith.divf %69, %68 : vector<4x128xf32>
      %71 = vector.extract_strided_slice %57 {offsets = [0, 128], sizes = [4, 128], strides = [1, 1]} : vector<4x384xf32> to vector<4x128xf32>
      %72 = vector.extract_strided_slice %60 {offsets = [0, 128], sizes = [4, 128], strides = [1, 1]} : vector<4x384xf32> to vector<4x128xf32>
      %73 = arith.addf %71, %72 : vector<4x128xf32>
      %cst_59 = arith.constant 0.000000e+00 : f32
      %74 = vector.broadcast %cst_59 : f32 to vector<4x128xf32>
      %75 = arith.subf %74, %73 : vector<4x128xf32>
      %76 = math.exp %75 : vector<4x128xf32>
      %cst_60 = arith.constant 1.000000e+00 : f32
      %77 = vector.broadcast %cst_60 : f32 to vector<4x128xf32>
      %78 = arith.addf %77, %76 : vector<4x128xf32>
      %cst_61 = arith.constant 1.000000e+00 : f32
      %79 = vector.broadcast %cst_61 : f32 to vector<4x128xf32>
      %80 = arith.divf %79, %78 : vector<4x128xf32>
      %81 = vector.extract_strided_slice %57 {offsets = [0, 256], sizes = [4, 128], strides = [1, 1]} : vector<4x384xf32> to vector<4x128xf32>
      %82 = vector.extract_strided_slice %60 {offsets = [0, 256], sizes = [4, 128], strides = [1, 1]} : vector<4x384xf32> to vector<4x128xf32>
      %83 = arith.mulf %70, %82 : vector<4x128xf32>
      %84 = arith.addf %81, %83 : vector<4x128xf32>
      %85 = math.tanh %84 : vector<4x128xf32>
      %cst_62 = arith.constant 1.000000e+00 : f32
      %86 = vector.broadcast %cst_62 : f32 to vector<4x128xf32>
      %87 = arith.subf %86, %80 : vector<4x128xf32>
      %88 = arith.mulf %87, %85 : vector<4x128xf32>
      %89 = arith.mulf %80, %arg23 : vector<4x128xf32>
      %90 = arith.addf %88, %89 : vector<4x128xf32>
      %cst_63 = arith.constant dense<0.000000e+00> : vector<4x128xf32>
      %91 = tpu.matmul %90, %32, %cst_63 {dimension_numbers = #tpu.dot_dimension_numbers<[1], [0], [0], [1], [0, 0, 1, 1], [], []>} : vector<4x128xf32>, vector<128x128xf32>, vector<4x128xf32> -> vector<4x128xf32>
      %92 = vector.shape_cast %91 : vector<4x128xf32> to vector<4x1x128xf32>
      %93 = vector.broadcast %92 : vector<4x1x128xf32> to vector<4x16x128xf32>
      %94 = arith.addf %26, %93 : vector<4x16x128xf32>
      %95 = math.tanh %94 : vector<4x16x128xf32>
      %96 = vector.broadcast %35 : vector<1x1x128xf32> to vector<4x16x128xf32>
      %97 = arith.mulf %95, %96 : vector<4x16x128xf32>
      %cst_64 = arith.constant dense<0.000000e+00> : vector<4x16xf32>
      %98 = vector.multi_reduction <add>, %97, %cst_64 [2] : vector<4x16x128xf32> to vector<4x16xf32>
      %cst_65 = arith.constant dense<0xFF800000> : vector<4xf32>
      %99 = vector.multi_reduction <maximumf>, %98, %cst_65 [1] : vector<4x16xf32> to vector<4xf32>
      %100 = vector.shape_cast %99 : vector<4xf32> to vector<4x1xf32>
      %101 = vector.broadcast %100 : vector<4x1xf32> to vector<4x16xf32>
      %102 = arith.subf %98, %101 : vector<4x16xf32>
      %103 = math.exp %102 : vector<4x16xf32>
      %cst_66 = arith.constant dense<0.000000e+00> : vector<4xf32>
      %104 = vector.multi_reduction <add>, %103, %cst_66 [1] : vector<4x16xf32> to vector<4xf32>
      %105 = vector.shape_cast %104 : vector<4xf32> to vector<4x1xf32>
      %106 = tpu.reciprocal %105 : vector<4x1xf32> -> vector<4x1xf32>
      %107 = vector.broadcast %106 : vector<4x1xf32> to vector<4x16xf32>
      %108 = arith.mulf %103, %107 : vector<4x16xf32>
      %109 = vector.shape_cast %108 : vector<4x16xf32> to vector<4x1x16xf32>
      "tpu.trace_start"() <{level = 10 : i32, message = "bks,bsh->bkh"}> : () -> ()
      %cst_67 = arith.constant dense<0.000000e+00> : vector<4x1x128xf32>
      %110 = tpu.matmul %109, %24, %cst_67 {dimension_numbers = #tpu.dot_dimension_numbers<[2], [1], [1], [2], [0, 0, 0, 1, 1, 2], [0], [0]>} : vector<4x1x16xf32>, vector<4x16x128xf32>, vector<4x1x128xf32> -> vector<4x1x128xf32>
      "tpu.trace_stop"() : () -> ()
      %111 = vector.shape_cast %110 : vector<4x1x128xf32> to vector<4x128xf32>
      %cst_68 = arith.constant dense<0.000000e+00> : vector<4x128xf32>
      %112 = tpu.matmul %111, %33, %cst_68 {dimension_numbers = #tpu.dot_dimension_numbers<[1], [0], [0], [1], [0, 0, 1, 1], [], []>} : vector<4x128xf32>, vector<128x128xf32>, vector<4x128xf32> -> vector<4x128xf32>
      %113 = vector.shape_cast %112 : vector<4x128xf32> to vector<4x1x128xf32>
      %114 = vector.broadcast %113 : vector<4x1x128xf32> to vector<4x16x128xf32>
      %115 = arith.addf %27, %114 : vector<4x16x128xf32>
      %116 = math.tanh %115 : vector<4x16x128xf32>
      %117 = vector.broadcast %37 : vector<1x1x128xf32> to vector<4x16x128xf32>
      %118 = arith.mulf %116, %117 : vector<4x16x128xf32>
      %cst_69 = arith.constant dense<0.000000e+00> : vector<4x16xf32>
      %119 = vector.multi_reduction <add>, %118, %cst_69 [2] : vector<4x16x128xf32> to vector<4x16xf32>
      %cst_70 = arith.constant dense<0xFF800000> : vector<4xf32>
      %120 = vector.multi_reduction <maximumf>, %119, %cst_70 [1] : vector<4x16xf32> to vector<4xf32>
      %121 = vector.shape_cast %120 : vector<4xf32> to vector<4x1xf32>
      %122 = vector.broadcast %121 : vector<4x1xf32> to vector<4x16xf32>
      %123 = arith.cmpf oge, %119, %122 : vector<4x16xf32>
      %c16_i32_71 = arith.constant 16 : i32
      %124 = vector.broadcast %c16_i32_71 : i32 to vector<4x16xi32>
      %125 = arith.select %123, %38, %124 : vector<4x16xi1>, vector<4x16xi32>
      %cst_72 = arith.constant dense<2147483647> : vector<4xi32>
      %126 = vector.multi_reduction <minsi>, %125, %cst_72 [1] : vector<4x16xi32> to vector<4xi32>
      %127 = vector.broadcast %121 : vector<4x1xf32> to vector<4x16xf32>
      %128 = arith.subf %119, %127 : vector<4x16xf32>
      %129 = math.exp %128 : vector<4x16xf32>
      %cst_73 = arith.constant dense<0.000000e+00> : vector<4xf32>
      %130 = vector.multi_reduction <add>, %129, %cst_73 [1] : vector<4x16xf32> to vector<4xf32>
      %131 = math.log %130 : vector<4xf32>
      %cst_74 = arith.constant 0.000000e+00 : f32
      %132 = vector.broadcast %cst_74 : f32 to vector<4xf32>
      %133 = arith.subf %132, %131 : vector<4xf32>
      %134 = vector.broadcast %arg22 : i32 to vector<4x16xi32>
      %135 = arith.cmpi eq, %38, %134 : vector<4x16xi32>
      %136 = vector.shape_cast %126 : vector<4xi32> to vector<4x1xi32>
      %137 = vector.shape_cast %136 : vector<4x1xi32> to vector<4x1xi32>
      %138 = vector.broadcast %137 : vector<4x1xi32> to vector<4x16xi32>
      %139 = arith.select %135, %138, %arg25 : vector<4x16xi1>, vector<4x16xi32>
      %140 = vector.shape_cast %133 : vector<4xf32> to vector<4x1xf32>
      %141 = vector.shape_cast %140 : vector<4x1xf32> to vector<4x1xf32>
      %142 = vector.broadcast %141 : vector<4x1xf32> to vector<4x16xf32>
      %143 = arith.select %135, %142, %arg26 : vector<4x16xi1>, vector<4x16xf32>
      %144 = vector.shape_cast %126 : vector<4xi32> to vector<4x1xi32>
      %145 = vector.broadcast %144 : vector<4x1xi32> to vector<4x16xi32>
      %146 = arith.cmpi eq, %38, %145 : vector<4x16xi32>
      %147 = arith.extui %146 : vector<4x16xi1> to vector<4x16xi32>
      %148 = arith.sitofp %147 : vector<4x16xi32> to vector<4x16xf32>
      %149 = vector.shape_cast %148 : vector<4x16xf32> to vector<4x1x16xf32>
      "tpu.trace_start"() <{level = 10 : i32, message = "bks,bsh->bkh"}> : () -> ()
      %cst_75 = arith.constant dense<0.000000e+00> : vector<4x1x128xf32>
      %150 = tpu.matmul %149, %25, %cst_75 {dimension_numbers = #tpu.dot_dimension_numbers<[2], [1], [1], [2], [0, 0, 0, 1, 1, 2], [0], [0]>} : vector<4x1x16xf32>, vector<4x16x128xf32>, vector<4x1x128xf32> -> vector<4x1x128xf32>
      "tpu.trace_stop"() : () -> ()
      %151 = vector.shape_cast %150 : vector<4x1x128xf32> to vector<4x128xf32>
      scf.yield %90, %151, %139, %143 : vector<4x128xf32>, vector<4x128xf32>, vector<4x16xi32>, vector<4x16xf32>
    }
    %c16_i32_47 = arith.constant 16 : i32
    %c0_48 = arith.constant 0 : index
    %c0_49 = arith.constant 0 : index
    %c0_50 = arith.constant 0 : index
    %49 = vector.load %arg20[%c0_48, %c0_49, %c0_50] : memref<1x4x16xi32, #tpu.memory_space<vmem>>, vector<1x4x16xi32>
    %50 = vector.shape_cast %49 : vector<1x4x16xi32> to vector<4x16xi32>
    %51 = vector.shape_cast %48#2 : vector<4x16xi32> to vector<1x4x16xi32>
    tpu.vector_store %arg20[%c0_48, %c0_49, %c0_50], %51 {strides = array<i32>} : memref<1x4x16xi32, #tpu.memory_space<vmem>>, vector<1x4x16xi32>,
    %c0_51 = arith.constant 0 : index
    %c0_52 = arith.constant 0 : index
    %c0_53 = arith.constant 0 : index
    %52 = vector.load %arg21[%c0_51, %c0_52, %c0_53] : memref<1x4x16xf32, #tpu.memory_space<vmem>>, vector<1x4x16xf32>
    %53 = vector.shape_cast %52 : vector<1x4x16xf32> to vector<4x16xf32>
    %54 = vector.shape_cast %48#3 : vector<4x16xf32> to vector<1x4x16xf32>
    tpu.vector_store %arg21[%c0_51, %c0_52, %c0_53], %54 {strides = array<i32>} : memref<1x4x16xf32, #tpu.memory_space<vmem>>, vector<1x4x16xf32>,
    return
  }
  func.func @transform_0(%arg0: i32) -> (i32, i32, i32) {
    %c0_i32 = arith.constant 0 : i32
    %c0_i32_0 = arith.constant 0 : i32
    %c0_i32_1 = arith.constant 0 : i32
    return %arg0, %c0_i32, %c0_i32_0 : i32, i32, i32
  }
  func.func @transform_1(%arg0: i32) -> (i32, i32, i32) {
    %c0_i32 = arith.constant 0 : i32
    %c0_i32_0 = arith.constant 0 : i32
    %c0_i32_1 = arith.constant 0 : i32
    return %arg0, %c0_i32, %c0_i32_0 : i32, i32, i32
  }
  func.func @transform_2(%arg0: i32) -> (i32, i32) {
    %c0_i32 = arith.constant 0 : i32
    %c0_i32_0 = arith.constant 0 : i32
    %c0_i32_1 = arith.constant 0 : i32
    return %c0_i32, %c0_i32_0 : i32, i32
  }
  func.func @transform_3(%arg0: i32) -> (i32, i32) {
    %c0_i32 = arith.constant 0 : i32
    %c0_i32_0 = arith.constant 0 : i32
    %c0_i32_1 = arith.constant 0 : i32
    return %c0_i32, %c0_i32_0 : i32, i32
  }
  func.func @transform_4(%arg0: i32) -> (i32, i32) {
    %c0_i32 = arith.constant 0 : i32
    %c0_i32_0 = arith.constant 0 : i32
    %c0_i32_1 = arith.constant 0 : i32
    return %c0_i32, %c0_i32_0 : i32, i32
  }
  func.func @transform_5(%arg0: i32) -> (i32, i32) {
    %c0_i32 = arith.constant 0 : i32
    %c0_i32_0 = arith.constant 0 : i32
    %c0_i32_1 = arith.constant 0 : i32
    return %c0_i32, %c0_i32_0 : i32, i32
  }
  func.func @transform_6(%arg0: i32) -> (i32, i32) {
    %c0_i32 = arith.constant 0 : i32
    %c0_i32_0 = arith.constant 0 : i32
    %c0_i32_1 = arith.constant 0 : i32
    return %c0_i32, %c0_i32_0 : i32, i32
  }
  func.func @transform_7(%arg0: i32) -> (i32, i32) {
    %c0_i32 = arith.constant 0 : i32
    %c0_i32_0 = arith.constant 0 : i32
    %c0_i32_1 = arith.constant 0 : i32
    return %c0_i32, %c0_i32_0 : i32, i32
  }
  func.func @transform_8(%arg0: i32) -> (i32, i32) {
    %c0_i32 = arith.constant 0 : i32
    %c0_i32_0 = arith.constant 0 : i32
    %c0_i32_1 = arith.constant 0 : i32
    return %c0_i32, %c0_i32_0 : i32, i32
  }
  func.func @transform_9(%arg0: i32) -> (i32, i32) {
    %c0_i32 = arith.constant 0 : i32
    %c0_i32_0 = arith.constant 0 : i32
    %c0_i32_1 = arith.constant 0 : i32
    return %c0_i32, %c0_i32_0 : i32, i32
  }
  func.func @transform_10(%arg0: i32) -> (i32, i32) {
    %c0_i32 = arith.constant 0 : i32
    %c0_i32_0 = arith.constant 0 : i32
    %c0_i32_1 = arith.constant 0 : i32
    return %c0_i32, %c0_i32_0 : i32, i32
  }
  func.func @transform_11(%arg0: i32) -> (i32, i32) {
    %c0_i32 = arith.constant 0 : i32
    %c0_i32_0 = arith.constant 0 : i32
    %c0_i32_1 = arith.constant 0 : i32
    return %c0_i32, %c0_i32_0 : i32, i32
  }
  func.func @transform_12(%arg0: i32) -> (i32, i32) {
    %c0_i32 = arith.constant 0 : i32
    %c0_i32_0 = arith.constant 0 : i32
    %c0_i32_1 = arith.constant 0 : i32
    return %c0_i32, %c0_i32_0 : i32, i32
  }
  func.func @transform_13(%arg0: i32) -> (i32, i32) {
    %c0_i32 = arith.constant 0 : i32
    %c0_i32_0 = arith.constant 0 : i32
    %c0_i32_1 = arith.constant 0 : i32
    return %c0_i32, %c0_i32_0 : i32, i32
  }
  func.func @transform_14(%arg0: i32) -> (i32, i32) {
    %c0_i32 = arith.constant 0 : i32
    %c0_i32_0 = arith.constant 0 : i32
    %c0_i32_1 = arith.constant 0 : i32
    return %c0_i32, %c0_i32_0 : i32, i32
  }
  func.func @transform_15(%arg0: i32) -> (i32, i32) {
    %c0_i32 = arith.constant 0 : i32
    %c0_i32_0 = arith.constant 0 : i32
    %c0_i32_1 = arith.constant 0 : i32
    return %c0_i32, %c0_i32_0 : i32, i32
  }
  func.func @transform_16(%arg0: i32) -> (i32, i32) {
    %c0_i32 = arith.constant 0 : i32
    %c0_i32_0 = arith.constant 0 : i32
    %c0_i32_1 = arith.constant 0 : i32
    return %c0_i32, %c0_i32_0 : i32, i32
  }
  func.func @transform_17(%arg0: i32) -> (i32, i32) {
    %c0_i32 = arith.constant 0 : i32
    %c0_i32_0 = arith.constant 0 : i32
    %c0_i32_1 = arith.constant 0 : i32
    return %c0_i32, %c0_i32_0 : i32, i32
  }
  func.func @transform_18(%arg0: i32) -> (i32, i32) {
    %c0_i32 = arith.constant 0 : i32
    %c0_i32_0 = arith.constant 0 : i32
    %c0_i32_1 = arith.constant 0 : i32
    return %c0_i32, %c0_i32_0 : i32, i32
  }
  func.func @transform_19(%arg0: i32) -> (i32, i32, i32) {
    %c0_i32 = arith.constant 0 : i32
    %c0_i32_0 = arith.constant 0 : i32
    %c0_i32_1 = arith.constant 0 : i32
    return %arg0, %c0_i32, %c0_i32_0 : i32, i32, i32
  }
  func.func @transform_20(%arg0: i32) -> (i32, i32, i32) {
    %c0_i32 = arith.constant 0 : i32
    %c0_i32_0 = arith.constant 0 : i32
    %c0_i32_1 = arith.constant 0 : i32
    return %arg0, %c0_i32, %c0_i32_0 : i32, i32, i32
  }
}

</mosaic_0001>

<bundles_post_ra>
// kernel: drl4tsp_forward.1
= control target key start
LH: loop header
LB: loop body
LE: loop exit
PB: predicated region body
PF: predicated region fallthrough
CT: control target
= control target key end

     0   :  { %s6433_s0 = inlined_call_operand.vmem [shape: f32[8,16,2], index: 0, kind: input, shape index: {}]   ;;  %s6434_s1 = inlined_call_operand.vmem [shape: f32[8,16,2], index: 1, kind: input, shape index: {}]   ;;  %s6435_s2 = inlined_call_operand.vmem [shape: f32[2,128], index: 2, kind: input, shape index: {}]   ;;  %s6436_s3 = inlined_call_operand.vmem [shape: f32[1,128], index: 3, kind: input, shape index: {}]   ;;  %s6437_s4 = inlined_call_operand.vmem [shape: f32[2,128], index: 4, kind: input, shape index: {}]   ;;  %s6438_s5 = inlined_call_operand.vmem [shape: f32[1,128], index: 5, kind: input, shape index: {}]   ;;  %s6439_s6 = inlined_call_operand.vmem [shape: f32[2,128], index: 6, kind: input, shape index: {}]   ;;  %s6440_s7 = inlined_call_operand.vmem [shape: f32[1,128], index: 7, kind: input, shape index: {}]   ;;  %s6441_s8 = inlined_call_operand.vmem [shape: f32[128,384], index: 8, kind: input, shape index: {}]   ;;  %s6442_s9 = inlined_call_operand.vmem [shape: f32[128,384], index: 9, kind: input, shape index: {}]   ;;  %s6443_s10 = inlined_call_operand.vmem [shape: f32[1,384], index: 10, kind: input, shape index: {}]   ;;  %s6444_s11 = inlined_call_operand.vmem [shape: f32[1,384], index: 11, kind: input, shape index: {}]   ;;  %s6445_s12 = inlined_call_operand.vmem [shape: f32[128,128], index: 12, kind: input, shape index: {}]   ;;  %s6446_s13 = inlined_call_operand.vmem [shape: f32[128,128], index: 13, kind: input, shape index: {}]   ;;  %s6447_s14 = inlined_call_operand.vmem [shape: f32[1,128], index: 14, kind: input, shape index: {}]   ;;  %s6448_s15 = inlined_call_operand.vmem [shape: f32[128,128], index: 15, kind: input, shape index: {}]   ;;  %s6449_s16 = inlined_call_operand.vmem [shape: f32[128,128], index: 16, kind: input, shape index: {}]   ;;  %s6450_s17 = inlined_call_operand.vmem [shape: f32[1,128], index: 17, kind: input, shape index: {}]   ;;  %s6451_s18 = inlined_call_operand.vmem [shape: f32[1,2], index: 18, kind: input, shape index: {}]   ;;  %s6452_s19 = inlined_call_operand.hbm [shape: s32[2,4,16], index: 19, kind: output, shape index: {0}]   ;;  %s6453_s20 = inlined_call_operand.hbm [shape: f32[2,4,16], index: 20, kind: output, shape index: {1}]  }
   0x1   :  { %6483 = sst [smem:[#allocation157_spill]] %s6433_s0 }
   0x2   :  { %6484 = sst [smem:[#allocation158_spill]] %s6434_s1 }
   0x3   :  { %6485 = sst [smem:[#allocation159_spill]] %s6435_s2 }
   0x4   :  { %6486 = sst [smem:[#allocation160_spill]] %s6436_s3 }
   0x5   :  { %6487 = sst [smem:[#allocation161_spill]] %s6437_s4 }
   0x6   :  { %6488 = sst [smem:[#allocation162_spill]] %s6438_s5 }
   0x7   :  { %6489 = sst [smem:[#allocation163_spill]] %s6439_s6 }
   0x8   :  { %6490 = sst [smem:[#allocation164_spill]] %s6440_s7 }
   0x9   :  { %6491 = sst [smem:[#allocation165_spill]] %s6453_s20 }
   0xa   :  { %26 = vsyncpa [#allocation3], 0 }
   0xb   :  { %28 = vsyncpa [#allocation3 + $0x1], 0 }
   0xc   :  { %29 = vsyncpa [#allocation5], 0 }
   0xd   :  { %31 = vsyncpa [#allocation5 + $0x1], 0  ;;  %s4795_s1 = smov 0   ;;  %s4797_s22 = smov 0  }
   0xe   :  { %s4799_s23 = smov 0   ;;  %s4801_s24 = smov 0  }
   0xf LB: > { %6492 = sst [smem:[#allocation8_spill]] %s4647_s1  ;;  %s4816_s2 = sadd.s32 4294967295, %s4659_s24   ;;  %s4659_s24 = sphi %s4801_s24, %s6807_s24   ;;  %s4655_s23 = sphi %s4799_s23, %s6810_s23   ;;  %s4651_s22 = sphi %s4797_s22, %s6809_s22   ;;  %s4647_s1 = sphi %s4795_s1, %s6808_s1  }
  0x10   : > { %6493 = sst [smem:[#allocation9_spill]] %s4651_s22  ;;  %s3548_s25 = sadd.s32 4294967294, %s4659_s24  }
  0x11   : > { %6494 = sst [smem:[#allocation10_spill]] %s4655_s23  ;;  %s4820_s3 = sadd.s32 1, %s4659_s24  }
  0x12   : > { %6495 = sst [smem:[#allocation11_spill]] %s4659_s24  ;;  %s453_s26 = sadd.s32 1, %s4655_s23 }
  0x13   : > { %6496 = sst [smem:[#allocation12_spill]] %s4820_s3  ;;  %s450_s27 = ssub.s32 %s4659_s24, %s4820_s3 }
  0x14   : > { %p463_p0 = scmp.ne.s32.totalorder %s4655_s23, %s4651_s22  ;;  %p451_p1 = scmp.eq.s32.totalorder %s450_s27, 0 }
  0x15   : > { %p464_p2 = scmp.eq.s32.totalorder %s4816_s2, 1  ;;  %p469_p3 = scmp.ne.s32.totalorder %s4651_s22, %s4647_s1 }
  0x16   : > { %p470_p4 = scmp.eq.s32.totalorder %s3548_s25, 1  ;;  %p3551_p7 = scmp.ge.s32.totalorder %s4659_s24, 1 }
  0x17   : > { %s4831_s28 = scalar_select %p451_p1, %s4655_s23, %s453_s26  }
  0x18   : > { %p4833_p5 = por %p464_p2, %p463_p0  ;;  %p4837_p6 = por %p470_p4, %p469_p3 }
  0x19   : > { %6497 = sst [smem:[#allocation13_spill]] %s4831_s28  ;;  %p585_p8 = scmp.lt.s32.totalorder %s4659_s24, 3 }
  0x1a   : > { %s6499_s29 = scalar_select %p4837_p6, 1, 0 }
  0x1b   : > { %p586_p9 = pnand %p3551_p7, %p585_p8 }
  0x1c   : > { %6500 = sst [smem:[#allocation14_spill]] %s6499_s29 }
  0x1d   : > { %589 = sbr.rel (%p586_p9) target bundleno = 3335 (0xd07), region = 96 }
  0x24   : > { %s4844_s30 = sand.u32 1, %s4651_s22   ;;  %s6501_s25 = sld [smem:[#allocation159_spill]]  ;;  %vm720_vm0 = vcmask 1041408   ;;  %v1098_v2 = vld [vmem:[%s6448_s15] sm:$0xff]  ;;  %v1099_v3 = vld [vmem:[%s6448_s15 + $0x8] sm:$0xff]  ;;  %vm695_vm1 = vcmask 15360  }
  0x25   : > { %s3554_s26 = sshll.u32 %s4816_s2, 2  ;;  %s6502_s3 = sld [smem:[#allocation161_spill]]  ;;  %v4142_v4 = vpack.c.bf16 %v1099_v3, %v1098_v2  ;;  %v829_v5 = vld [vmem:[%s6445_s12] sm:$0xff]  ;;  %v830_v6 = vld [vmem:[%s6445_s12 + $0x8] sm:$0xff]  ;;  %v1100_v8 = vld [vmem:[%s6448_s15 + $0x10] sm:$0xff]  ;;  %vm4682_vm2 = vmmov 0  }
  0x26   : > { %p656_p10 = scmp.lt.s32.totalorder %s3554_s26, 7  ;;  %v4110_v7 = vpack.c.bf16 %v830_v6, %v829_v5  ;;  %v1101_v9 = vld [vmem:[%s6448_s15 + $0x18] sm:$0xff]  ;;  %s6503_s21 = sld [smem:[#allocation157_spill]]  ;;  %v831_v10 = vld [vmem:[%s6445_s12 + $0x10] sm:$0xff]  ;;  %v1102_v16 = vld [vmem:[%s6448_s15 + $0x20] sm:$0xff] }
  0x27   : > { %s6504_s20 = sld [smem:[#allocation158_spill]]  ;;  %v832_v11 = vld [vmem:[%s6445_s12 + $0x18] sm:$0xff]  ;;  %v4146_v15 = vpack.c.bf16 %v1101_v9, %v1100_v8  ;;  %v1103_v19 = vld [vmem:[%s6448_s15 + $0x28] sm:$0xff]  ;;  %v833_v20 = vld [vmem:[%s6445_s12 + $0x20] sm:$0xff]  ;;  %s6505_s6 = sld [smem:[#allocation163_spill]] }
  0x28   : > { %s6812_s26 = smov (!%p656_p10, %s3554_s26), 7  ;;  %v4114_v18 = vpack.c.bf16 %v832_v11, %v831_v10  ;;  %v834_v23 = vld [vmem:[%s6445_s12 + $0x28] sm:$0xff]  ;;  %v4150_v26 = vpack.c.bf16 %v1103_v19, %v1102_v16  ;;  %v1104_v29 = vld [vmem:[%s6448_s15 + $0x30] sm:$0xff]  ;;  %v1105_v30 = vld [vmem:[%s6448_s15 + $0x38] sm:$0xff]  ;;  %s6621_s24 = sld [smem:[#allocation160_spill]] }
  0x29   : > { %s3608_s1 = sshll.u32 %s6812_s26, 4  ;;  %v4118_v28 = vpack.c.bf16 %v834_v23, %v833_v20  ;;  %v835_v32 = vld [vmem:[%s6445_s12 + $0x30] sm:$0xff]  ;;  %v836_v33 = vld [vmem:[%s6445_s12 + $0x38] sm:$0xff]  ;;  %v4154_v36 = vpack.c.bf16 %v1105_v30, %v1104_v29  ;;  %v1106_v39 = vld [vmem:[%s6448_s15 + $0x40] sm:$0xff]  ;;  %s6631_s5 = sld [smem:[#allocation162_spill]] }
  0x2a   : > { %v687_v0 = vld [vmem:[%s6501_s25] sm:$0x3]  ;;  %v4122_v38 = vpack.c.bf16 %v836_v33, %v835_v32  ;;  %v1107_v40 = vld [vmem:[%s6448_s15 + $0x48] sm:$0xff]  ;;  %v1108_v46 = vld [vmem:[%s6448_s15 + $0x50] sm:$0xff]  ;;  %s6644_s7 = sld [smem:[#allocation164_spill]]  ;;  %s6651_s29 = sshll.u32 %s4844_s30, 2 }
  0x2b   : > { %3779 = vmatprep.subr.msk.mxu0 %vm720_vm0, %v687_v0  ;;  %v845_v1 = vld [vmem:[%s6502_s3] sm:$0x3]  ;;  %v838_v43 = vld [vmem:[%s6445_s12 + $0x48] sm:$0xff]  ;;  %v4158_v44 = vpack.c.bf16 %v1107_v40, %v1106_v39  ;;  %v1109_v47 = vld [vmem:[%s6448_s15 + $0x58] sm:$0xff]  ;;  %s6652_s0 = smov %s6651_s29  ;;  %s5829_s23 = smov 0  }
  0x2c   : > { %3780 = vmatpush3.msk.msra.mxu0 %vm720_vm0, %v687_v0  ;;  %3793 = vmatprep.subr.msk.mxu1 %vm720_vm0, %v845_v1  ;;  %s4879_s25 = scalar_lea.vmem %s6503_s21, %s3608_s1  ;;  %v837_v42 = vld [vmem:[%s6445_s12 + $0x40] sm:$0xff]  ;;  %v839_v48 = vld [vmem:[%s6445_s12 + $0x50] sm:$0xff]  ;;  %v840_v49 = vld [vmem:[%s6445_s12 + $0x58] sm:$0xff]  ;;  %v4162_v50 = vpack.c.bf16 %v1109_v47, %v1108_v46  ;;  %s5819_s21 = scalar_lea.vmem [#allocation4], %s6652_s0 }
  0x2d   : > { %3794 = vmatpush3.msk.msra.mxu1 %vm720_vm0, %v845_v1  ;;  %4143 = vmatprep.subr.bf16.mxu0 %v4142_v4  ;;  %s4884_s26 = scalar_lea.vmem %s6504_s20, %s3608_s1  ;;  %v4893_v12 = vld [vmem:[%s4879_s25] sm:$0xff]  ;;  %v4896_v13 = vld [vmem:[%s4879_s25 + $0x8] sm:$0xff]  ;;  %v4899_v14 = vld [vmem:[%s4879_s25 + $0x10] sm:$0xff]  ;;  %v4126_v45 = vpack.c.bf16 %v838_v43, %v837_v42  ;;  %v4130_v51 = vpack.c.bf16 %v840_v49, %v839_v48 }
  0x2e   : > { %4111 = vmatprep.subr.bf16.mxu1 %v4110_v7  ;;  %3781 = vmatprep.mubr.msk.f32.mxu0 %vm695_vm1, %v4893_v12  ;;  %v677_v17 = vld [vmem:[%s4884_s26] sm:$0xff]  ;;  %v4918_v21 = vld [vmem:[%s4879_s25 + $0x18] sm:$0xff]  ;;  %v678_v22 = vld [vmem:[%s4884_s26 + $0x8] sm:$0xff] }
  0x2f   : > { %3782 = vmatmul.mubr.msk.f32.vlgmr.msra.gmra.mrb[0].mxu0 %vm695_vm1, %v4896_v13  ;;  %3795 = vmatprep.mubr.msk.f32.mxu1 %vm695_vm1, %v677_v17  ;;  %v4926_v24 = vld [vmem:[%s4879_s25 + $0x20] sm:$0xff]  ;;  %v679_v25 = vld [vmem:[%s4884_s26 + $0x10] sm:$0xff]  ;;  %v680_v27 = vld [vmem:[%s4884_s26 + $0x18] sm:$0xff] }
  0x30   : > { %3784 = vmatprep.mubr.msk.f32.mxu0 %vm695_vm1, %v4899_v14  ;;  %4145 = vmatpush3.bf16.msra.mxu0 %v4142_v4  ;;  %v4942_v31 = vld [vmem:[%s4879_s25 + $0x28] sm:$0xff]  ;;  %v4952_v34 = vld [vmem:[%s4879_s25 + $0x30] sm:$0xff]  ;;  %v681_v35 = vld [vmem:[%s4884_s26 + $0x20] sm:$0xff] }
  0x31   : > { %3796 = vmatmul.mubr.msk.f32.vlgmr.msra.gmra.mrb[0].mxu1 %vm695_vm1, %v678_v22  ;;  %4147 = vmatprep.subr.bf16.mxu0 %v4146_v15  ;;  %v682_v37 = vld [vmem:[%s4884_s26 + $0x28] sm:$0xff]  ;;  %v4968_v41 = vld [vmem:[%s4879_s25 + $0x38] sm:$0xff]  ;;  %v1110_v52 = vld [vmem:[%s6448_s15 + $0x60] sm:$0xff] }
  0x32   : > { %4113 = vmatpush3.bf16.msra.mxu1 %v4110_v7  ;;  %3798 = vmatprep.mubr.msk.f32.mxu1 %vm695_vm1, %v679_v25  ;;  %v1111_v53 = vld [vmem:[%s6448_s15 + $0x68] sm:$0xff]  ;;  %v841_v54 = vld [vmem:[%s6445_s12 + $0x60] sm:$0xff]  ;;  %v1112_v58 = vld [vmem:[%s6448_s15 + $0x70] sm:$0xff] }
  0x33   : > { %3785 = vmatmul.mubr.msk.f32.gmra.mrb[2].mxu0 %vm695_vm1, %v4918_v21  ;;  %4115 = vmatprep.subr.bf16.mxu1 %v4114_v18  ;;  %v842_v55 = vld [vmem:[%s6445_s12 + $0x68] sm:$0xff]  ;;  %v4166_v56 = vpack.c.bf16 %v1111_v53, %v1110_v52  ;;  %v1113_v59 = vld [vmem:[%s6448_s15 + $0x78] sm:$0xff]  ;;  %v843_v60 = vld [vmem:[%s6445_s12 + $0x70] sm:$0xff] }
  0x34   : > { %3787 = vmatprep.mubr.msk.f32.mxu0 %vm695_vm1, %v4926_v24  ;;  %4149 = vmatpush3.bf16.msra.mxu0 %v4146_v15  ;;  %v4134_v57 = vpack.c.bf16 %v842_v55, %v841_v54  ;;  %v683_v61 = vld [vmem:[%s4884_s26 + $0x30] sm:$0xff]  ;;  %v4170_v62 = vpack.c.bf16 %v1113_v59, %v1112_v58  ;;  %v844_v63 = vld [vmem:[%s6445_s12 + $0x78] sm:$0xff]  ;;  %v5023_v2 = vld [vmem:[%s6505_s6] sm:$0x3] }
  0x35   : > { %3799 = vmatmul.mubr.msk.f32.gmra.mrb[2].mxu1 %vm695_vm1, %v680_v27  ;;  %4151 = vmatprep.subr.bf16.mxu0 %v4150_v26  ;;  %v684_v0 = vld [vmem:[%s4884_s26 + $0x38] sm:$0xff]  ;;  %v4138_v1 = vpack.c.bf16 %v844_v63, %v843_v60  ;;  %v5032_v3 = vld [vmem:[%s6441_s8] sm:$0xff]  ;;  %v5037_v4 = vld [vmem:[%s6441_s8 + $0x8] sm:$0xff]  ;;  %s5815_s26 = scalar_lea.vmem [#allocation2], %s6651_s29 }
  0x36   : > { %4117 = vmatpush3.bf16.msra.mxu1 %v4114_v18  ;;  %3801 = vmatprep.mubr.msk.f32.mxu1 %vm695_vm1, %v681_v35  ;;  %6506 = vst [vmem:[#allocation15_spill] sm:$0xff] %v5032_v3  ;;  %6507 = vst [vmem:[#allocation16_spill] sm:$0xff] %v5037_v4  ;;  %v5042_v5 = vld [vmem:[%s6441_s8 + $0x10] sm:$0xff]  ;;  %v5047_v6 = vld [vmem:[%s6441_s8 + $0x18] sm:$0xff] }
  0x37   : > { %3788 = vmatmul.mubr.msk.f32.gmra.mrb[4].mxu0 %vm695_vm1, %v4942_v31  ;;  %4119 = vmatprep.subr.bf16.mxu1 %v4118_v28  ;;  %6508 = vst [vmem:[#allocation17_spill] sm:$0xff] %v5042_v5  ;;  %6509 = vst [vmem:[#allocation18_spill] sm:$0xff] %v5047_v6  ;;  %v5052_v7 = vld [vmem:[%s6441_s8 + $0x20] sm:$0xff]  ;;  %v5057_v8 = vld [vmem:[%s6441_s8 + $0x28] sm:$0xff] }
  0x38   : > { %3790 = vmatprep.mubr.msk.f32.mxu0 %vm695_vm1, %v4952_v34  ;;  %4153 = vmatpush3.bf16.msra.mxu0 %v4150_v26  ;;  %6510 = vst [vmem:[#allocation19_spill] sm:$0xff] %v5052_v7  ;;  %6511 = vst [vmem:[#allocation20_spill] sm:$0xff] %v5057_v8  ;;  %v5062_v9 = vld [vmem:[%s6441_s8 + $0x30] sm:$0xff]  ;;  %v5067_v10 = vld [vmem:[%s6441_s8 + $0x38] sm:$0xff] }
  0x39   : > { %3802 = vmatmul.mubr.msk.f32.gmra.mrb[4].mxu1 %vm695_vm1, %v682_v37  ;;  %4155 = vmatprep.subr.bf16.mxu0 %v4154_v36  ;;  %6512 = vst [vmem:[#allocation21_spill] sm:$0xff] %v5062_v9  ;;  %6513 = vst [vmem:[#allocation22_spill] sm:$0xff] %v5067_v10  ;;  %v5072_v11 = vld [vmem:[%s6441_s8 + $0x40] sm:$0xff]  ;;  %v5077_v15 = vld [vmem:[%s6441_s8 + $0x48] sm:$0xff] }
  0x3a   : > { %4121 = vmatpush3.bf16.msra.mxu1 %v4118_v28  ;;  %3804 = vmatprep.mubr.msk.f32.mxu1 %vm695_vm1, %v683_v61  ;;  %6514 = vst [vmem:[#allocation23_spill] sm:$0xff] %v5072_v11  ;;  %6515 = vst [vmem:[#allocation24_spill] sm:$0xff] %v5077_v15  ;;  %v5082_v16 = vld [vmem:[%s6441_s8 + $0x50] sm:$0xff]  ;;  %v5087_v17 = vld [vmem:[%s6441_s8 + $0x58] sm:$0xff] }
  0x3b   : > { %3791 = vmatmul.mubr.msk.f32.gmra.mrb[6].mxu0 %vm695_vm1, %v4968_v41  ;;  %4123 = vmatprep.subr.bf16.mxu1 %v4122_v38  ;;  %6516 = vst [vmem:[#allocation25_spill] sm:$0xff] %v5082_v16  ;;  %6517 = vst [vmem:[#allocation26_spill] sm:$0xff] %v5087_v17  ;;  %v5092_v18 = vld [vmem:[%s6441_s8 + $0x60] sm:$0xff]  ;;  %v5097_v19 = vld [vmem:[%s6441_s8 + $0x68] sm:$0xff] }
  0x3c   : > { %4157 = vmatpush3.bf16.msra.mxu0 %v4154_v36  ;;  %6518 = vst [vmem:[#allocation27_spill] sm:$0xff] %v5092_v18  ;;  %6519 = vst [vmem:[#allocation28_spill] sm:$0xff] %v5097_v19  ;;  %v5102_v20 = vld [vmem:[%s6441_s8 + $0x70] sm:$0xff]  ;;  %v5107_v22 = vld [vmem:[%s6441_s8 + $0x78] sm:$0xff] }
  0x3d   : > { %4159 = vmatprep.subr.bf16.mxu0 %v4158_v44  ;;  %3805 = vmatmul.mubr.msk.f32.gmra.mrb[6].mxu1 %vm695_vm1, %v684_v0  ;;  %6520 = vst [vmem:[#allocation29_spill] sm:$0xff] %v5102_v20  ;;  %6521 = vst [vmem:[#allocation30_spill] sm:$0xff] %v5107_v22  ;;  %v5112_v23 = vld [vmem:[%s6441_s8 + $0x80] sm:$0xff]  ;;  %v5117_v25 = vld [vmem:[%s6441_s8 + $0x88] sm:$0xff] }
  0x3e   : > { %4125 = vmatpush3.bf16.msra.mxu1 %v4122_v38  ;;  %6522 = vst [vmem:[#allocation31_spill] sm:$0xff] %v5112_v23  ;;  %6523 = vst [vmem:[#allocation32_spill] sm:$0xff] %v5117_v25  ;;  %v5122_v26 = vld [vmem:[%s6441_s8 + $0x90] sm:$0xff]  ;;  %v5127_v27 = vld [vmem:[%s6441_s8 + $0x98] sm:$0xff] }
  0x3f   : > { %4127 = vmatprep.subr.bf16.mxu1 %v4126_v45  ;;  %6524 = vst [vmem:[#allocation33_spill] sm:$0xff] %v5122_v26  ;;  %6525 = vst [vmem:[#allocation34_spill] sm:$0xff] %v5127_v27  ;;  %v5132_v28 = vld [vmem:[%s6441_s8 + $0xa0] sm:$0xff]  ;;  %v5137_v29 = vld [vmem:[%s6441_s8 + $0xa8] sm:$0xff] }
  0x40   : > { %4161 = vmatpush3.bf16.msra.mxu0 %v4158_v44  ;;  %6526 = vst [vmem:[#allocation35_spill] sm:$0xff] %v5132_v28  ;;  %6527 = vst [vmem:[#allocation36_spill] sm:$0xff] %v5137_v29  ;;  %v5142_v30 = vld [vmem:[%s6441_s8 + $0xb0] sm:$0xff]  ;;  %v5147_v32 = vld [vmem:[%s6441_s8 + $0xb8] sm:$0xff] }
  0x41   : > { %4163 = vmatprep.subr.bf16.mxu0 %v4162_v50  ;;  %6528 = vst [vmem:[#allocation37_spill] sm:$0xff] %v5142_v30  ;;  %6529 = vst [vmem:[#allocation38_spill] sm:$0xff] %v5147_v32  ;;  %v5152_v33 = vld [vmem:[%s6441_s8 + $0xc0] sm:$0xff]  ;;  %v5157_v35 = vld [vmem:[%s6441_s8 + $0xc8] sm:$0xff] }
  0x42   : > { %4129 = vmatpush3.bf16.msra.mxu1 %v4126_v45  ;;  %6530 = vst [vmem:[#allocation39_spill] sm:$0xff] %v5152_v33  ;;  %6531 = vst [vmem:[#allocation40_spill] sm:$0xff] %v5157_v35  ;;  %v5162_v36 = vld [vmem:[%s6441_s8 + $0xd0] sm:$0xff]  ;;  %v5167_v37 = vld [vmem:[%s6441_s8 + $0xd8] sm:$0xff] }
  0x43   : > { %4131 = vmatprep.subr.bf16.mxu1 %v4130_v51  ;;  %6532 = vst [vmem:[#allocation41_spill] sm:$0xff] %v5162_v36  ;;  %v5172_v38 = vld [vmem:[%s6441_s8 + $0xe0] sm:$0xff]  ;;  %v5177_v39 = vld [vmem:[%s6441_s8 + $0xe8] sm:$0xff]  ;;  %v5182_v40 = vld [vmem:[%s6441_s8 + $0xf0] sm:$0xff] }
  0x44   : > { %4165 = vmatpush3.bf16.msra.mxu0 %v4162_v50  ;;  %v5187_v42 = vld [vmem:[%s6441_s8 + $0xf8] sm:$0xff]  ;;  %v5192_v43 = vld [vmem:[%s6441_s8 + $0x100] sm:$0xff]  ;;  %v5197_v44 = vld [vmem:[%s6441_s8 + $0x108] sm:$0xff] }
  0x45   : > { %4167 = vmatprep.subr.bf16.mxu0 %v4166_v56  ;;  %v5202_v45 = vld [vmem:[%s6441_s8 + $0x110] sm:$0xff]  ;;  %v5207_v46 = vld [vmem:[%s6441_s8 + $0x118] sm:$0xff]  ;;  %v5212_v47 = vld [vmem:[%s6441_s8 + $0x120] sm:$0xff] }
  0x46   : > { %4133 = vmatpush3.bf16.msra.mxu1 %v4130_v51  ;;  %v5217_v48 = vld [vmem:[%s6441_s8 + $0x128] sm:$0xff]  ;;  %v5222_v49 = vld [vmem:[%s6441_s8 + $0x130] sm:$0xff]  ;;  %v5227_v50 = vld [vmem:[%s6441_s8 + $0x138] sm:$0xff] }
  0x47   : > { %4135 = vmatprep.subr.bf16.mxu1 %v4134_v57  ;;  %v5232_v51 = vld [vmem:[%s6441_s8 + $0x140] sm:$0xff]  ;;  %v5237_v52 = vld [vmem:[%s6441_s8 + $0x148] sm:$0xff]  ;;  %v5242_v53 = vld [vmem:[%s6441_s8 + $0x150] sm:$0xff] }
  0x48   : > { %4169 = vmatpush3.bf16.msra.mxu0 %v4166_v56  ;;  %6533 = vst [vmem:[#allocation42_spill] sm:$0xff] %v5242_v53  ;;  %v5247_v54 = vld [vmem:[%s6441_s8 + $0x158] sm:$0xff]  ;;  %v5252_v55 = vld [vmem:[%s6441_s8 + $0x160] sm:$0xff]  ;;  %v5257_v56 = vld [vmem:[%s6441_s8 + $0x168] sm:$0xff] }
  0x49   : > { %4171 = vmatprep.subr.bf16.mxu0 %v4170_v62  ;;  %6534 = vst [vmem:[#allocation43_spill] sm:$0xff] %v5252_v55  ;;  %6535 = vst [vmem:[#allocation44_spill] sm:$0xff] %v5257_v56  ;;  %v5267_v58 = vld [vmem:[%s6441_s8 + $0x178] sm:$0xff]  ;;  %v5272_v59 = vld [vmem:[%s6442_s9] sm:$0xff] }
  0x4a   : > { %4137 = vmatpush3.bf16.msra.mxu1 %v4134_v57  ;;  %v5262_v57 = vld [vmem:[%s6441_s8 + $0x170] sm:$0xff]  ;;  %6536 = vst [vmem:[#allocation45_spill] sm:$0xff] %v5267_v58  ;;  %6537 = vst [vmem:[#allocation46_spill] sm:$0xff] %v5272_v59  ;;  %v5277_v60 = vld [vmem:[%s6442_s9 + $0x8] sm:$0xff] }
  0x4b   : > { %4139 = vmatprep.subr.bf16.mxu1 %v4138_v1  ;;  %6538 = vst [vmem:[#allocation47_spill] sm:$0xff] %v5277_v60  ;;  %v5282_v61 = vld [vmem:[%s6442_s9 + $0x10] sm:$0xff]  ;;  %v5292_v63 = vld [vmem:[%s6442_s9 + $0x20] sm:$0xff]  ;;  %v5297_v0 = vld [vmem:[%s6442_s9 + $0x28] sm:$0xff] }
  0x4c   : > { %4173 = vmatpush3.bf16.msra.mxu0 %v4170_v62  ;;  %6539 = vst [vmem:[#allocation48_spill] sm:$0xff] %v5282_v61  ;;  %v5287_v62 = vld [vmem:[%s6442_s9 + $0x18] sm:$0xff]  ;;  %6541 = vst [vmem:[#allocation50_spill] sm:$0xff] %v5292_v63  ;;  %v5317_v59 = vld [vmem:[%s6442_s9 + $0x48] sm:$0xff] }
  0x4d   : > { %3895 = vmatprep.subr.msk.mxu0 %vm720_vm0, %v5023_v2  ;;  %6540 = vst [vmem:[#allocation49_spill] sm:$0xff] %v5287_v62  ;;  %6542 = vst [vmem:[#allocation51_spill] sm:$0xff] %v5297_v0  ;;  %v5307_v61 = vld [vmem:[%s6442_s9 + $0x38] sm:$0xff]  ;;  %v5312_v62 = vld [vmem:[%s6442_s9 + $0x40] sm:$0xff] }
  0x4e   : > { %4141 = vmatpush3.bf16.msra.mxu1 %v4138_v1  ;;  %v5302_v1 = vld [vmem:[%s6442_s9 + $0x30] sm:$0xff]  ;;  %6544 = vst [vmem:[#allocation53_spill] sm:$0xff] %v5307_v61  ;;  %6545 = vst [vmem:[#allocation54_spill] sm:$0xff] %v5312_v62  ;;  %v5332_v61 = vld [vmem:[%s6442_s9 + $0x60] sm:$0xff] }
  0x4f   : > { %4358 = vmatprep.subr.msk.mxu1 %vm720_vm0, %v5023_v2  ;;  %6543 = vst [vmem:[#allocation52_spill] sm:$0xff] %v5302_v1  ;;  %6546 = vst [vmem:[#allocation55_spill] sm:$0xff] %v5317_v59  ;;  %v5322_v0 = vld [vmem:[%s6442_s9 + $0x50] sm:$0xff]  ;;  %v5327_v1 = vld [vmem:[%s6442_s9 + $0x58] sm:$0xff] }
  0x50   : > { %6547 = vst [vmem:[#allocation56_spill] sm:$0xff] %v5322_v0  ;;  %6548 = vst [vmem:[#allocation57_spill] sm:$0xff] %v5327_v1  ;;  %v5337_v62 = vld [vmem:[%s6442_s9 + $0x68] sm:$0xff]  ;;  %v5342_v59 = vld [vmem:[%s6442_s9 + $0x70] sm:$0xff] }
  0x51   : > { %6549 = vst [vmem:[#allocation58_spill] sm:$0xff] %v5332_v61  ;;  %6550 = vst [vmem:[#allocation59_spill] sm:$0xff] %v5337_v62  ;;  %v5347_v0 = vld [vmem:[%s6442_s9 + $0x78] sm:$0xff]  ;;  %v5352_v1 = vld [vmem:[%s6442_s9 + $0x80] sm:$0xff] }
  0x52   : > { %6551 = vst [vmem:[#allocation60_spill] sm:$0xff] %v5342_v59  ;;  %6552 = vst [vmem:[#allocation61_spill] sm:$0xff] %v5347_v0  ;;  %v5357_v61 = vld [vmem:[%s6442_s9 + $0x88] sm:$0xff]  ;;  %v5362_v62 = vld [vmem:[%s6442_s9 + $0x90] sm:$0xff] }
  0x53   : > { %6553 = vst [vmem:[#allocation62_spill] sm:$0xff] %v5352_v1  ;;  %6554 = vst [vmem:[#allocation63_spill] sm:$0xff] %v5357_v61  ;;  %v5367_v59 = vld [vmem:[%s6442_s9 + $0x98] sm:$0xff]  ;;  %v5372_v0 = vld [vmem:[%s6442_s9 + $0xa0] sm:$0xff] }
  0x54   : > { %6555 = vst [vmem:[#allocation64_spill] sm:$0xff] %v5362_v62  ;;  %6556 = vst [vmem:[#allocation65_spill] sm:$0xff] %v5367_v59  ;;  %v5377_v1 = vld [vmem:[%s6442_s9 + $0xa8] sm:$0xff]  ;;  %v5382_v61 = vld [vmem:[%s6442_s9 + $0xb0] sm:$0xff] }
  0x55   : > { %6557 = vst [vmem:[#allocation66_spill] sm:$0xff] %v5372_v0  ;;  %6558 = vst [vmem:[#allocation67_spill] sm:$0xff] %v5377_v1  ;;  %v5387_v62 = vld [vmem:[%s6442_s9 + $0xb8] sm:$0xff]  ;;  %v5392_v59 = vld [vmem:[%s6442_s9 + $0xc0] sm:$0xff] }
  0x56   : > { %6559 = vst [vmem:[#allocation68_spill] sm:$0xff] %v5382_v61  ;;  %6560 = vst [vmem:[#allocation69_spill] sm:$0xff] %v5387_v62  ;;  %v5397_v0 = vld [vmem:[%s6442_s9 + $0xc8] sm:$0xff]  ;;  %v5402_v1 = vld [vmem:[%s6442_s9 + $0xd0] sm:$0xff] }
  0x57   : > { %6561 = vst [vmem:[#allocation70_spill] sm:$0xff] %v5392_v59  ;;  %6562 = vst [vmem:[#allocation71_spill] sm:$0xff] %v5397_v0  ;;  %v5407_v61 = vld [vmem:[%s6442_s9 + $0xd8] sm:$0xff]  ;;  %v5412_v62 = vld [vmem:[%s6442_s9 + $0xe0] sm:$0xff] }
  0x58   : > { %6563 = vst [vmem:[#allocation72_spill] sm:$0xff] %v5402_v1  ;;  %6564 = vst [vmem:[#allocation73_spill] sm:$0xff] %v5407_v61  ;;  %v5417_v59 = vld [vmem:[%s6442_s9 + $0xe8] sm:$0xff]  ;;  %v5422_v0 = vld [vmem:[%s6442_s9 + $0xf0] sm:$0xff] }
  0x59   : > { %6565 = vst [vmem:[#allocation74_spill] sm:$0xff] %v5412_v62  ;;  %6566 = vst [vmem:[#allocation75_spill] sm:$0xff] %v5417_v59  ;;  %v5427_v1 = vld [vmem:[%s6442_s9 + $0xf8] sm:$0xff]  ;;  %v5432_v61 = vld [vmem:[%s6442_s9 + $0x100] sm:$0xff] }
  0x5a   : > { %6567 = vst [vmem:[#allocation76_spill] sm:$0xff] %v5422_v0  ;;  %6568 = vst [vmem:[#allocation77_spill] sm:$0xff] %v5427_v1  ;;  %v5437_v62 = vld [vmem:[%s6442_s9 + $0x108] sm:$0xff]  ;;  %v5442_v59 = vld [vmem:[%s6442_s9 + $0x110] sm:$0xff] }
  0x5b   : > { %6569 = vst [vmem:[#allocation78_spill] sm:$0xff] %v5432_v61  ;;  %6570 = vst [vmem:[#allocation79_spill] sm:$0xff] %v5437_v62  ;;  %v5447_v0 = vld [vmem:[%s6442_s9 + $0x118] sm:$0xff]  ;;  %v5452_v1 = vld [vmem:[%s6442_s9 + $0x120] sm:$0xff] }
  0x5c   : > { %6571 = vst [vmem:[#allocation80_spill] sm:$0xff] %v5442_v59  ;;  %6572 = vst [vmem:[#allocation81_spill] sm:$0xff] %v5447_v0  ;;  %v5457_v61 = vld [vmem:[%s6442_s9 + $0x128] sm:$0xff]  ;;  %v5462_v62 = vld [vmem:[%s6442_s9 + $0x130] sm:$0xff] }
  0x5d   : > { %6573 = vst [vmem:[#allocation82_spill] sm:$0xff] %v5452_v1  ;;  %6574 = vst [vmem:[#allocation83_spill] sm:$0xff] %v5457_v61  ;;  %v5467_v59 = vld [vmem:[%s6442_s9 + $0x138] sm:$0xff]  ;;  %v5472_v0 = vld [vmem:[%s6442_s9 + $0x140] sm:$0xff] }
  0x5e   : > { %6575 = vst [vmem:[#allocation84_spill] sm:$0xff] %v5462_v62  ;;  %6576 = vst [vmem:[#allocation85_spill] sm:$0xff] %v5467_v59  ;;  %v5477_v1 = vld [vmem:[%s6442_s9 + $0x148] sm:$0xff]  ;;  %v5482_v61 = vld [vmem:[%s6442_s9 + $0x150] sm:$0xff] }
  0x5f   : > { %6577 = vst [vmem:[#allocation86_spill] sm:$0xff] %v5472_v0  ;;  %6578 = vst [vmem:[#allocation87_spill] sm:$0xff] %v5477_v1  ;;  %v5487_v62 = vld [vmem:[%s6442_s9 + $0x158] sm:$0xff]  ;;  %v5492_v59 = vld [vmem:[%s6442_s9 + $0x160] sm:$0xff] }
  0x60   : > { %6579 = vst [vmem:[#allocation88_spill] sm:$0xff] %v5482_v61  ;;  %6580 = vst [vmem:[#allocation89_spill] sm:$0xff] %v5487_v62  ;;  %v5497_v0 = vld [vmem:[%s6442_s9 + $0x168] sm:$0xff]  ;;  %v5502_v1 = vld [vmem:[%s6442_s9 + $0x170] sm:$0xff] }
  0x61   : > { %6581 = vst [vmem:[#allocation90_spill] sm:$0xff] %v5492_v59  ;;  %6582 = vst [vmem:[#allocation91_spill] sm:$0xff] %v5497_v0  ;;  %v5507_v61 = vld [vmem:[%s6442_s9 + $0x178] sm:$0xff]  ;;  %v5512_v62 = vld [vmem:[%s6443_s10] sm:$0x7] }
  0x62   : > { %6583 = vst [vmem:[#allocation92_spill] sm:$0xff] %v5502_v1  ;;  %6584 = vst [vmem:[#allocation93_spill] sm:$0xff] %v5507_v61  ;;  %v5517_v59 = vld [vmem:[%s6444_s11] sm:$0x7]  ;;  %v5527_v1 = vld [vmem:[%s6446_s13 + $0x8] sm:$0xff] }
  0x63   : > { %6585 = vst [vmem:[#allocation94_spill] sm:$0xff] %v5512_v62  ;;  %6586 = vst [vmem:[#allocation95_spill] sm:$0xff] %v5517_v59  ;;  %v5522_v0 = vld [vmem:[%s6446_s13] sm:$0xff]  ;;  %v5532_v61 = vld [vmem:[%s6446_s13 + $0x10] sm:$0xff] }
  0x64   : > { %6587 = vst [vmem:[#allocation96_spill] sm:$0xff] %v5522_v0  ;;  %6588 = vst [vmem:[#allocation97_spill] sm:$0xff] %v5527_v1  ;;  %v5537_v62 = vld [vmem:[%s6446_s13 + $0x18] sm:$0xff]  ;;  %v5542_v59 = vld [vmem:[%s6446_s13 + $0x20] sm:$0xff] }
  0x65   : > { %6589 = vst [vmem:[#allocation98_spill] sm:$0xff] %v5532_v61  ;;  %6590 = vst [vmem:[#allocation99_spill] sm:$0xff] %v5537_v62  ;;  %v5547_v0 = vld [vmem:[%s6446_s13 + $0x28] sm:$0xff]  ;;  %v5552_v1 = vld [vmem:[%s6446_s13 + $0x30] sm:$0xff] }
  0x66   : > { %6591 = vst [vmem:[#allocation100_spill] sm:$0xff] %v5542_v59  ;;  %6592 = vst [vmem:[#allocation101_spill] sm:$0xff] %v5547_v0  ;;  %v5557_v61 = vld [vmem:[%s6446_s13 + $0x38] sm:$0xff]  ;;  %v5562_v62 = vld [vmem:[%s6446_s13 + $0x40] sm:$0xff] }
  0x67   : > { %6593 = vst [vmem:[#allocation102_spill] sm:$0xff] %v5552_v1  ;;  %6594 = vst [vmem:[#allocation103_spill] sm:$0xff] %v5557_v61  ;;  %v5567_v59 = vld [vmem:[%s6446_s13 + $0x48] sm:$0xff]  ;;  %v5572_v0 = vld [vmem:[%s6446_s13 + $0x50] sm:$0xff] }
  0x68   : > { %6595 = vst [vmem:[#allocation104_spill] sm:$0xff] %v5562_v62  ;;  %6596 = vst [vmem:[#allocation105_spill] sm:$0xff] %v5567_v59  ;;  %v5577_v1 = vld [vmem:[%s6446_s13 + $0x58] sm:$0xff]  ;;  %v5582_v61 = vld [vmem:[%s6446_s13 + $0x60] sm:$0xff] }
  0x69   : > { %6597 = vst [vmem:[#allocation106_spill] sm:$0xff] %v5572_v0  ;;  %6598 = vst [vmem:[#allocation107_spill] sm:$0xff] %v5577_v1  ;;  %v5587_v62 = vld [vmem:[%s6446_s13 + $0x68] sm:$0xff]  ;;  %v5592_v59 = vld [vmem:[%s6446_s13 + $0x70] sm:$0xff] }
  0x6a   : > { %6599 = vst [vmem:[#allocation108_spill] sm:$0xff] %v5582_v61  ;;  %6600 = vst [vmem:[#allocation109_spill] sm:$0xff] %v5587_v62  ;;  %v5597_v0 = vld [vmem:[%s6446_s13 + $0x78] sm:$0xff]  ;;  %v5602_v1 = vld [vmem:[%s6449_s16] sm:$0xff] }
  0x6b   : > { %6601 = vst [vmem:[#allocation110_spill] sm:$0xff] %v5592_v59  ;;  %6602 = vst [vmem:[#allocation111_spill] sm:$0xff] %v5597_v0  ;;  %v5607_v61 = vld [vmem:[%s6449_s16 + $0x8] sm:$0xff]  ;;  %v5612_v62 = vld [vmem:[%s6449_s16 + $0x10] sm:$0xff] }
  0x6c   : > { %6603 = vst [vmem:[#allocation112_spill] sm:$0xff] %v5602_v1  ;;  %6604 = vst [vmem:[#allocation113_spill] sm:$0xff] %v5607_v61  ;;  %v5617_v59 = vld [vmem:[%s6449_s16 + $0x18] sm:$0xff]  ;;  %v5622_v0 = vld [vmem:[%s6449_s16 + $0x20] sm:$0xff] }
  0x6d   : > { %6605 = vst [vmem:[#allocation114_spill] sm:$0xff] %v5612_v62  ;;  %6606 = vst [vmem:[#allocation115_spill] sm:$0xff] %v5617_v59  ;;  %v5627_v1 = vld [vmem:[%s6449_s16 + $0x28] sm:$0xff]  ;;  %v5632_v61 = vld [vmem:[%s6449_s16 + $0x30] sm:$0xff] }
  0x6e   : > { %6607 = vst [vmem:[#allocation116_spill] sm:$0xff] %v5622_v0  ;;  %6608 = vst [vmem:[#allocation117_spill] sm:$0xff] %v5627_v1  ;;  %v5637_v62 = vld [vmem:[%s6449_s16 + $0x38] sm:$0xff]  ;;  %v5642_v59 = vld [vmem:[%s6449_s16 + $0x40] sm:$0xff] }
  0x6f   : > { %6609 = vst [vmem:[#allocation118_spill] sm:$0xff] %v5632_v61  ;;  %6610 = vst [vmem:[#allocation119_spill] sm:$0xff] %v5637_v62  ;;  %v5647_v0 = vld [vmem:[%s6449_s16 + $0x48] sm:$0xff]  ;;  %v5652_v1 = vld [vmem:[%s6449_s16 + $0x50] sm:$0xff] }
  0x70   : > { %6611 = vst [vmem:[#allocation120_spill] sm:$0xff] %v5642_v59  ;;  %6612 = vst [vmem:[#allocation121_spill] sm:$0xff] %v5647_v0  ;;  %v5657_v61 = vld [vmem:[%s6449_s16 + $0x58] sm:$0xff]  ;;  %v5662_v62 = vld [vmem:[%s6449_s16 + $0x60] sm:$0xff] }
  0x71   : > { %6613 = vst [vmem:[#allocation122_spill] sm:$0xff] %v5652_v1  ;;  %6614 = vst [vmem:[#allocation123_spill] sm:$0xff] %v5657_v61  ;;  %v5667_v59 = vld [vmem:[%s6449_s16 + $0x68] sm:$0xff]  ;;  %v5672_v0 = vld [vmem:[%s6449_s16 + $0x70] sm:$0xff] }
  0x72   : > { %6615 = vst [vmem:[#allocation124_spill] sm:$0xff] %v5662_v62  ;;  %6616 = vst [vmem:[#allocation125_spill] sm:$0xff] %v5667_v59  ;;  %v5677_v1 = vld [vmem:[%s6449_s16 + $0x78] sm:$0xff]  ;;  %v5682_v61 = vld [vmem:[%s6447_s14] ss:$0 sm:$0xff] }
  0x73   : > { %6617 = vst [vmem:[#allocation126_spill] sm:$0xff] %v5672_v0  ;;  %6618 = vst [vmem:[#allocation127_spill] sm:$0xff] %v5677_v1  ;;  %v5687_v62 = vld [vmem:[%s6450_s17] ss:$0 sm:$0xff] }
  0x74   : > { %6619 = vst [vmem:[#allocation128_spill] sm:$0xff] %v5682_v61  ;;  %6620 = vst [vmem:[#allocation129_spill] sm:$0xff] %v5687_v62  ;;  %v3560_v59 = vld [vmem:[%s6621_s24] ss:$0 sm:$0xff] }
 0x102   : > { %v3783_v0 = vpop.f32.mrb[0].mxu0 }
 0x103   : > { %v790_v58 = vpop.f32.mrb[1].mxu0  ;;  %v5694_v63 = vadd.f32 %v3783_v0, %v3560_v59  ;;  %v4681_v0 = vmov 0.0  }
 0x104   : > { %v5692_v55 = vadd.f32 %v3560_v59, %v790_v58 }
 0x105   : > { %6623 = vst [vmem:[#allocation131_spill] sm:$0xff] %v5694_v63 }
 0x106   : > { %6622 = vst [vmem:[#allocation130_spill] sm:$0xff] %v5692_v55  ;;  %v3786_v1 = vpop.f32.mrb[2].mxu0  ;;  %3839 = vmatprep.mubr.f32.mxu1 %v5692_v55  ;;  %3883 = vmatprep.mubr.f32.mxu0 %v5692_v55 }
 0x107   : > { %v800_v61 = vpop.f32.mrb[3].mxu0  ;;  %3840 = vmatmul.mubr.f32.vlgmr.msra.gmra.mrb[0].mxu1 %v5694_v63  ;;  %3884 = vmatmul.mubr.f32.vlgmr.msra.gmra.mrb[8].mxu0 %v5694_v63  ;;  %v5706_v58 = vadd.f32 %v3786_v1, %v3560_v59 }
 0x108   : > { %v5700_v62 = vadd.f32 %v3560_v59, %v800_v61  ;;  %3896 = vmatpush3.msk.msra.mxu0 %vm720_vm0, %v5023_v2  ;;  %4359 = vmatpush3.msk.msra.mxu1 %vm720_vm0, %v5023_v2 }
 0x109   : > { %6625 = vst [vmem:[#allocation133_spill] sm:$0xff] %v5706_v58  ;;  %3909 = vmatprep.subr.mxu1 %v4681_v0 }
 0x10a   : > { %6624 = vst [vmem:[#allocation132_spill] sm:$0xff] %v5700_v62  ;;  %v3789_v60 = vpop.f32.mrb[4].mxu0  ;;  %3842 = vmatprep.mubr.f32.mxu1 %v5700_v62  ;;  %3886 = vmatprep.mubr.f32.mxu0 %v5700_v62 }
 0x10b   : > { %v810_v55 = vpop.f32.mrb[5].mxu0  ;;  %3843 = vmatmul.mubr.f32.gmra.mrb[2].mxu1 %v5706_v58  ;;  %3887 = vmatmul.mubr.f32.gmra.mrb[10].mxu0 %v5706_v58  ;;  %v5714_v63 = vadd.f32 %v3789_v60, %v3560_v59 }
 0x10c   : > { %v5712_v61 = vadd.f32 %v3560_v59, %v810_v55  ;;  %v1467_v55 = vld [vmem:[%s6451_s18] sm:$0x1] }
 0x10d   : > { %6627 = vst [vmem:[#allocation135_spill] sm:$0xff] %v5714_v63 }
 0x10e   : > { %6626 = vst [vmem:[#allocation134_spill] sm:$0xff] %v5712_v61  ;;  %v3792_v56 = vpop.f32.mrb[6].mxu0  ;;  %3845 = vmatprep.mubr.f32.mxu1 %v5712_v61  ;;  %3889 = vmatprep.mubr.f32.mxu0 %v5712_v61 }
 0x10f   : > { %v820_v1 = vpop.f32.mrb[7].mxu0  ;;  %3846 = vmatmul.mubr.f32.gmra.mrb[4].mxu1 %v5714_v63  ;;  %3890 = vmatmul.mubr.f32.gmra.mrb[12].mxu0 %v5714_v63  ;;  %v5722_v53 = vadd.f32 %v3792_v56, %v3560_v59 }
 0x110   : > { %v5720_v62 = vadd.f32 %v3560_v59, %v820_v1 }
 0x111   : > { %6629 = vst [vmem:[#allocation137_spill] sm:$0xff] %v5722_v53 }
 0x112   : > { %6628 = vst [vmem:[#allocation136_spill] sm:$0xff] %v5720_v62  ;;  %3848 = vmatprep.mubr.f32.mxu1 %v5720_v62  ;;  %3892 = vmatprep.mubr.f32.mxu0 %v5720_v62 }
 0x113   : > { %3849 = vmatmul.mubr.f32.gmra.mrb[6].mxu1 %v5722_v53  ;;  %3893 = vmatmul.mubr.f32.gmra.mrb[14].mxu0 %v5722_v53 }
 0x114   : > { %3897 = vmatprep.mubr.msk.f32.mxu0 %vm695_vm1, %v4893_v12  ;;  %3906 = vmatprep.mubr.msk.f32.mxu1 %vm695_vm1, %v4952_v34  ;;  %v1220_v12 = vlaneseq }
 0x117   : > { %3898 = vmatmul.mubr.msk.f32.vlgmr.msra.gmra.mrb[16].mxu0 %vm695_vm1, %v4896_v13  ;;  %3907 = vmatmul.mubr.msk.f32.vlgmr.msra.gmra.mrb[8].mxu1 %vm695_vm1, %v4968_v41  ;;  %v5750_v13 = vand.u32 127, %v1220_v12 }
 0x118   : > { %3900 = vmatprep.mubr.msk.f32.mxu0 %vm695_vm1, %v4899_v14  ;;  %3910 = vmatpush3.msk.msra.mxu1 %vm720_vm0, %v5023_v2  ;;  %v3579_v14 = vld [vmem:[%s6631_s5] ss:$0 sm:$0xff] }
 0x119   : > { %3911 = vmatprep.mubr.msk.f32.mxu1 %vm4682_vm2, %v4681_v0  ;;  %6630 = vst [vmem:[#allocation138_spill] sm:$0xff] %v5750_v13 }
 0x11b   : > { %3901 = vmatmul.mubr.msk.f32.gmra.mrb[18].mxu0 %vm695_vm1, %v4918_v21  ;;  %3912 = vmatmul.mubr.msk.f32.vlgmr.msra.gmra.mrb[10].mxu1 %vm695_vm1, %v1467_v55  ;;  %v5769_v55 = vshrl.u32 %v1220_v12, 7  ;;  %v686_v12 = vld [vmem:[%s6644_s7] sm:$0x1] }
 0x11c   : > { %3903 = vmatprep.mubr.msk.f32.mxu0 %vm695_vm1, %v4926_v24 }
 0x11d   : > { %v5780_v63 = vsub.s32 0, %v5769_v55 }
 0x11f   : > { %3904 = vmatmul.mubr.msk.f32.gmra.mrb[20].mxu0 %vm695_vm1, %v4942_v31  ;;  %v1223_v61 = vrot.slane %v686_v12, %v5780_v63 }
 0x1da   : > { %v3841_v34 = vpop.f32.mrb[0].mxu1  ;;  %v5755_v41 = vpop.f32.mrb[8].mxu0 }
 0x1db   : > { %6632 = vst [vmem:[#allocation139_spill] sm:$0xff] %v5755_v41  ;;  %v5757_v2 = vadd.f32 %v3841_v34, %v3579_v14  ;;  %v1044_v21 = vpop.f32.mrb[1].mxu1  ;;  %v5759_v56 = vpop.f32.mrb[9].mxu0 }
 0x1dc   : > { %6634 = vst [vmem:[#allocation141_spill] sm:$0xff] %v5759_v56  ;;  %v5761_v59 = vadd.f32 %v3579_v14, %v1044_v21 }
 0x1dd   : > { %6633 = vst [vmem:[#allocation140_spill] sm:$0xff] %v5757_v2 }
 0x1de   : > { %6635 = vst [vmem:[#allocation142_spill] sm:$0xff] %v5761_v59  ;;  %v3844_v24 = vpop.f32.mrb[2].mxu1  ;;  %v5763_v60 = vpop.f32.mrb[10].mxu0 }
 0x1df   : > { %6636 = vst [vmem:[#allocation143_spill] sm:$0xff] %v5763_v60  ;;  %v5765_v31 = vadd.f32 %v3844_v24, %v3579_v14  ;;  %v1054_v0 = vpop.f32.mrb[3].mxu1  ;;  %v5767_v1 = vpop.f32.mrb[11].mxu0 }
 0x1e0   : > { %6638 = vst [vmem:[#allocation145_spill] sm:$0xff] %v5767_v1  ;;  %v5771_v53 = vadd.f32 %v3579_v14, %v1054_v0 }
 0x1e1   : > { %6637 = vst [vmem:[#allocation144_spill] sm:$0xff] %v5765_v31 }
 0x1e2   : > { %6639 = vst [vmem:[#allocation146_spill] sm:$0xff] %v5771_v53  ;;  %v3847_v41 = vpop.f32.mrb[4].mxu1  ;;  %v5773_v34 = vpop.f32.mrb[12].mxu0 }
 0x1e3   : > { %6640 = vst [vmem:[#allocation147_spill] sm:$0xff] %v5773_v34  ;;  %v5775_v62 = vadd.f32 %v3847_v41, %v3579_v14  ;;  %v1064_v56 = vpop.f32.mrb[5].mxu1  ;;  %v5777_v21 = vpop.f32.mrb[13].mxu0 }
 0x1e4   : > { %6642 = vst [vmem:[#allocation149_spill] sm:$0xff] %v5777_v21  ;;  %v5782_v24 = vadd.f32 %v3579_v14, %v1064_v56 }
 0x1e5   : > { %6641 = vst [vmem:[#allocation148_spill] sm:$0xff] %v5775_v62 }
 0x1e6   : > { %6643 = vst [vmem:[#allocation150_spill] sm:$0xff] %v5782_v24  ;;  %v3850_v60 = vpop.f32.mrb[6].mxu1  ;;  %v5787_v0 = vpop.f32.mrb[14].mxu0 }
 0x1e7   : > { %6645 = vst [vmem:[#allocation151_spill] sm:$0xff] %v5787_v0  ;;  %v5789_v1 = vadd.f32 %v3850_v60, %v3579_v14  ;;  %v1074_v34 = vpop.f32.mrb[7].mxu1  ;;  %v5791_v41 = vpop.f32.mrb[15].mxu0 }
 0x1e8   : > { %6647 = vst [vmem:[#allocation153_spill] sm:$0xff] %v5791_v41  ;;  %v5794_v21 = vadd.f32 %v3579_v14, %v1074_v34 }
 0x1e9   : > { %6646 = vst [vmem:[#allocation152_spill] sm:$0xff] %v5789_v1 }
 0x1ea   : > { %6648 = vst [vmem:[#allocation154_spill] sm:$0xff] %v5794_v21  ;;  %v3899_v58 = vpop.f32.mrb[16].mxu0  ;;  %v3908_v13 = vpop.f32.mrb[8].mxu1 }
 0x1eb   : > { %v5796_v56 = vadd.f32 %v3899_v58, %v1223_v61  ;;  %v1294_v62 = vpop.f32.mrb[17].mxu0  ;;  %v5798_v24 = vadd.f32 %v3908_v13, %v1223_v61  ;;  %v1324_v31 = vpop.f32.mrb[9].mxu1 }
 0x1ec   : > { %v5800_v0 = vadd.f32 %v1294_v62, %v1223_v61  ;;  %v5802_v60 = vadd.f32 %v1324_v31, %v1223_v61  ;;  %v5821_v62 = vmov 0.0   ;;  %v5823_v31 = vmov 0  }
 0x1ed   : > { %6649 = vst [vmem:[#allocation155_spill] sm:$0xff] %v5796_v56  ;;  %6650 = vst [vmem:[#allocation156_spill] sm:$0xff] %v5798_v24 }
 0x1ee   : > { %v3902_v1 = vpop.f32.mrb[18].mxu0  ;;  %v1537_v41 = vpop.f32.mrb[10].mxu1 }
 0x1ef   : > { %v5804_v53 = vadd.f32 %v3902_v1, %v1223_v61  ;;  %v1304_v14 = vpop.f32.mrb[19].mxu0  ;;  %v1538_v34 = vadd.f32 %v1537_v41, %v686_v12  ;;  %v3913_v21 = vpop.f32.mrb[11].mxu1  ;;  %v5827_v1 = vmov 0.0  }
 0x1f0   : > { %v5806_v2 = vadd.f32 %v1304_v14, %v1223_v61 }
 0x1f1   : > { %v1544_v58 = vrot.slane %v1538_v34, %v5780_v63  }
 0x1f2   : > { %v3905_v13 = vpop.f32.mrb[20].mxu0 }
 0x1f3   : > { %v5809_v24 = vadd.f32 %v3905_v13, %v1223_v61  ;;  %v1314_v56 = vpop.f32.mrb[21].mxu0 }
 0x1f4   : > { %v5811_v59 = vadd.f32 %v1314_v56, %v1223_v61 }
 0x1f5 LB: >> { %v6653_v4 = vld [vmem:[#allocation16_spill] sm:$0xff]  ;;  %v6654_v7 = vld [vmem:[#allocation19_spill] sm:$0xff]  ;;  %v6656_v6 = vld [vmem:[#allocation18_spill] sm:$0xff]  ;;  %v6477_v14 = vmov 0.0|0.0   ;;  %v6475_v13 = vmov 0.0   ;;  %vm4685_vm3 = vmmov 0   ;;  %s4679_s23 = sphi %s5829_s23, %s1550_s23   ;;  %v4675_v1 = vphi %v5827_v1, %v6017_v1   ;;  %v4671_v58 = vphi %v1544_v58, %v3391_v58   ;;  %v4667_v31 = vphi %v5823_v31, %v6801_v31   ;;  %v4663_v62 = vphi %v5821_v62, %v6800_v62  }
 0x1f6   : >> { %v4174_v61 = vpack.c.bf16 %v6654_v7, %v6653_v4  ;;  %v6655_v3 = vld [vmem:[#allocation15_spill] sm:$0xff]  ;;  %v6657_v10 = vld [vmem:[#allocation22_spill] sm:$0xff]  ;;  %v6658_v16 = vld [vmem:[#allocation25_spill] sm:$0xff]  ;;  %4206 = vmatprep.subr.bf16.mxu1 %v6477_v14  ;;  %1635 = vmatprep.mubr.f32.mxu0 %v6475_v13  ;;  %vm2068_vm4 = vcmask 130112   ;;  %vm2097_vm5 = vcmask 1041409   ;;  %vm2099_vm6 = vcmask 1042434  }
 0x1f7   : >> { %v4176_v21 = vpack.c.bf16 %v6656_v6, %v6655_v3  ;;  %v4178_v12 = vpack.c.bf16 %v6658_v16, %v6657_v10  ;;  %v6659_v9 = vld [vmem:[#allocation21_spill] sm:$0xff]  ;;  %v6660_v15 = vld [vmem:[#allocation24_spill] sm:$0xff]  ;;  %v6662_v23 = vld [vmem:[#allocation31_spill] sm:$0xff]  ;;  %3946 = vmatprep.mubr.msk.f32.mxu1 %vm4685_vm3, %v6475_v13  ;;  %vm2101_vm7 = vcmask 1043459   ;;  %vm2104_vm8 = vcmask 125952  }
 0x1f8   : >> { %4175 = vmatprep.subr.bf16.mxu0 %v4174_v61  ;;  %v4180_v41 = vpack.c.bf16 %v6660_v15, %v6659_v9  ;;  %v6661_v19 = vld [vmem:[#allocation28_spill] sm:$0xff]  ;;  %v6663_v5 = vld [vmem:[#allocation17_spill] sm:$0xff]  ;;  %v6665_v11 = vld [vmem:[#allocation23_spill] sm:$0xff]  ;;  %vm2275_vm9 = vcmask 130048  }
 0x1f9   : >> { %4177 = vmatpush1.bf16.msra.mxu0 %v4176_v21  ;;  %v4182_v56 = vpack.c.bf16 %v6662_v23, %v6661_v19  ;;  %v6664_v8 = vld [vmem:[#allocation20_spill] sm:$0xff]  ;;  %v6666_v17 = vld [vmem:[#allocation26_spill] sm:$0xff]  ;;  %v6667_v18 = vld [vmem:[#allocation27_spill] sm:$0xff] }
 0x1fa   : >> { %4179 = vmatprep.subr.bf16.mxu0 %v4178_v12  ;;  %v4207_v34 = vpack.c.bf16 %v6664_v8, %v6663_v5  ;;  %v4210_v61 = vpack.c.bf16 %v6666_v17, %v6665_v11  ;;  %v6668_v22 = vld [vmem:[#allocation30_spill] sm:$0xff]  ;;  %v6670_v30 = vld [vmem:[#allocation37_spill] sm:$0xff]  ;;  %v6672_v25 = vld [vmem:[#allocation32_spill] sm:$0xff] }
 0x1fb   : >> { %v4184_v21 = vpack.c.bf16 %v6668_v22, %v6667_v18  ;;  %v6669_v27 = vld [vmem:[#allocation34_spill] sm:$0xff]  ;;  %v6671_v20 = vld [vmem:[#allocation29_spill] sm:$0xff]  ;;  %v6674_v29 = vld [vmem:[#allocation36_spill] sm:$0xff] }
 0x1fc   : >> { %4208 = vmatpush3.bf16.msra.mxu1 %v4207_v34  ;;  %v4186_v12 = vpack.c.bf16 %v6670_v30, %v6669_v27  ;;  %v4213_v34 = vpack.c.bf16 %v6672_v25, %v6671_v20  ;;  %v6673_v26 = vld [vmem:[#allocation33_spill] sm:$0xff]  ;;  %v6675_v35 = vld [vmem:[#allocation40_spill] sm:$0xff]  ;;  %v6676_v28 = vld [vmem:[#allocation35_spill] sm:$0xff]  ;;  %v6010_v20 = vsub.s32 2, %v5769_v55 }
 0x1fd   : >> { %4181 = vmatpush1.bf16.msra.mxu0 %v4180_v41  ;;  %4209 = vmatprep.subr.bf16.mxu1 %v6477_v14  ;;  %v4188_v41 = vpack.c.bf16 %v6674_v29, %v6673_v26  ;;  %v6677_v32 = vld [vmem:[#allocation38_spill] sm:$0xff]  ;;  %v6678_v33 = vld [vmem:[#allocation39_spill] sm:$0xff]  ;;  %v6679_v36 = vld [vmem:[#allocation41_spill] sm:$0xff] }
 0x1fe   : >> { %4183 = vmatprep.subr.bf16.mxu0 %v4182_v56  ;;  %v4190_v56 = vpack.c.bf16 %v5172_v38, %v6675_v35  ;;  %v4216_v3 = vpack.c.bf16 %v6677_v32, %v6676_v28  ;;  %v6680_v13 = vld [vmem:[#allocation42_spill] sm:$0xff]  ;;  %v6684_v7 = vld [vmem:[#allocation43_spill] sm:$0xff]  ;;  %v6689_v11 = vld [vmem:[#allocation56_spill] sm:$0xff] }
 0x1ff   : >> { %v6683_v5 = vld [vmem:[#allocation50_spill] sm:$0xff] }
 0x200   : >> { %4211 = vmatpush3.bf16.msra.mxu1 %v4210_v61  ;;  %v4192_v61 = vpack.c.bf16 %v5167_v37, %v6678_v33  ;;  %v6686_v9 = vld [vmem:[#allocation46_spill] sm:$0xff] }
 0x201   : >> { %4185 = vmatpush1.bf16.msra.mxu0 %v4184_v21  ;;  %4212 = vmatprep.subr.bf16.mxu1 %v6477_v14  ;;  %v4194_v21 = vpack.c.bf16 %v5202_v45, %v5187_v42 }
 0x202   : >> { %4187 = vmatprep.subr.bf16.mxu0 %v4186_v12  ;;  %v4219_v12 = vpack.c.bf16 %v5177_v39, %v6679_v36 }
 0x204   : >> { %4214 = vmatpush3.bf16.msra.mxu1 %v4213_v34  ;;  %v4196_v34 = vpack.c.bf16 %v5197_v44, %v5182_v40 }
 0x205   : >> { %4189 = vmatpush1.bf16.msra.mxu0 %v4188_v41  ;;  %4215 = vmatprep.subr.bf16.mxu1 %v6477_v14  ;;  %v4198_v41 = vpack.c.bf16 %v5232_v51, %v5217_v48 }
 0x206   : >> { %4191 = vmatprep.subr.bf16.mxu0 %v4190_v56  ;;  %v4222_v56 = vpack.c.bf16 %v5207_v46, %v5192_v43 }
 0x208   : >> { %4217 = vmatpush3.bf16.msra.mxu1 %v4216_v3  ;;  %v4200_v3 = vpack.c.bf16 %v5227_v50, %v5212_v47 }
 0x209   : >> { %4193 = vmatpush1.bf16.msra.mxu0 %v4192_v61  ;;  %4218 = vmatprep.subr.bf16.mxu1 %v6477_v14  ;;  %v4202_v61 = vpack.c.bf16 %v5262_v57, %v5247_v54 }
 0x20a   : >> { %4195 = vmatprep.subr.bf16.mxu0 %v4194_v21  ;;  %v4225_v21 = vpack.c.bf16 %v5237_v52, %v5222_v49 }
 0x20c   : >> { %4220 = vmatpush3.bf16.msra.mxu1 %v4219_v12  ;;  %v6681_v12 = vld [vmem:[#allocation44_spill] sm:$0xff] }
 0x20d   : >> { %4197 = vmatpush1.bf16.msra.mxu0 %v4196_v34  ;;  %4221 = vmatprep.subr.bf16.mxu1 %v6477_v14  ;;  %v4204_v4 = vpack.c.bf16 %v6681_v12, %v6680_v13  ;;  %v6682_v34 = vld [vmem:[#allocation47_spill] sm:$0xff] }
 0x20e   : >> { %4199 = vmatprep.subr.bf16.mxu0 %v4198_v41  ;;  %v4230_v6 = vpack.c.bf16 %v6683_v5, %v6682_v34  ;;  %v6685_v41 = vld [vmem:[#allocation45_spill] sm:$0xff]  ;;  %v6691_v12 = vld [vmem:[#allocation51_spill] sm:$0xff] }
 0x20f   : >> { %v4228_v8 = vpack.c.bf16 %v6685_v41, %v6684_v7  ;;  %v6693_v34 = vld [vmem:[#allocation55_spill] sm:$0xff] }
 0x210   : >> { %4223 = vmatpush3.bf16.msra.mxu1 %v4222_v56  ;;  %v6687_v56 = vld [vmem:[#allocation49_spill] sm:$0xff] }
 0x211   : >> { %4201 = vmatpush1.bf16.msra.mxu0 %v4200_v3  ;;  %4224 = vmatprep.subr.bf16.mxu1 %v6477_v14  ;;  %v4232_v10 = vpack.c.bf16 %v6687_v56, %v6686_v9  ;;  %v6688_v3 = vld [vmem:[#allocation53_spill] sm:$0xff]  ;;  %v6695_v9 = vld [vmem:[#allocation62_spill] sm:$0xff] }
 0x212   : >> { %4203 = vmatprep.subr.bf16.mxu0 %v4202_v61  ;;  %v4234_v13 = vpack.c.bf16 %v6689_v11, %v6688_v3  ;;  %v6690_v61 = vld [vmem:[#allocation48_spill] sm:$0xff]  ;;  %v6697_v11 = vld [vmem:[#allocation54_spill] sm:$0xff]  ;;  %v6700_v3 = vld [vmem:[#allocation61_spill] sm:$0xff] }
 0x213   : >> { %v4263_v5 = vpack.c.bf16 %v6691_v12, %v6690_v61  ;;  %v6702_v12 = vld [vmem:[#allocation68_spill] sm:$0xff] }
 0x214   : >> { %4226 = vmatpush3.bf16.msra.mxu1 %v4225_v21  ;;  %v6692_v21 = vld [vmem:[#allocation52_spill] sm:$0xff] }
 0x215   : >> { %4205 = vmatpush1.bf16.msra.mxu0 %v4204_v4  ;;  %4227 = vmatprep.subr.bf16.mxu1 %v6477_v14  ;;  %v4236_v7 = vpack.c.bf16 %v6693_v34, %v6692_v21  ;;  %v6694_v4 = vld [vmem:[#allocation59_spill] sm:$0xff]  ;;  %v6703_v34 = vld [vmem:[#allocation60_spill] sm:$0xff] }
 0x216   : >> { %4231 = vmatprep.subr.bf16.mxu0 %v4230_v6  ;;  %v4238_v41 = vpack.c.bf16 %v6695_v9, %v6694_v4  ;;  %v6696_v6 = vmov 0.0   ;;  %v6705_v4 = vld [vmem:[#allocation64_spill] sm:$0xff]  ;;  %v6706_v9 = vld [vmem:[#allocation67_spill] sm:$0xff] }
 0x218   : >> { %1636 = vmatmul.mubr.f32.vlgmr.msra.gmra.mrb[0].mxu0 %v4671_v58  ;;  %4229 = vmatpush3.bf16.msra.mxu1 %v4228_v8  ;;  %v6698_v8 = vld [vmem:[#allocation57_spill] sm:$0xff] }
 0x219   : >> { %4233 = vmatpush1.bf16.msra.mxu0 %v4232_v10  ;;  %4262 = vmatprep.subr.bf16.mxu1 %v6477_v14  ;;  %v4266_v56 = vpack.c.bf16 %v6698_v8, %v6697_v11  ;;  %v6699_v10 = vld [vmem:[#allocation58_spill] sm:$0xff]  ;;  %v4244_v11 = vpack.c.bf16 %v6706_v9, %v6705_v4  ;;  %v6715_v4 = vld [vmem:[#allocation72_spill] sm:$0xff] }
 0x21a   : >> { %4235 = vmatprep.subr.bf16.mxu0 %v4234_v13  ;;  %1792 = vmatprep.mubr.f32.mxu0 %v6696_v6  ;;  %v4240_v61 = vpack.c.bf16 %v6700_v3, %v6699_v10  ;;  %v6701_v13 = vld [vmem:[#allocation65_spill] sm:$0xff]  ;;  %v6708_v8 = vld [vmem:[#allocation74_spill] sm:$0xff] }
 0x21b   : >> { %3947 = vmatmul.mubr.f32.vlgmr.msra.gmra.mrb[0].mxu1 %v4671_v58  ;;  %v4242_v21 = vpack.c.bf16 %v6702_v12, %v6701_v13  ;;  %v6704_v58 = vld [vmem:[#allocation63_spill] sm:$0xff]  ;;  %v6709_v3 = vld [vmem:[#allocation66_spill] sm:$0xff] }
 0x21c   : >> { %4264 = vmatpush3.bf16.msra.mxu1 %v4263_v5  ;;  %3981 = vmatprep.mubr.msk.f32.mxu1 %vm4685_vm3, %v6696_v6  ;;  %v4269_v5 = vpack.c.bf16 %v6704_v58, %v6703_v34  ;;  %v6711_v13 = vld [vmem:[#allocation70_spill] sm:$0xff]  ;;  %v6714_v34 = vld [vmem:[#allocation80_spill] sm:$0xff] }
 0x21d   : >> { %4237 = vmatpush1.bf16.msra.mxu0 %v4236_v7  ;;  %4265 = vmatprep.subr.bf16.mxu1 %v6477_v14  ;;  %v6707_v7 = vld [vmem:[#allocation71_spill] sm:$0xff] }
 0x21e   : >> { %4239 = vmatprep.subr.bf16.mxu0 %v4238_v41  ;;  %v4246_v10 = vpack.c.bf16 %v6708_v8, %v6707_v7  ;;  %v6710_v41 = vld [vmem:[#allocation69_spill] sm:$0xff]  ;;  %v6717_v7 = vld [vmem:[#allocation76_spill] sm:$0xff] }
 0x21f   : >> { %v4272_v15 = vpack.c.bf16 %v6710_v41, %v6709_v3  ;;  %v6720_v3 = vld [vmem:[#allocation86_spill] sm:$0xff] }
 0x220   : >> { %4267 = vmatpush3.bf16.msra.mxu1 %v4266_v56  ;;  %v6712_v56 = vld [vmem:[#allocation73_spill] sm:$0xff] }
 0x221   : >> { %4241 = vmatpush1.bf16.msra.mxu0 %v4240_v61  ;;  %4268 = vmatprep.subr.bf16.mxu1 %v6477_v14  ;;  %v4248_v12 = vpack.c.bf16 %v6712_v56, %v6711_v13  ;;  %v6713_v61 = vld [vmem:[#allocation77_spill] sm:$0xff]  ;;  %v6721_v13 = vld [vmem:[#allocation78_spill] sm:$0xff] }
 0x222   : >> { %4243 = vmatprep.subr.bf16.mxu0 %v4242_v21  ;;  %v4250_v58 = vpack.c.bf16 %v6714_v34, %v6713_v61  ;;  %v6716_v21 = vld [vmem:[#allocation75_spill] sm:$0xff]  ;;  %v6723_v61 = vld [vmem:[#allocation82_spill] sm:$0xff] }
 0x223   : >> { %v4275_v9 = vpack.c.bf16 %v6716_v21, %v6715_v4  ;;  %v6726_v4 = vld [vmem:[#allocation92_spill] sm:$0xff] }
 0x224   : >> { %4270 = vmatpush3.bf16.msra.mxu1 %v4269_v5  ;;  %v6718_v5 = vld [vmem:[#allocation79_spill] sm:$0xff] }
 0x225   : >> { %4245 = vmatpush1.bf16.msra.mxu0 %v4244_v11  ;;  %4271 = vmatprep.subr.bf16.mxu1 %v6477_v14  ;;  %v4252_v8 = vpack.c.bf16 %v6718_v5, %v6717_v7  ;;  %v6719_v11 = vld [vmem:[#allocation83_spill] sm:$0xff]  ;;  %v6727_v7 = vld [vmem:[#allocation84_spill] sm:$0xff] }
 0x226   : >> { %4247 = vmatprep.subr.bf16.mxu0 %v4246_v10  ;;  %v4254_v41 = vpack.c.bf16 %v6720_v3, %v6719_v11  ;;  %v6722_v10 = vld [vmem:[#allocation81_spill] sm:$0xff]  ;;  %v6729_v11 = vld [vmem:[#allocation88_spill] sm:$0xff] }
 0x227   : >> { %v4278_v56 = vpack.c.bf16 %v6722_v10, %v6721_v13  ;;  %v6732_v13 = vld [vmem:[#allocation93_spill] sm:$0xff] }
 0x228   : >> { %4273 = vmatpush3.bf16.msra.mxu1 %v4272_v15  ;;  %v6724_v15 = vld [vmem:[#allocation85_spill] sm:$0xff] }
 0x229   : >> { %4249 = vmatpush1.bf16.msra.mxu0 %v4248_v12  ;;  %4274 = vmatprep.subr.bf16.mxu1 %v6477_v14  ;;  %v4256_v34 = vpack.c.bf16 %v6724_v15, %v6723_v61  ;;  %v6725_v12 = vld [vmem:[#allocation89_spill] sm:$0xff]  ;;  %v6735_v15 = vld [vmem:[#allocation98_spill] sm:$0xff] }
 0x22a   : >> { %4251 = vmatprep.subr.bf16.mxu0 %v4250_v58  ;;  %v4258_v21 = vpack.c.bf16 %v6726_v4, %v6725_v12  ;;  %v6728_v58 = vld [vmem:[#allocation87_spill] sm:$0xff]  ;;  %v6737_v4 = vld [vmem:[#allocation100_spill] sm:$0xff] }
 0x22b   : >> { %v4281_v5 = vpack.c.bf16 %v6728_v58, %v6727_v7  ;;  %v6739_v58 = vld [vmem:[#allocation102_spill] sm:$0xff] }
 0x22c   : >> { %4276 = vmatpush3.bf16.msra.mxu1 %v4275_v9  ;;  %v6730_v9 = vld [vmem:[#allocation91_spill] sm:$0xff] }
 0x22d   : >> { %4253 = vmatpush1.bf16.msra.mxu0 %v4252_v8  ;;  %4277 = vmatprep.subr.bf16.mxu1 %v6477_v14  ;;  %v4260_v3 = vpack.c.bf16 %v6730_v9, %v6729_v11  ;;  %v6731_v8 = vld [vmem:[#allocation90_spill] sm:$0xff]  ;;  %v6741_v9 = vld [vmem:[#allocation104_spill] sm:$0xff] }
 0x22e   : >> { %4255 = vmatprep.subr.bf16.mxu0 %v4254_v41  ;;  %v4284_v10 = vpack.c.bf16 %v6732_v13, %v6731_v8  ;;  %v6733_v41 = vld [vmem:[#allocation96_spill] sm:$0xff]  ;;  %v6743_v13 = vld [vmem:[#allocation106_spill] sm:$0xff] }
 0x230   : >> { %4279 = vmatpush3.bf16.msra.mxu1 %v4278_v56  ;;  %v6734_v56 = vld [vmem:[#allocation97_spill] sm:$0xff] }
 0x231   : >> { %4257 = vmatpush1.bf16.msra.mxu0 %v4256_v34  ;;  %4280 = vmatprep.subr.bf16.mxu1 %v6477_v14  ;;  %v4287_v61 = vpack.c.bf16 %v6734_v56, %v6733_v41  ;;  %v6736_v34 = vld [vmem:[#allocation99_spill] sm:$0xff]  ;;  %v6745_v56 = vld [vmem:[#allocation108_spill] sm:$0xff] }
 0x232   : >> { %4259 = vmatprep.subr.bf16.mxu0 %v4258_v21  ;;  %v4290_v12 = vpack.c.bf16 %v6736_v34, %v6735_v15  ;;  %v6738_v21 = vld [vmem:[#allocation101_spill] sm:$0xff]  ;;  %v6747_v34 = vld [vmem:[#allocation110_spill] sm:$0xff] }
 0x233   : >> { %v4293_v7 = vpack.c.bf16 %v6738_v21, %v6737_v4 }
 0x234   : >> { %4282 = vmatpush3.bf16.msra.mxu1 %v4281_v5  ;;  %v6740_v5 = vld [vmem:[#allocation103_spill] sm:$0xff] }
 0x235   : >> { %4261 = vmatpush1.bf16.msra.mxu0 %v4260_v3  ;;  %4283 = vmatprep.subr.bf16.mxu1 %v6477_v14  ;;  %v4296_v11 = vpack.c.bf16 %v6740_v5, %v6739_v58  ;;  %v6742_v3 = vld [vmem:[#allocation105_spill] sm:$0xff]  ;;  %v5999_v58 = vsub.s32 1, %v5769_v55  ;;  %v6749_v5 = vld [vmem:[#allocation94_spill] sm:$0xff] }
 0x236   : >> { %4286 = vmatprep.subr.bf16.mxu0 %v6477_v14  ;;  %v4299_v8 = vpack.c.bf16 %v6742_v3, %v6741_v9  ;;  %v6750_v9 = vld [vmem:[#allocation95_spill] sm:$0xff] }
 0x237   : >> { %v1716_v3 = vrot.slane %v6750_v9, %v5780_v63 }
 0x238   : >> { %1793 = vmatmul.mubr.f32.vlgmr.msra.gmra.mrb[0].mxu0 %v4675_v1  ;;  %4285 = vmatpush3.bf16.msra.mxu1 %v4284_v10  ;;  %v6744_v10 = vld [vmem:[#allocation107_spill] sm:$0xff] }
 0x239   : >> { %4016 = vmatprep.mubr.msk.f32.mxu0 %vm4685_vm3, %v6696_v6  ;;  %4310 = vmatprep.subr.bf16.mxu1 %v6477_v14  ;;  %v4302_v41 = vpack.c.bf16 %v6744_v10, %v6743_v13  ;;  %v1720_v13 = vrot.slane %v6750_v9, %v5999_v58 }
 0x23a   : >> { %4288 = vmatpush3.bf16.msra.mxu0 %v4287_v61  ;;  %v6746_v61 = vld [vmem:[#allocation109_spill] sm:$0xff] }
 0x23b   : >> { %3982 = vmatmul.mubr.f32.vlgmr.msra.gmra.mrb[2].mxu1 %v4675_v1  ;;  %4289 = vmatprep.subr.bf16.mxu0 %v6477_v14  ;;  %v4305_v15 = vpack.c.bf16 %v6746_v61, %v6745_v56 }
 0x23c   : >> { %4023 = vmatprep.mubr.msk.f32.mxu1 %vm4685_vm3, %v6696_v6 }
 0x23e   : >> { %4291 = vmatpush3.bf16.msra.mxu0 %v4290_v12  ;;  %v6748_v12 = vld [vmem:[#allocation111_spill] sm:$0xff] }
 0x23f   : >> { %4292 = vmatprep.subr.bf16.mxu0 %v6477_v14  ;;  %v4308_v4 = vpack.c.bf16 %v6748_v12, %v6747_v34 }
 0x242   : >> { %4294 = vmatpush3.bf16.msra.mxu0 %v4293_v7 }
 0x243   : >> { %4295 = vmatprep.subr.bf16.mxu0 %v6477_v14 }
 0x246   : >> { %4297 = vmatpush3.bf16.msra.mxu0 %v4296_v11  ;;  %v1559_v11 = vrot.slane %v6749_v5, %v5780_v63 }
 0x247   : >> { %4298 = vmatprep.subr.bf16.mxu0 %v6477_v14 }
 0x248   : >> { %v4368_v10 = vadd.f32 %v1716_v3, %v1559_v11  ;;  %v1724_v11 = vrot.slane %v6750_v9, %v6010_v20 }
 0x24a   : >> { %4300 = vmatpush3.bf16.msra.mxu0 %v4299_v8  ;;  %v1563_v8 = vrot.slane %v6749_v5, %v5999_v58 }
 0x24b   : >> { %4301 = vmatprep.subr.bf16.mxu0 %v6477_v14 }
 0x24e   : >> { %4303 = vmatpush3.bf16.msra.mxu0 %v4302_v41  ;;  %v4370_v41 = vadd.f32 %v1720_v13, %v1563_v8  ;;  %v1567_v8 = vrot.slane %v6749_v5, %v6010_v20 }
 0x24f   : >> { %4304 = vmatprep.subr.bf16.mxu0 %v6477_v14 }
 0x252   : >> { %4306 = vmatpush3.bf16.msra.mxu0 %v4305_v15 }
 0x253   : >> { %4307 = vmatprep.subr.bf16.mxu0 %v6477_v14 }
 0x256   : >> { %4309 = vmatpush3.bf16.msra.mxu0 %v4308_v4 }
 0x257   : >> { %4346 = vmatprep.subr.bf16.mxu0 %v6477_v14 }
 0x2ee   : >> { %v1708_v21 = vpop.f32.mrb[0].mxu1 }
 0x2ef   : >> { %v3948_v7 = vpop.f32.mrb[1].mxu1 }
 0x30b   : >> { %v1794_v56 = vpop.f32.mrb[0].mxu0 }
 0x30c   : >> { %v4369_v61 = vadd.f32 %v4368_v10, %v1794_v56  ;;  %v1796_v15 = vpop.f32.mrb[1].mxu0  ;;  %v1709_v56 = vadd.f32 %v1708_v21, %v1567_v8 }
 0x30d   : >> { %v4371_v34 = vadd.f32 %v4370_v41, %v1796_v15 }
 0x30e   : >> { %v1870_v12 = vsub.f32 0.0, %v4369_v61  ;;  %v1865_v4 = vpop.f32.mrb[2].mxu1 }
 0x30f   : >> { %v3983_v7 = vpop.f32.mrb[3].mxu1  ;;  %v1877_v16 = vsub.f32 0.0, %v4371_v34  ;;  %v1866_v10 = vadd.f32 %v1865_v4, %v1724_v11  ;;  %v4686_v34 = vmov 1966171168  }
 0x310   : >> { %v1871_v14 = vmul.f32 1.442695, %v1870_v12  ;;  %v1962_v12 = vunpack.c.l.s4 %v4686_v34  ;;  %v6753_v34 = vld [vmem:[#allocation146_spill] sm:$0xff] }
 0x311   : >> { %v1878_v17 = vmul.f32 1.442695, %v1877_v16 }
 0x312   : >> { %4467 = vpow2.f32 %v1871_v14  ;;  %v1963_v21 = vunpack.c.0.s8 %v1962_v12 }
 0x313   : >> { %4469 = vpow2.f32 %v1878_v17 }
 0x314   : >> { %v6023_v4 = vsub.s32 %v1963_v21, %v5769_v55  ;;  %v6754_v21 = vld [vmem:[#allocation144_spill] sm:$0xff] }
 0x31c   : >> { %v4468_v18 = vpop.eup %4467 }
 0x31d   : >> { %v1873_v19 = vadd.f32 1.0, %v4468_v18  ;;  %v4470_v3 = vpop.eup %4469 }
 0x31e   : >> { %v1880_v13 = vadd.f32 1.0, %v4470_v3 }
 0x31f   : >> { %4471 = vrcp.f32 %v1873_v19 }
 0x320   : >> { %4473 = vrcp.f32 %v1880_v13 }
 0x329   : >> { %v4472_v41 = vpop.eup %4471 }
 0x32a   : >> { %v1883_v16 = vmul.f32 %v4472_v41, %v1866_v10  ;;  %v4474_v18 = vpop.eup %4473 }
 0x32b   : >> { %v1886_v19 = vsub.f32 1.0, %v4474_v18  ;;  %v1888_v15 = vmul.f32 %v4675_v1, %v4474_v18  ;;  %v6751_v18 = vld [vmem:[#allocation142_spill] sm:$0xff] }
 0x32c   : >> { %v1884_v17 = vadd.f32 %v1883_v16, %v1709_v56 }
 0x32e   : >> { %4475 = vtanh.f32 %v1884_v17 }
 0x338   : >> { %v4476_v14 = vpop.eup %4475 }
 0x339   : >> { %v1887_v61 = vmul.f32 %v4476_v14, %v1886_v19 }
 0x33b   : >> { %v6017_v1 = vadd.f32 %v1888_v15, %v1887_v61   ;;  %v6752_v61 = vld [vmem:[#allocation140_spill] sm:$0xff] }
 0x33d   : >> { %4017 = vmatmul.mubr.f32.vlgmr.msra.gmra.mrb[2].mxu0 %v6017_v1 }
 0x33e   : >> { %4086 = vmatprep.mubr.msk.f32.mxu0 %vm4685_vm3, %v6696_v6 }
 0x410   : >> { %v1956_v7 = vpop.f32.mrb[2].mxu0 }
 0x411   : >> { %v1967_v11 = vrot.slane %v1956_v7, %v6023_v4  ;;  %v4018_v3 = vpop.f32.mrb[3].mxu0 }
 0x413   : >> { %v1968_v8 = vcombine.high %v1967_v11, %v1967_v11  ;;  %v1975_v13 = vrot.slane %v1967_v11, %v6023_v4  ;;  %v6755_v11 = vld [vmem:[#allocation150_spill] sm:$0xff] }
 0x415   : >> { %v1982_v10 = vrot.slane %v1968_v8, %v6023_v4  ;;  %v1983_v41 = vcombine.high %v1975_v13, %v1975_v13  ;;  %v1988_v56 = vrot.slane %v1975_v13, %v5780_v63  ;;  %v6756_v13 = vld [vmem:[#allocation148_spill] sm:$0xff] }
 0x417   : >> { %v1984_v16 = vcombine.high %v1982_v10, %v1982_v10  ;;  %v1996_v17 = vrot.slane %v1983_v41, %v5780_v63  ;;  %v2005_v19 = vadd.f32 %v1988_v56, %v6751_v18  ;;  %v1992_v14 = vrot.slane %v1982_v10, %v5780_v63  ;;  %v6757_v18 = vld [vmem:[#allocation154_spill] sm:$0xff]  ;;  %v6758_v10 = vld [vmem:[#allocation152_spill] sm:$0xff] }
 0x418   : >> { %v2006_v15 = vadd.f32 %v1988_v56, %v6752_v61 }
 0x419   : >> { %4477 = vtanh.f32 %v2005_v19  ;;  %v2007_v12 = vadd.f32 %v1992_v14, %v6753_v34  ;;  %v2008_v7 = vadd.f32 %v1992_v14, %v6754_v21  ;;  %v2009_v3 = vadd.f32 %v1996_v17, %v6755_v11  ;;  %v6759_v34 = vld [vmem:[#allocation128_spill] sm:$0xff] }
 0x41a   : >> { %4479 = vtanh.f32 %v2006_v15  ;;  %v2000_v8 = vrot.slane %v1984_v16, %v5780_v63  ;;  %v2010_v41 = vadd.f32 %v1996_v17, %v6756_v13 }
 0x41b   : >> { %4481 = vtanh.f32 %v2007_v12 }
 0x41c   : >> { %4483 = vtanh.f32 %v2008_v7  ;;  %v2011_v5 = vadd.f32 %v2000_v8, %v6757_v18  ;;  %v2012_v56 = vadd.f32 %v2000_v8, %v6758_v10 }
 0x41d   : >> { %4485 = vtanh.f32 %v2009_v3 }
 0x41e   : >> { %4487 = vtanh.f32 %v2010_v41 }
 0x41f   : >> { %4489 = vtanh.f32 %v2011_v5 }
 0x420   : >> { %4491 = vtanh.f32 %v2012_v56 }
 0x423   : >> { %v4478_v19 = vpop.eup %4477 }
 0x424   : >> { %v4480_v61 = vpop.eup %4479  ;;  %v2027_v14 = vmul.f32 %v4478_v19, %v6759_v34  ;;  %v6760_v19 = vld [vmem:[#allocation138_spill] sm:$0xff] }
 0x425   : >> { %v4482_v15 = vpop.eup %4481  ;;  %v2028_v17 = vmul.f32 %v4480_v61, %v6759_v34  ;;  %v2063_v61 = vadd.s32 4294967288, %v6760_v19 }
 0x426   : >> { %2035 = vadd.xlane.f32.xlu0 %v2027_v14  ;;  %v2029_v12 = vmul.f32 %v4482_v15, %v6759_v34  ;;  %v4484_v16 = vpop.eup %4483 }
 0x427   : >> { %v4486_v21 = vpop.eup %4485  ;;  %v2030_v7 = vmul.f32 %v4484_v16, %v6759_v34 }
 0x428   : >> { %2039 = vadd.xlane.f32.xlu1 %v2029_v12  ;;  %v4488_v11 = vpop.eup %4487  ;;  %v2031_v5 = vmul.f32 %v4486_v21, %v6759_v34  ;;  %v6050_v12 = vsub.s32 %v2063_v61, %v5769_v55 }
 0x429   : >> { %v4490_v3 = vpop.eup %4489  ;;  %v2032_v8 = vmul.f32 %v4488_v11, %v6759_v34 }
 0x42a   : >> { %2037 = vadd.xlane.f32.xlu0 %v2028_v17  ;;  %v4492_v13 = vpop.eup %4491  ;;  %v2033_v41 = vmul.f32 %v4490_v3, %v6759_v34  ;;  %v6054_v17 = vsub.s32 %v6760_v19, %v5769_v55 }
 0x42b   : >> { %v2034_v18 = vmul.f32 %v4492_v13, %v6759_v34 }
 0x42c   : >> { %2041 = vadd.xlane.f32.xlu1 %v2030_v7 }
 0x42e   : >> { %2043 = vadd.xlane.f32.xlu0 %v2031_v5 }
 0x430   : >> { %2045 = vadd.xlane.f32.xlu1 %v2032_v8 }
 0x432   : >> { %2047 = vadd.xlane.f32.xlu0 %v2033_v41 }
 0x434   : >> { %2049 = vadd.xlane.f32.xlu1 %v2034_v18 }
 0x4b3   : >> { %v2036_v10 = vpop.xlane.xlu0 %2035 }
 0x4b4   : >> { %v2062_v41 = vrot.slane %v2036_v10, %v6054_v17 }
 0x4b5   : >> { %v2040_v56 = vpop.xlane.xlu1 %2039 }
 0x4b6   : >> { %v2073_v11 = vrot.slane %v2040_v56, %v6054_v17 }
 0x4b7   : >> { %v2038_v14 = vpop.xlane.xlu0 %2037 }
 0x4b8   : >> { %v2067_v5 = vrot.slane %v2038_v14, %v6050_v12 }
 0x4b9   : >> { %v2042_v15 = vpop.xlane.xlu1 %2041 }
 0x4ba   : >> { %v2077_v21 = vrot.slane %v2042_v15, %v6050_v12  ;;  %v2069_v22 = vsel %vm2068_vm4, %v2067_v5, %v2062_v41 }
 0x4bb   : >> { %v2044_v16 = vpop.xlane.xlu0 %2043 }
 0x4bc   : >> { %v2082_v8 = vrot.slane %v2044_v16, %v6054_v17  ;;  %v2078_v18 = vsel %vm2068_vm4, %v2077_v21, %v2073_v11 }
 0x4bd   : >> { %v2046_v7 = vpop.xlane.xlu1 %2045  ;;  %v2098_v26 = vsel %vm2097_vm5, %v2078_v18, %v2069_v22 }
 0x4be   : >> { %v2086_v3 = vrot.slane %v2046_v7, %v6050_v12 }
 0x4bf   : >> { %v2048_v13 = vpop.xlane.xlu0 %2047 }
 0x4c0   : >> { %v2087_v9 = vsel %vm2068_vm4, %v2086_v3, %v2082_v8  ;;  %v2091_v23 = vrot.slane %v2048_v13, %v6054_v17  ;;  %v4687_v3 = vmov 0  }
 0x4c1   : >> { %v2050_v61 = vpop.xlane.xlu1 %2049  ;;  %v2100_v28 = vsel %vm2099_vm6, %v2087_v9, %v2098_v26  ;;  %4466 = vset.pattern.permute.xlu0 %v4687_v3  ;;  %4465 = vset.pattern.permute.xlu1 %v4687_v3 }
 0x4c2   : >> { %v2095_v25 = vrot.slane %v2050_v61, %v6050_v12 }
 0x4c4   : >> { %v2096_v27 = vsel %vm2068_vm4, %v2095_v25, %v2091_v23 }
 0x4c5   : >> { %v2102_v21 = vsel %vm2101_vm7, %v2096_v27, %v2100_v28  ;;  %v6076_v28 = vsub.s32 3, %v5769_v55 }
 0x4c6   : >> { %v2105_v11 = vsel %vm2104_vm8, %v2102_v21, -inf }
 0x4c7   : >> { %2106 = vmax.xlane.f32.xlu0 %v2105_v11 }
 0x554   : >> { %v2107_v5 = vpop.xlane.xlu0 %2106 }
 0x555   : >> { %v2112_v8 = vrot.slane %v2107_v5, %v5780_v63  ;;  %v2116_v41 = vrot.slane %v2107_v5, %v5999_v58  ;;  %v2120_v25 = vrot.slane %v2107_v5, %v6010_v20  ;;  %v2124_v11 = vrot.slane %v2107_v5, %v6076_v28 }
 0x557   : >> { %v2129_v29 = vsub.f32 %v2036_v10, %v2112_v8  ;;  %v2130_v22 = vsub.f32 %v2038_v14, %v2112_v8  ;;  %v2131_v18 = vsub.f32 %v2040_v56, %v2116_v41  ;;  %v2132_v26 = vsub.f32 %v2042_v15, %v2116_v41 }
 0x558   : >> { %v2133_v9 = vsub.f32 %v2044_v16, %v2120_v25  ;;  %v2134_v3 = vsub.f32 %v2046_v7, %v2120_v25  ;;  %v2135_v14 = vsub.f32 %v2048_v13, %v2124_v11  ;;  %v2136_v8 = vsub.f32 %v2050_v61, %v2124_v11 }
 0x559   : >> { %v2137_v30 = vmul.f32 1.442695, %v2129_v29  ;;  %v2139_v23 = vmul.f32 1.442695, %v2130_v22  ;;  %v2141_v27 = vmul.f32 1.442695, %v2131_v18 }
 0x55a   : >> { %v2143_v21 = vmul.f32 1.442695, %v2132_v26  ;;  %v2145_v10 = vmul.f32 1.442695, %v2133_v9  ;;  %v2147_v15 = vmul.f32 1.442695, %v2134_v3 }
 0x55b   : >> { %4493 = vpow2.f32 %v2137_v30  ;;  %v2149_v41 = vmul.f32 1.442695, %v2135_v14  ;;  %v2151_v22 = vmul.f32 1.442695, %v2136_v8 }
 0x55c   : >> { %4495 = vpow2.f32 %v2139_v23 }
 0x55d   : >> { %4497 = vpow2.f32 %v2141_v27 }
 0x55e   : >> { %4499 = vpow2.f32 %v2143_v21 }
 0x55f   : >> { %4501 = vpow2.f32 %v2145_v10 }
 0x560   : >> { %4503 = vpow2.f32 %v2147_v15 }
 0x561   : >> { %4505 = vpow2.f32 %v2149_v41 }
 0x562   : >> { %4507 = vpow2.f32 %v2151_v22 }
 0x565   : >> { %v4494_v56 = vpop.eup %4493 }
 0x566   : >> { %v4496_v29 = vpop.eup %4495  ;;  %2162 = vperm.xlu1 %4465, %v4494_v56  }
 0x567   : >> { %2165 = vperm.xlu0 %4466, %v4496_v29   ;;  %v4498_v30 = vpop.eup %4497 }
 0x568   : >> { %v4500_v16 = vpop.eup %4499 }
 0x569   : >> { %v4502_v5 = vpop.eup %4501 }
 0x56a   : >> { %2168 = vperm.xlu1 %4465, %v4498_v30   ;;  %v4504_v7 = vpop.eup %4503 }
 0x56b   : >> { %v4506_v18 = vpop.eup %4505 }
 0x56c   : >> { %v4508_v13 = vpop.eup %4507 }
 0x56e   : >> { %2171 = vperm.xlu1 %4465, %v4500_v16  }
 0x572   : >> { %2174 = vperm.xlu1 %4465, %v4502_v5  }
 0x576   : >> { %2177 = vperm.xlu1 %4465, %v4504_v7  }
 0x57a   : >> { %2180 = vperm.xlu1 %4465, %v4506_v18  }
 0x57e   : >> { %2183 = vperm.xlu1 %4465, %v4508_v13  }
 0x5e5   : >> { %v2163_v23 = vpop.permute.xlu1 %2162 }
 0x5e6   : >> { %v2166_v9 = vpop.permute.xlu0 %2165  ;;  %v2188_v14 = vrot.slane %v2163_v23, %v6054_v17 }
 0x5e7   : >> { %v2192_v10 = vrot.slane %v2166_v9, %v6050_v12 }
 0x5e9   : >> { %v2169_v25 = vpop.permute.xlu1 %2168  ;;  %v2193_v33 = vsel %vm2068_vm4, %v2192_v10, %v2188_v14 }
 0x5ea   : >> { %v2197_v15 = vrot.slane %v2169_v25, %v6054_v17 }
 0x5ed   : >> { %v2172_v26 = vpop.permute.xlu1 %2171 }
 0x5ee   : >> { %v2201_v21 = vrot.slane %v2172_v26, %v6050_v12 }
 0x5f0   : >> { %v2202_v41 = vsel %vm2068_vm4, %v2201_v21, %v2197_v15  ;;  %v6761_v15 = vld [vmem:[#allocation130_spill] sm:$0xff] }
 0x5f1   : >> { %v2175_v27 = vpop.permute.xlu1 %2174  ;;  %v2221_v34 = vsel %vm2097_vm5, %v2202_v41, %v2193_v33  ;;  %v6763_v41 = vmov 0.0|0.0  }
 0x5f2   : >> { %v2206_v8 = vrot.slane %v2175_v27, %v6054_v17 }
 0x5f5   : >> { %v2178_v61 = vpop.permute.xlu1 %2177 }
 0x5f6   : >> { %v2210_v11 = vrot.slane %v2178_v61, %v6050_v12 }
 0x5f8   : >> { %v2211_v22 = vsel %vm2068_vm4, %v2210_v11, %v2206_v8  ;;  %v6762_v8 = vld [vmem:[#allocation131_spill] sm:$0xff] }
 0x5f9   : >> { %v2181_v3 = vpop.permute.xlu1 %2180  ;;  %v2222_v23 = vsel %vm2099_vm6, %v2211_v22, %v2221_v34  ;;  %v4311_v34 = vpack.c.bf16 %v6762_v8, %v6761_v15 }
 0x5fa   : >> { %v2215_v26 = vrot.slane %v2181_v3, %v6054_v17 }
 0x5fb   : >> { %4312 = vmatpush3.bf16.msra.mxu1 %v4311_v34 }
 0x5fc   : >> { %4313 = vmatprep.subr.bf16.mxu1 %v6763_v41 }
 0x5fd   : >> { %v2184_v32 = vpop.permute.xlu1 %2183 }
 0x5fe   : >> { %v2219_v61 = vrot.slane %v2184_v32, %v6050_v12 }
 0x600   : >> { %v2220_v9 = vsel %vm2068_vm4, %v2219_v61, %v2215_v26 }
 0x601   : >> { %v2223_v25 = vsel %vm2101_vm7, %v2220_v9, %v2222_v23 }
 0x602   : >> { %v2225_v27 = vsel %vm2104_vm8, %v2223_v25, 0.0 }
 0x603   : >> { %2226 = vadd.xlane.f32.xlu1 %v2225_v27 }
 0x690   : >> { %v2227_v21 = vpop.xlane.xlu1 %2226 }
 0x691   : >> { %4509 = vrcp.f32 %v2227_v21 }
 0x69b   : >> { %v4510_v11 = vpop.eup %4509 }
 0x69c   : >> { %v2233_v10 = vrot.slane %v4510_v11, %v5780_v63  ;;  %v2237_v32 = vrot.slane %v4510_v11, %v5999_v58  ;;  %v2241_v26 = vrot.slane %v4510_v11, %v6010_v20 }
 0x69e   : >> { %v2250_v14 = vmul.f32 %v4494_v56, %v2233_v10  ;;  %v2251_v3 = vmul.f32 %v4496_v29, %v2233_v10  ;;  %v2252_v33 = vmul.f32 %v4498_v30, %v2237_v32  ;;  %v2253_v22 = vmul.f32 %v4500_v16, %v2237_v32  ;;  %v6764_v16 = vld [vmem:[#allocation132_spill] sm:$0xff]  ;;  %v6765_v10 = vld [vmem:[#allocation133_spill] sm:$0xff]  ;;  %v6767_v32 = vld [vmem:[#allocation135_spill] sm:$0xff] }
 0x69f   : >> { %v2254_v61 = vmul.f32 %v4502_v5, %v2241_v26  ;;  %v2255_v56 = vmul.f32 %v4504_v7, %v2241_v26  ;;  %v2245_v29 = vrot.slane %v4510_v11, %v6076_v28 }
 0x6a0   : >> { %2261 = vperm.xlu0 %4466, %v2250_v14   ;;  %v4314_v14 = vpack.c.bf16 %v6765_v10, %v6764_v16  ;;  %v6771_v16 = vld [vmem:[#allocation113_spill] sm:$0xff] }
 0x6a1   : >> { %v2256_v9 = vmul.f32 %v4506_v18, %v2245_v29  ;;  %v2257_v30 = vmul.f32 %v4508_v13, %v2245_v29 }
 0x6a4   : >> { %2264 = vperm.xlu0 %4466, %v2251_v3   ;;  %v6766_v3 = vld [vmem:[#allocation134_spill] sm:$0xff] }
 0x6a8   : >> { %2351 = vperm.xlu0 %4466, %v2252_v33   ;;  %v4317_v33 = vpack.c.bf16 %v6767_v32, %v6766_v3  ;;  %v6776_v32 = vld [vmem:[#allocation118_spill] sm:$0xff] }
 0x6ac   : >> { %2354 = vperm.xlu0 %4466, %v2253_v22  }
 0x6b0   : >> { %2440 = vperm.xlu0 %4466, %v2254_v61   ;;  %v6768_v61 = vld [vmem:[#allocation136_spill] sm:$0xff] }
 0x6b4   : >> { %2443 = vperm.xlu0 %4466, %v2255_v56   ;;  %v6769_v56 = vld [vmem:[#allocation137_spill] sm:$0xff] }
 0x6b5   : >> { %v4320_v29 = vpack.c.bf16 %v6769_v56, %v6768_v61  ;;  %v6781_v61 = vld [vmem:[#allocation123_spill] sm:$0xff] }
 0x6b8   : >> { %2529 = vperm.xlu0 %4466, %v2256_v9  }
 0x6bc   : >> { %2532 = vperm.xlu0 %4466, %v2257_v30  }
 0x71f   : >> { %v2262_v23 = vpop.permute.xlu0 %2261 }
 0x720   : >> { %v2269_v27 = vrot.slane %v2262_v23, %v6054_v17 }
 0x723   : >> { %v2265_v25 = vpop.permute.xlu0 %2264 }
 0x724   : >> { %v2273_v21 = vrot.slane %v2265_v25, %v6050_v12 }
 0x726   : >> { %v2274_v5 = vsel %vm2068_vm4, %v2273_v21, %v2269_v27  ;;  %v6770_v21 = vld [vmem:[#allocation112_spill] sm:$0xff] }
 0x727   : >> { %4024 = vmatmul.mubr.msk.f32.vlgmr.msra.gmra.mrb[4].mxu1 %vm2275_vm9, %v2274_v5  ;;  %v2352_v7 = vpop.permute.xlu0 %2351  ;;  %v4323_v10 = vpack.c.bf16 %v6771_v16, %v6770_v21  ;;  %v6772_v5 = vld [vmem:[#allocation114_spill] sm:$0xff] }
 0x728   : >> { %4315 = vmatpush3.bf16.msra.mxu1 %v4314_v14  ;;  %4030 = vmatprep.mubr.msk.f32.mxu1 %vm4685_vm3, %v6696_v6  ;;  %v2359_v13 = vrot.slane %v2352_v7, %v6054_v17  ;;  %v6773_v7 = vld [vmem:[#allocation115_spill] sm:$0xff] }
 0x729   : >> { %4316 = vmatprep.subr.bf16.mxu1 %v6763_v41 }
 0x72b   : >> { %v2355_v18 = vpop.permute.xlu0 %2354 }
 0x72c   : >> { %v2363_v11 = vrot.slane %v2355_v18, %v6050_v12  ;;  %v4326_v18 = vpack.c.bf16 %v6773_v7, %v6772_v5 }
 0x72e   : >> { %v2364_v15 = vsel %vm2068_vm4, %v2363_v11, %v2359_v13  ;;  %v6774_v13 = vld [vmem:[#allocation116_spill] sm:$0xff]  ;;  %v6775_v11 = vld [vmem:[#allocation117_spill] sm:$0xff] }
 0x72f   : >> { %4031 = vmatmul.mubr.msk.f32.vlgmr.msra.gmra.mrb[6].mxu1 %vm2275_vm9, %v2364_v15  ;;  %v2441_v8 = vpop.permute.xlu0 %2440  ;;  %v4329_v3 = vpack.c.bf16 %v6775_v11, %v6774_v13 }
 0x730   : >> { %4318 = vmatpush3.bf16.msra.mxu1 %v4317_v33  ;;  %4037 = vmatprep.mubr.msk.f32.mxu1 %vm4685_vm3, %v6696_v6  ;;  %v2448_v22 = vrot.slane %v2441_v8, %v6054_v17  ;;  %v6777_v33 = vld [vmem:[#allocation119_spill] sm:$0xff]  ;;  %v6778_v8 = vld [vmem:[#allocation120_spill] sm:$0xff] }
 0x731   : >> { %4319 = vmatprep.subr.bf16.mxu1 %v6763_v41  ;;  %v4332_v15 = vpack.c.bf16 %v6777_v33, %v6776_v32 }
 0x733   : >> { %v2444_v34 = vpop.permute.xlu0 %2443 }
 0x734   : >> { %v2452_v26 = vrot.slane %v2444_v34, %v6050_v12  ;;  %v6779_v34 = vld [vmem:[#allocation121_spill] sm:$0xff] }
 0x736   : >> { %v2453_v9 = vsel %vm2068_vm4, %v2452_v26, %v2448_v22  ;;  %v4335_v22 = vpack.c.bf16 %v6779_v34, %v6778_v8  ;;  %v6780_v26 = vld [vmem:[#allocation122_spill] sm:$0xff] }
 0x737   : >> { %4038 = vmatmul.mubr.msk.f32.vlgmr.msra.gmra.mrb[8].mxu1 %vm2275_vm9, %v2453_v9  ;;  %v2530_v30 = vpop.permute.xlu0 %2529  ;;  %v4338_v56 = vpack.c.bf16 %v6781_v61, %v6780_v26  ;;  %v6783_v9 = vld [vmem:[#allocation125_spill] sm:$0xff] }
 0x738   : >> { %4321 = vmatpush3.bf16.msra.mxu1 %v4320_v29  ;;  %4044 = vmatprep.mubr.msk.f32.mxu1 %vm4685_vm3, %v6696_v6  ;;  %v2537_v25 = vrot.slane %v2530_v30, %v6054_v17  ;;  %v6782_v29 = vld [vmem:[#allocation124_spill] sm:$0xff] }
 0x739   : >> { %4322 = vmatprep.subr.bf16.mxu1 %v6763_v41  ;;  %v4341_v30 = vpack.c.bf16 %v6783_v9, %v6782_v29 }
 0x73b   : >> { %v2533_v23 = vpop.permute.xlu0 %2532 }
 0x73c   : >> { %v2541_v27 = vrot.slane %v2533_v23, %v6050_v12  ;;  %v6784_v23 = vld [vmem:[#allocation126_spill] sm:$0xff] }
 0x73e   : >> { %v2542_v14 = vsel %vm2068_vm4, %v2541_v27, %v2537_v25  ;;  %v6785_v25 = vld [vmem:[#allocation127_spill] sm:$0xff] }
 0x73f   : >> { %4045 = vmatmul.mubr.msk.f32.vlgmr.msra.gmra.mrb[10].mxu1 %vm2275_vm9, %v2542_v14  ;;  %v4344_v27 = vpack.c.bf16 %v6785_v25, %v6784_v23  ;;  %v6786_v23 = vld [vmem:[#allocation139_spill] sm:$0xff] }
 0x740   : >> { %4324 = vmatpush3.bf16.msra.mxu1 %v4323_v10  ;;  %4079 = vmatprep.mubr.msk.f32.mxu1 %vm4685_vm3, %v6696_v6 }
 0x741   : >> { %4325 = vmatprep.subr.bf16.mxu1 %v6763_v41 }
 0x744   : >> { %4327 = vmatpush3.bf16.msra.mxu1 %v4326_v18 }
 0x745   : >> { %4328 = vmatprep.subr.bf16.mxu1 %v6763_v41 }
 0x748   : >> { %4330 = vmatpush3.bf16.msra.mxu1 %v4329_v3 }
 0x749   : >> { %4331 = vmatprep.subr.bf16.mxu1 %v6763_v41 }
 0x74c   : >> { %4333 = vmatpush3.bf16.msra.mxu1 %v4332_v15 }
 0x74d   : >> { %4334 = vmatprep.subr.bf16.mxu1 %v6763_v41 }
 0x750   : >> { %4336 = vmatpush3.bf16.msra.mxu1 %v4335_v22 }
 0x751   : >> { %4337 = vmatprep.subr.bf16.mxu1 %v6763_v41 }
 0x754   : >> { %4339 = vmatpush3.bf16.msra.mxu1 %v4338_v56 }
 0x755   : >> { %4340 = vmatprep.subr.bf16.mxu1 %v6763_v41 }
 0x758   : >> { %4342 = vmatpush3.bf16.msra.mxu1 %v4341_v30 }
 0x759   : >> { %4343 = vmatprep.subr.bf16.mxu1 %v6763_v41 }
 0x75c   : >> { %4345 = vmatpush3.bf16.msra.mxu1 %v4344_v27 }
 0x7fa   : >> { %v2344_v21 = vpop.f32.mrb[4].mxu1 }
 0x7fb   : >> { %v4025_v16 = vpop.f32.mrb[5].mxu1 }
 0x802   : >> { %v2433_v10 = vpop.f32.mrb[6].mxu1 }
 0x803   : >> { %v2619_v14 = vrot.slane %v2433_v10, 7  ;;  %v4032_v5 = vpop.f32.mrb[7].mxu1  ;;  %v6788_v10 = vld [vmem:[#allocation145_spill] sm:$0xff] }
 0x805   : >> { %v2620_v7 = vsel %vm2097_vm5, %v2619_v14, %v2344_v21  ;;  %v6787_v21 = vld [vmem:[#allocation141_spill] sm:$0xff] }
 0x80a   : >> { %v2522_v18 = vpop.f32.mrb[8].mxu1 }
 0x80b   : >> { %v2621_v13 = vrot.slane %v2522_v18, 6  ;;  %v4039_v11 = vpop.f32.mrb[9].mxu1 }
 0x80c   : >> { %v6790_v11 = vld [vmem:[#allocation149_spill] sm:$0xff] }
 0x80d   : >> { %v2622_v3 = vsel %vm2099_vm6, %v2621_v13, %v2620_v7  ;;  %v6789_v7 = vld [vmem:[#allocation143_spill] sm:$0xff] }
 0x812   : >> { %v2611_v32 = vpop.f32.mrb[10].mxu1 }
 0x813   : >> { %v2623_v33 = vrot.slane %v2611_v32, 5  ;;  %v4046_v15 = vpop.f32.mrb[11].mxu1 }
 0x814   : >> { %v6791_v15 = vld [vmem:[#allocation129_spill] sm:$0xff] }
 0x815   : >> { %v2624_v8 = vsel %vm2101_vm7, %v2623_v33, %v2622_v3 }
 0x816   : >> { %4080 = vmatmul.mubr.f32.vlgmr.msra.gmra.mrb[12].mxu1 %v2624_v8 }
 0x8e9   : >> { %v2692_v34 = vpop.f32.mrb[12].mxu1 }
 0x8ea   : >> { %v2703_v22 = vrot.slane %v2692_v34, %v6023_v4  ;;  %v4081_v26 = vpop.f32.mrb[13].mxu1  ;;  %v6792_v34 = vld [vmem:[#allocation147_spill] sm:$0xff] }
 0x8ec   : >> { %v2704_v61 = vcombine.high %v2703_v22, %v2703_v22  ;;  %v2711_v56 = vrot.slane %v2703_v22, %v6023_v4 }
 0x8ee   : >> { %v2718_v29 = vrot.slane %v2704_v61, %v6023_v4  ;;  %v2724_v9 = vrot.slane %v2711_v56, %v5780_v63  ;;  %v2719_v27 = vcombine.high %v2711_v56, %v2711_v56 }
 0x8f0   : >> { %v2728_v30 = vrot.slane %v2718_v29, %v5780_v63  ;;  %v2742_v25 = vadd.f32 %v6786_v23, %v2724_v9  ;;  %v2741_v16 = vadd.f32 %v2724_v9, %v6787_v21  ;;  %v2732_v5 = vrot.slane %v2719_v27, %v5780_v63  ;;  %v6793_v9 = vld [vmem:[#allocation153_spill] sm:$0xff] }
 0x8f1   : >> { %v2720_v13 = vcombine.high %v2718_v29, %v2718_v29 }
 0x8f2   : >> { %4511 = vtanh.f32 %v2742_v25  ;;  %v2743_v14 = vadd.f32 %v2728_v30, %v6788_v10  ;;  %v2744_v18 = vadd.f32 %v6789_v7, %v2728_v30  ;;  %v2745_v3 = vadd.f32 %v2732_v5, %v6790_v11  ;;  %v6794_v25 = vld [vmem:[#allocation151_spill] sm:$0xff] }
 0x8f3   : >> { %4513 = vtanh.f32 %v2741_v16  ;;  %v2746_v22 = vadd.f32 %v6792_v34, %v2732_v5  ;;  %v2736_v26 = vrot.slane %v2720_v13, %v5780_v63 }
 0x8f4   : >> { %4515 = vtanh.f32 %v2743_v14 }
 0x8f5   : >> { %4517 = vtanh.f32 %v2744_v18  ;;  %v2747_v29 = vadd.f32 %v2736_v26, %v6793_v9  ;;  %v2748_v27 = vadd.f32 %v6794_v25, %v2736_v26 }
 0x8f6   : >> { %4519 = vtanh.f32 %v2745_v3 }
 0x8f7   : >> { %4521 = vtanh.f32 %v2746_v22 }
 0x8f8   : >> { %4523 = vtanh.f32 %v2747_v29 }
 0x8f9   : >> { %4525 = vtanh.f32 %v2748_v27 }
 0x8fc   : >> { %v4512_v32 = vpop.eup %4511 }
 0x8fd   : >> { %v4514_v33 = vpop.eup %4513  ;;  %v2764_v8 = vmul.f32 %v4512_v32, %v6791_v15 }
 0x8fe   : >> { %v2763_v61 = vmul.f32 %v4514_v33, %v6791_v15  ;;  %v4516_v56 = vpop.eup %4515 }
 0x8ff   : >> { %2773 = vadd.xlane.f32.xlu0 %v2764_v8  ;;  %v2765_v30 = vmul.f32 %v4516_v56, %v6791_v15  ;;  %v4518_v23 = vpop.eup %4517 }
 0x900   : >> { %2771 = vadd.xlane.f32.xlu1 %v2763_v61  ;;  %v2766_v21 = vmul.f32 %v4518_v23, %v6791_v15  ;;  %v4520_v16 = vpop.eup %4519 }
 0x901   : >> { %v2767_v10 = vmul.f32 %v4520_v16, %v6791_v15  ;;  %v4522_v14 = vpop.eup %4521 }
 0x902   : >> { %v2768_v5 = vmul.f32 %v4522_v14, %v6791_v15  ;;  %v4524_v7 = vpop.eup %4523 }
 0x903   : >> { %v2769_v18 = vmul.f32 %v4524_v7, %v6791_v15  ;;  %v4526_v13 = vpop.eup %4525 }
 0x904   : >> { %2775 = vadd.xlane.f32.xlu1 %v2765_v30  ;;  %v2770_v11 = vmul.f32 %v4526_v13, %v6791_v15 }
 0x908   : >> { %2777 = vadd.xlane.f32.xlu1 %v2766_v21 }
 0x90c   : >> { %2779 = vadd.xlane.f32.xlu1 %v2767_v10 }
 0x910   : >> { %2781 = vadd.xlane.f32.xlu1 %v2768_v5 }
 0x914   : >> { %2783 = vadd.xlane.f32.xlu1 %v2769_v18 }
 0x915   : >> { %2872 = vbcast.lane.b32.xlu0 %v6760_v19, 264 }
 0x918   : >> { %2785 = vadd.xlane.f32.xlu1 %v2770_v11 }
 0x98c   : >> { %v6195_v22 = vpop.xlane.xlu0 %2773 }
 0x98d   : >> { %v6185_v3 = vpop.xlane.xlu1 %2771  ;;  %v2802_v9 = vrot.slane %v6195_v22, %v6050_v12 }
 0x98e   : >> { %v2798_v29 = vrot.slane %v6185_v3, %v6054_v17 }
 0x990   : >> { %v2803_v16 = vsel %vm2068_vm4, %v2802_v9, %v2798_v29 }
 0x991   : >> { %v6187_v32 = vpop.xlane.xlu1 %2775 }
 0x992   : >> { %v2807_v30 = vrot.slane %v6187_v32, %v6054_v17 }
 0x995   : >> { %v6189_v33 = vpop.xlane.xlu1 %2777 }
 0x996   : >> { %v2811_v26 = vrot.slane %v6189_v33, %v6050_v12 }
 0x998   : >> { %v2812_v25 = vsel %vm2068_vm4, %v2811_v26, %v2807_v30 }
 0x999   : >> { %v6191_v8 = vpop.xlane.xlu1 %2779  ;;  %v2831_v5 = vsel %vm2097_vm5, %v2812_v25, %v2803_v16 }
 0x99a   : >> { %v2816_v23 = vrot.slane %v6191_v8, %v6054_v17 }
 0x99d   : >> { %v6193_v34 = vpop.xlane.xlu1 %2781 }
 0x99e   : >> { %v2820_v61 = vrot.slane %v6193_v34, %v6050_v12 }
 0x9a0   : >> { %v2821_v21 = vsel %vm2068_vm4, %v2820_v61, %v2816_v23 }
 0x9a1   : >> { %v6201_v56 = vpop.xlane.xlu1 %2783  ;;  %v2832_v18 = vsel %vm2099_vm6, %v2821_v21, %v2831_v5  ;;  %v2873_v21 = vpop.permute.xlu0 %2872 }
 0x9a2   : >> { %v2825_v10 = vrot.slane %v6201_v56, %v6054_v17 }
 0x9a5   : >> { %v6212_v27 = vpop.xlane.xlu1 %2785 }
 0x9a6   : >> { %v2829_v14 = vrot.slane %v6212_v27, %v6050_v12 }
 0x9a8   : >> { %v2830_v7 = vsel %vm2068_vm4, %v2829_v14, %v2825_v10 }
 0x9a9   : >> { %v2833_v13 = vsel %vm2101_vm7, %v2830_v7, %v2832_v18 }
 0x9aa   : >> { %v2835_v11 = vsel %vm2104_vm8, %v2833_v13, -inf }
 0x9ab   : >> { %2836 = vmax.xlane.f32.xlu1 %v2835_v11 }
 0x9bc   : >> { %2868 = vbcast.lane.b32.xlu1 %v6760_v19, 256 }
 0xa38   : >> { %v2837_v26 = vpop.xlane.xlu1 %2836 }
 0xa39   : >> { %v6227_v61 = vrot.slane %v2837_v26, %v5999_v58  ;;  %v6230_v9 = vrot.slane %v2837_v26, %v5780_v63  ;;  %v6233_v29 = vrot.slane %v2837_v26, %v6010_v20  ;;  %v6240_v25 = vrot.slane %v2837_v26, %v6076_v28 }
 0xa3b   : >> { %vm2861_vm10 = vcmp.ge.f32.partialorder %v6187_v32, %v6227_v61  ;;  %vm2859_vm11 = vcmp.ge.f32.partialorder %v6185_v3, %v6230_v9  ;;  %vm2863_vm12 = vcmp.ge.f32.partialorder %v6191_v8, %v6233_v29  ;;  %vm2860_vm13 = vcmp.ge.f32.partialorder %v6195_v22, %v6230_v9 }
 0xa3c   : >> { %v2869_v30 = vpop.permute.xlu1 %2868  ;;  %v2875_v16 = vsel %vm2860_vm13, %v2873_v21, 16  ;;  %vm2865_vm14 = vcmp.ge.f32.partialorder %v6201_v56, %v6240_v25  ;;  %vm2862_vm15 = vcmp.ge.f32.partialorder %v6189_v33, %v6227_v61  ;;  %vm2864_vm0 = vcmp.ge.f32.partialorder %v6193_v34, %v6233_v29 }
 0xa3d   : >> { %v2876_v23 = vsel %vm2861_vm10, %v2869_v30, 16  ;;  %v2874_v58 = vsel %vm2859_vm11, %v2869_v30, 16  ;;  %v2878_v20 = vsel %vm2863_vm12, %v2869_v30, 16  ;;  %v2880_v28 = vsel %vm2865_vm14, %v2869_v30, 16 }
 0xa3e   : >> { %2889 = vperm.xlu0 %4466, %v2876_v23   ;;  %2883 = vperm.xlu1 %4465, %v2874_v58   ;;  %v2877_v10 = vsel %vm2862_vm15, %v2873_v21, 16  ;;  %v2879_v14 = vsel %vm2864_vm0, %v2873_v21, 16  ;;  %vm2866_vm1 = vcmp.ge.f32.partialorder %v6212_v27, %v6240_v25 }
 0xa3f   : >> { %v2881_v5 = vsel %vm2866_vm1, %v2873_v21, 16 }
 0xa42   : >> { %2895 = vperm.xlu0 %4466, %v2878_v20   ;;  %2886 = vperm.xlu1 %4465, %v2875_v16  }
 0xa46   : >> { %2901 = vperm.xlu0 %4466, %v2880_v28   ;;  %2892 = vperm.xlu1 %4465, %v2877_v10  }
 0xa4a   : >> { %2898 = vperm.xlu1 %4465, %v2879_v14  }
 0xa4e   : >> { %2904 = vperm.xlu1 %4465, %v2881_v5  }
 0xabd   : >> { %v2884_v7 = vpop.permute.xlu1 %2883  ;;  %v2890_v18 = vpop.permute.xlu0 %2889 }
 0xabe   : >> { %v2918_v58 = vrot.slane %v2890_v18, %v6054_v17  ;;  %v2909_v21 = vrot.slane %v2884_v7, %v6054_v17 }
 0xac1   : >> { %v2887_v13 = vpop.permute.xlu1 %2886  ;;  %v2896_v11 = vpop.permute.xlu0 %2895 }
 0xac2   : >> { %v2913_v20 = vrot.slane %v2887_v13, %v6050_v12  ;;  %v2927_v28 = vrot.slane %v2896_v11, %v6054_v17 }
 0xac4   : >> { %v2914_v35 = vsel %vm2068_vm4, %v2913_v20, %v2909_v21  ;;  %v2960_v20 = vsub.f32 %v6185_v3, %v6230_v9 }
 0xac5   : >> { %v2893_v26 = vpop.permute.xlu1 %2892  ;;  %v2902_v10 = vpop.permute.xlu0 %2901 }
 0xac6   : >> { %v2922_v30 = vrot.slane %v2893_v26, %v6050_v12  ;;  %v2936_v26 = vrot.slane %v2902_v10, %v6054_v17  ;;  %v2966_v10 = vsub.f32 %v6201_v56, %v6240_v25 }
 0xac8   : >> { %v2923_v14 = vsel %vm2068_vm4, %v2922_v30, %v2918_v58  ;;  %v2980_v21 = vmul.f32 1.442695, %v2966_v10 }
 0xac9   : >> { %v2899_v23 = vpop.permute.xlu1 %2898  ;;  %v2942_v13 = vsel %vm2097_vm5, %v2923_v14, %v2914_v35  ;;  %v2964_v35 = vsub.f32 %v6191_v8, %v6233_v29 }
 0xaca   : >> { %v2931_v16 = vrot.slane %v2899_v23, %v6050_v12 }
 0xacc   : >> { %v2932_v5 = vsel %vm2068_vm4, %v2931_v16, %v2927_v28  ;;  %v2962_v16 = vsub.f32 %v6187_v32, %v6227_v61 }
 0xacd   : >> { %v2905_v15 = vpop.permute.xlu1 %2904  ;;  %v2943_v11 = vsel %vm2099_vm6, %v2932_v5, %v2942_v13  ;;  %v2961_v13 = vsub.f32 %v6195_v22, %v6230_v9 }
 0xace   : >> { %v2940_v18 = vrot.slane %v2905_v15, %v6050_v12  ;;  %v2968_v15 = vmul.f32 1.442695, %v2960_v20  ;;  %v2972_v28 = vmul.f32 1.442695, %v2962_v16 }
 0xad0   : >> { %v2941_v23 = vsel %vm2068_vm4, %v2940_v18, %v2936_v26  ;;  %4527 = vpow2.f32 %v2968_v15 }
 0xad1   : >> { %v2944_v36 = vsel %vm2101_vm7, %v2941_v23, %v2943_v11  ;;  %4529 = vpow2.f32 %v2972_v28  ;;  %v2963_v23 = vsub.f32 %v6189_v33, %v6227_v61  ;;  %v2970_v11 = vmul.f32 1.442695, %v2961_v13  ;;  %v6795_v61 = vld [vmem:[#allocation155_spill] sm:$0xff] }
 0xad2   : >> { %v2945_v7 = vsel %vm2104_vm8, %v2944_v36, 2147483647  ;;  %v2976_v36 = vmul.f32 1.442695, %v2964_v35  ;;  %v4347_v15 = vpack.c.bf16 %v6795_v61, %v5800_v0  ;;  %v4350_v13 = vpack.c.bf16 %v5804_v53, %v5806_v2 }
 0xad3   : >> { %v2947_v30 = vshra.s32 %v2945_v7, 16  ;;  %v2946_v26 = vand.u32 65535, %v2945_v7  ;;  %v2974_v20 = vmul.f32 1.442695, %v2963_v23  ;;  %v2967_v7 = vsub.f32 %v6212_v27, %v6240_v25 }
 0xad4   : >> { %4531 = vpow2.f32 %v2976_v36  ;;  %4348 = vmatpush3.bf16.msra.mxu0 %v4347_v15  ;;  %v3062_v25 = vstv %s4679_s23  ;;  %s1550_s23 = sadd.s32 1, %s4679_s23  }
 0xad5   : >> { %v2949_v58 = vcvt.s32.f32 %v2947_v30  ;;  %4533 = vpow2.f32 %v2980_v21  ;;  %v2948_v18 = vcvt.s32.f32 %v2946_v26  ;;  %v2965_v30 = vsub.f32 %v6193_v34, %v6233_v29  ;;  %4349 = vmatprep.subr.bf16.mxu0 %v6763_v41  ;;  %p1547_p11 = scmp.ge.s32.totalorder %s1550_s23, 16  }
 0xad6   : >> { %4535 = vpow2.f32 %v2970_v11  ;;  %v2982_v22 = vmul.f32 1.442695, %v2967_v7  ;;  %vm6291_vm10 = vcmp.eq.s32.totalorder %v6760_v19, %v3062_v25  ;;  %s3604_s22 = sshll.u32 (%p1547_p11), %s4816_s2, 6  ;;  %s3415_s20 = sshll.u32 (%p1547_p11), %s5815_s26, 4  ;;  %s3416_s20 = int_to_ptr.vmem [resolvable:$true] %s3415_s20 }
 0xad7   : >> { %2950 = vmin.xlane.f32.xlu0 %v2949_v58  ;;  %4537 = vpow2.f32 %v2974_v20  ;;  %v2978_v16 = vmul.f32 1.442695, %v2965_v30  ;;  %v4353_v30 = vpack.c.bf16 %v5809_v24, %v5811_v59  ;;  %s6369_s28 = scalar_lea.hbm (%p1547_p11), %s6452_s19, %s3604_s22  ;;  %s3397_s27 = scalar_lea.sflag (%p1547_p11), [#allocation3], %s4844_s30 }
 0xad8   : > { %s4545_s25 = scalar_lea.vmem (%p1547_p11), %s3416_s20, 64  ;;  %s4688_s1 = smov (%p1547_p11), [#allocation2]  }
 0xad9   : >> { %4539 = vpow2.f32 %v2978_v16  ;;  %p4546_p12 = scmp.ne.s32.totalorder (%p1547_p11), %s3416_s20, %s4545_s25  ;;  %s4549_s29 = sshll.u32 (%p1547_p11), %s4688_s1, 4  ;;  %s4550_s29 = int_to_ptr.vmem [resolvable:$false] %s4549_s29 }
 0xada   : >> { %v4528_v14 = vpop.eup %4527  ;;  %4541 = vpow2.f32 %v2982_v22  ;;  %s4551_s0 = scalar_lea.vmem (%p1547_p11), %s4550_s29, 128  ;;  %p4552_p1 = scmp.lt.s32.totalorder (%p1547_p11), %s3416_s20, %s4550_s29 }
 0xadb   : >> { %v4530_v3 = vpop.eup %4529  ;;  %p4547_p13 = pnand (%p1547_p11), %p4546_p12, %p4833_p5  ;;  %p4553_p2 = scmp.lt.s32.totalorder (%p1547_p11), %s4551_s0, %s4545_s25 }
 0xadd   : > { %p4548_p0 = pneg (%p1547_p11), %p4547_p13  ;;  %p4554_p3 = por (%p1547_p11), %p4553_p2, %p4552_p1 }
 0xade   : >> { %v4532_v5 = vpop.eup %4531 }
 0xadf   : >> { %v4534_v32 = vpop.eup %4533  ;;  %p4555_p4 = pnand (%p1547_p11), %p4554_p3, %p4548_p0 }
 0xae0   : >> { %v4536_v9 = vpop.eup %4535 }
 0xaed   : >> { %2993 = vperm.xlu0 %4466, %v4528_v14  }
 0xaf1   : >> { %2999 = vperm.xlu0 %4466, %v4530_v3  }
 0xaf5   : >> { %3005 = vperm.xlu0 %4466, %v4532_v5  }
 0xaf9   : >> { %3011 = vperm.xlu0 %4466, %v4534_v32  }
 0xb64   : >> { %v2951_v8 = vpop.xlane.xlu0 %2950 }
 0xb65   : >> { %vm2952_vm2 = vcmp.eq.f32.partialorder %v2949_v58, %v2951_v8  ;;  %v4538_v58 = vpop.eup %4537  ;;  %v2957_v29 = vcvt.f32.s32 %v2951_v8 }
 0xb66   : >> { %v2953_v56 = vsel %vm2952_vm2, %v2948_v18, inf  ;;  %v4540_v33 = vpop.eup %4539 }
 0xb67   : >> { %2954 = vmin.xlane.f32.xlu1 %v2953_v56  ;;  %v4542_v34 = vpop.eup %4541  ;;  %v2958_v28 = vshll.u32 %v2957_v29, 16 }
 0xb6c   : >> { %v2994_v27 = vpop.permute.xlu0 %2993 }
 0xb70   : >> { %v3000_v36 = vpop.permute.xlu0 %2999 }
 0xb71   : >> { %v3028_v20 = vrot.slane %v3000_v36, %v6054_v17 }
 0xb74   : >> { %v3006_v8 = vpop.permute.xlu0 %3005 }
 0xb78   : >> { %2996 = vperm.xlu1 %4465, %v4536_v9   ;;  %v3037_v9 = vrot.slane %v3006_v8, %v6054_v17 }
 0xb7c   : >> { %3002 = vperm.xlu1 %4465, %v4538_v58   ;;  %v3012_v58 = vpop.permute.xlu0 %3011 }
 0xb7d   : >> { %v3046_v25 = vrot.slane %v3012_v58, %v6054_v17 }
 0xb80   : >> { %3008 = vperm.xlu1 %4465, %v4540_v33   ;;  %v3019_v33 = vrot.slane %v2994_v27, %v6054_v17 }
 0xb84   : >> { %3014 = vperm.xlu1 %4465, %v4542_v34  }
 0xbf4   : >> { %v2955_v35 = vpop.xlane.xlu1 %2954 }
 0xbf5   : >> { %v2956_v10 = vcvt.f32.s32 %v2955_v35 }
 0xbf7   : >> { %v2959_v14 = vadd.s32 %v2958_v28, %v2956_v10 }
 0xbf8   : >> { %v2997_v3 = vpop.permute.xlu1 %2996 }
 0xbf9   : >> { %v6298_v31 = vsel %vm6291_vm10, %v2959_v14, %v4667_v31   ;;  %vm3066_vm11 = vcmp.eq.s32.totalorder %v6760_v19, %v2959_v14  ;;  %v3023_v16 = vrot.slane %v2997_v3, %v6050_v12 }
 0xbfa   : >> { %v6798_v5 = vmov %v6298_v31  ;;  %v3597_v32 = vsel %vm3066_vm11, 1.0, %v6696_v6 }
 0xbfb   : >> { %v3076_v26 = vrot.slane %v3597_v32, %v6023_v4  ;;  %v3024_v28 = vsel %vm2068_vm4, %v3023_v16, %v3019_v33  ;;  %3394 = vst.msk [vmem:[%s5815_s26] sm:$0xf] (%p1547_p11), %vm2104_vm8, %v6798_v5 }
 0xbfc   : >> { %v3003_v18 = vpop.permute.xlu1 %3002 }
 0xbfd   : >> { %v3077_v56 = vcombine.high %v3076_v26, %v3076_v26  ;;  %v3084_v23 = vrot.slane %v3076_v26, %v6023_v4  ;;  %v3032_v11 = vrot.slane %v3003_v18, %v6050_v12 }
 0xbff   : >> { %4087 = vmatmul.mubr.msk.f32.vlgmr.msra.gmra.mrb[4].mxu0 %vm2275_vm9, %v3084_v23  ;;  %v3091_v7 = vrot.slane %v3077_v56, %v6023_v4  ;;  %v3033_v61 = vsel %vm2068_vm4, %v3032_v11, %v3028_v20  ;;  %v6799_v4 = vld [vmem:[#allocation156_spill] sm:$0xff]  ;;  %v3092_v35 = vcombine.high %v3084_v23, %v3084_v23 }
 0xc00   : >> { %4351 = vmatpush3.bf16.msra.mxu0 %v4350_v13  ;;  %v3009_v31 = vpop.permute.xlu1 %3008  ;;  %4093 = vmatprep.mubr.msk.f32.mxu0 %vm4685_vm3, %v6696_v6  ;;  %v4356_v29 = vpack.c.bf16 %v6799_v4, %v5802_v60  ;;  %v3052_v10 = vsel %vm2097_vm5, %v3033_v61, %v3024_v28 }
 0xc01   : >> { %v3041_v22 = vrot.slane %v3009_v31, %v6050_v12  ;;  %4352 = vmatprep.subr.bf16.mxu0 %v6763_v41  ;;  %v3093_v32 = vcombine.high %v3091_v7, %v3091_v7 }
 0xc03   : >> { %4094 = vmatmul.mubr.msk.f32.vlgmr.msra.gmra.mrb[6].mxu0 %vm2275_vm9, %v3091_v7  ;;  %v3042_v15 = vsel %vm2068_vm4, %v3041_v22, %v3037_v9 }
 0xc04   : >> { %4354 = vmatpush3.bf16.msra.mxu0 %v4353_v30  ;;  %v3015_v34 = vpop.permute.xlu1 %3014  ;;  %4100 = vmatprep.mubr.msk.f32.mxu0 %vm4685_vm3, %v6696_v6  ;;  %v3053_v14 = vsel %vm2099_vm6, %v3042_v15, %v3052_v10 }
 0xc05   : >> { %v3050_v27 = vrot.slane %v3015_v34, %v6050_v12  ;;  %4355 = vmatprep.subr.bf16.mxu0 %v6763_v41 }
 0xc07   : >> { %4101 = vmatmul.mubr.msk.f32.vlgmr.msra.gmra.mrb[8].mxu0 %vm2275_vm9, %v3092_v35  ;;  %v3051_v36 = vsel %vm2068_vm4, %v3050_v27, %v3046_v25 }
 0xc08   : >> { %4357 = vmatpush3.bf16.msra.mxu0 %v4356_v29  ;;  %4107 = vmatprep.mubr.msk.f32.mxu0 %vm4685_vm3, %v6696_v6  ;;  %v3054_v17 = vsel %vm2101_vm7, %v3051_v36, %v3053_v14 }
 0xc09   : >> { %v3056_v3 = vsel %vm2104_vm8, %v3054_v17, 0.0 }
 0xc0a   : >> { %3057 = vadd.xlane.f32.xlu0 %v3056_v3 }
 0xc0b   : >> { %4108 = vmatmul.mubr.msk.f32.vlgmr.msra.gmra.mrb[10].mxu0 %vm2275_vm9, %v3093_v32 }
 0xc97   : >> { %v3058_v12 = vpop.xlane.xlu0 %3057 }
 0xc98   : >> { %4543 = vlog2.f32 %v3058_v12 }
 0xca2   : >> { %v4544_v41 = vpop.eup %4543 }
 0xca3   : >> { %v3060_v26 = vmul.f32 0.6931472, %v4544_v41 }
 0xca5   : >> { %v3061_v8 = vsub.f32 0.0, %v3060_v26 }
 0xca7   : >> { %v3065_v18 = vsel %vm6291_vm10, %v3061_v8, %v4663_v62  }
 0xca8   : >> { %v6800_v62 = vmov %v3065_v18  ;;  %3395 = vst.msk [vmem:[%s5819_s21] sm:$0xf] (%p1547_p11), %vm2104_vm8, %v3065_v18 }
 0xcd2   : >> { %v3162_v13 = vpop.f32.mrb[4].mxu0 }
 0xcd3   : >> { %v4088_v56 = vpop.f32.mrb[5].mxu0 }
 0xcd6   : >> { %v3234_v6 = vpop.f32.mrb[6].mxu0 }
 0xcd7   : >> { %v3386_v23 = vrot.slane %v3234_v6, 7  ;;  %v4095_v11 = vpop.f32.mrb[7].mxu0 }
 0xcd9   : >> { %v3387_v31 = vsel %vm2097_vm5, %v3386_v23, %v3162_v13 }
 0xcda   : >> { %v3306_v30 = vpop.f32.mrb[8].mxu0 }
 0xcdb   : >> { %v3388_v20 = vrot.slane %v3306_v30, 6  ;;  %v4102_v7 = vpop.f32.mrb[9].mxu0  ;;  %1549 = sbr.rel (!%p1547_p11) target bundleno = 501 (0x1f5), region = 158 }
 0xcdd   : >> { %v3389_v16 = vsel %vm2099_vm6, %v3388_v20, %v3387_v31  ;;  %v6801_v31 = vmov %v6798_v5 }
 0xcde   : >> { %v3378_v22 = vpop.f32.mrb[10].mxu0 }
 0xcdf   : >> { %v3390_v9 = vrot.slane %v3378_v22, 5  ;;  %v4109_v58 = vpop.f32.mrb[11].mxu0 }
 0xce1   : >> { %v3391_v58 = vsel %vm2101_vm7, %v3390_v9, %v3389_v16  }
 0xce2   : > { %4558 = shalt.err (!%p4555_p4)
}
 0xce3   : > { %s4559_s26 = scalar_lea.hbm %s6369_s28, 64  ;;  %s4563_s3 = scalar_lea.hbm %s6452_s19, 128 }
 0xce4   : > { %p4560_p7 = scmp.ne.s32.totalorder %s6369_s28, %s4559_s26  ;;  %p4564_p10 = scmp.lt.u32.totalorder %s6369_s28, %s6452_s19 }
 0xce5   : > { %p4565_p11 = scmp.lt.u32.totalorder %s4563_s3, %s4559_s26  ;;  %p4567_p13 = scmp.lt.u32.totalorder %s4559_s26, %s6369_s28 }
 0xce6   : > { %p4561_p8 = pnand %p4560_p7, %p4833_p5 }
 0xce7   : > { %p4566_p12 = por %p4565_p11, %p4564_p10 }
 0xce8   : > { %p4562_p9 = pneg %p4561_p8 }
 0xce9   : > { %p4568_p0 = por %p4567_p13, %p4566_p12 }
 0xceb   : > { %p4569_p1 = pnand %p4568_p0, %p4562_p9 }
 0xced   : > { %4572 = shalt.err (!%p4569_p1)
}
 0xcee   : > { %4374 = dma.vmem_to_hbm [thread:$0]  (%p4833_p5), %s3416_s20, 64, %s6369_s28, %s3397_s27  }
 0xcef   : > { %s6802_s23 = sld [smem:[#allocation165_spill]]  ;;  %s3428_s3 = sshll.u32 %s5819_s21, 4  ;;  %s3429_s3 = int_to_ptr.vmem [resolvable:$true] %s3428_s3 }
 0xcf0   : > { %s3402_s26 = scalar_lea.sflag [#allocation5], %s4844_s30  ;;  %s4573_s1 = scalar_lea.vmem %s3429_s3, 64 }
 0xcf1   : > { %p4574_p2 = scmp.ne.s32.totalorder %s3429_s3, %s4573_s1  ;;  %s4689_s29 = smov [#allocation4]  }
 0xcf2   : > { %s4577_s6 = sshll.u32 %s4689_s29, 4  ;;  %s4578_s6 = int_to_ptr.vmem [resolvable:$false] %s4577_s6 }
 0xcf3   : > { %p4575_p3 = pnand %p4574_p2, %p4833_p5  ;;  %s4579_s7 = scalar_lea.vmem %s4578_s6, 128 }
 0xcf4   : > { %p4580_p7 = scmp.lt.s32.totalorder %s3429_s3, %s4578_s6  ;;  %p4581_p8 = scmp.lt.s32.totalorder %s4579_s7, %s4573_s1 }
 0xcf5   : > { %s6803_s5 = smov %s6802_s23  ;;  %s6395_s24 = scalar_lea.hbm %s6802_s23, %s3604_s22 }
 0xcf6   : > { %p4576_p4 = pneg %p4575_p3  ;;  %p4582_p9 = por %p4581_p8, %p4580_p7 }
 0xcf8   : > { %p4583_p10 = pnand %p4582_p9, %p4576_p4 }
 0xcfa   : > { %4586 = shalt.err (!%p4583_p10)
}
 0xcfb   : > { %s4587_s2 = scalar_lea.hbm %s6395_s24, 64  ;;  %s4591_s22 = scalar_lea.hbm %s6803_s5, 128 }
 0xcfc   : > { %p4588_p11 = scmp.ne.s32.totalorder %s6395_s24, %s4587_s2  ;;  %p4592_p0 = scmp.lt.u32.totalorder %s6395_s24, %s6803_s5 }
 0xcfd   : > { %p4593_p1 = scmp.lt.u32.totalorder %s4591_s22, %s4587_s2  ;;  %p4595_p3 = scmp.lt.u32.totalorder %s4587_s2, %s6395_s24 }
 0xcfe   : > { %p4589_p12 = pnand %p4588_p11, %p4833_p5 }
 0xcff   : > { %p4594_p2 = por %p4593_p1, %p4592_p0 }
 0xd00   : > { %p4590_p13 = pneg %p4589_p12 }
 0xd01   : > { %p4596_p4 = por %p4595_p3, %p4594_p2 }
 0xd03   : > { %p4597_p7 = pnand %p4596_p4, %p4590_p13 }
 0xd05   : > { %4600 = shalt.err (!%p4597_p7)
}
 0xd06   : > { %4375 = dma.vmem_to_hbm [thread:$0]  (%p4833_p5), %s3429_s3, 64, %s6395_s24, %s3402_s26  }
 0xd07 PF: > { %s6804_s7 = sld [smem:[#allocation11_spill]]  ;;  %s6805_s20 = sld [smem:[#allocation8_spill]] }
 0xd0d   : > { %p4385_p8 = scmp.ge.s32.totalorder %s6804_s7, 2  ;;  %s3440_s25 = sand.u32 1, %s6805_s20  }
 0xd0e   : > { %s3441_s0 = scalar_lea.sflag [#allocation3], %s3440_s25 }
 0xd0f   : > { %p4379_p9 = pnand %p4385_p8, %p4837_p6 }
 0xd11   : > { %4638 = dma.done.wait (!%p4379_p9), %s3441_s0, 64  }
 0xd12   : > { %4640 = vsyncadd (!%p4379_p9), %s3441_s0, 4294967232  ;;  %s3450_s23 = scalar_lea.sflag [#allocation5], %s3440_s25 }
 0xd13   : > { %4642 = dma.done.wait (!%p4379_p9), %s3450_s23, 64  }
 0xd14   : > { %4644 = vsyncadd (!%p4379_p9), %s3450_s23, 4294967232  ;;  %s6807_s24 = sld [smem:[#allocation12_spill]]  ;;  %s6808_s1 = sld [smem:[#allocation9_spill]] }
 0xd15   : > { %s6809_s22 = sld [smem:[#allocation10_spill]]  ;;  %s6810_s23 = sld [smem:[#allocation13_spill]] }
 0xd1a   : > { %p34_p5 = scmp.ge.s32.totalorder %s6807_s24, 4  }
 0xd1c   :  { %36 = sbr.rel (!%p34_p5) target bundleno = 15 (0xf), region = 169 }
 0xd23   :  { %3455 = vsyncpa [#allocation3], 1 }
 0xd24   :  { %3457 = vsyncpa [#allocation3 + $0x1], 1 }
 0xd25   :  { %3458 = vsyncpa [#allocation5], 1 }
 0xd26   :  { %3460 = vsyncpa [#allocation5 + $0x1], 1 }

</bundles_post_ra>
